<compile_context>
chip_gen: v7x
topology: tpu7x:2x2x1
jax: 0.10.0
libtpu: 0.0.40
codegen_flags: <defaults>
</compile_context>

<pallas_src>
import functools

import jax
import jax.numpy as jnp
from jax.experimental import pallas as pl
from jax.experimental.pallas import tpu as pltpu

# ----------------------------------------------------------------------------
# Model hyper-parameters (small, ViT-style)
# ----------------------------------------------------------------------------
B = 2                              # batch
C = 4                              # input channels
IMG = 16                           # spatial (H == W)
PATCH = 4                          # patch size -> 4x4 = 16 patches
NUM_PATCHES = (IMG // PATCH) ** 2
N_TOK = NUM_PATCHES + 1            # + cls token = 17
N_PAD = 32                         # token rows padded once to 32 (8-aligned)
PATCH_FEAT = C * PATCH * PATCH     # 64
DIM = 32                           # embedding dim
HEADS = 4
HEAD_DIM = DIM // HEADS            # 8
MLP_DIM = 4 * DIM                  # 128
DEPTH = 2
NUM_CLASSES = 10
OUT_PAD = 128                      # lane-dense padded logits width
LN_EPS = 1e-6
NEG_INF = -1e30

B_STEP = B                         # batch elements stacked per grid step
assert B % B_STEP == 0


# ----------------------------------------------------------------------------
# Fused whole-model Pallas kernel (B_STEP batch elements per grid step)
# ----------------------------------------------------------------------------
def _ln(x, g, b):
    """Row-wise LayerNorm in f32 with affine params g/b of shape [1, D]."""
    mean = jnp.mean(x, axis=-1, keepdims=True)
    var = jnp.mean(jnp.square(x - mean), axis=-1, keepdims=True)
    return (x - mean) * jax.lax.rsqrt(var + LN_EPS) * g + b


def _vit_kernel(patches_ref, posb_ref, pew_ref, keymask_ref, headmask_ref,
                ln1g_ref, ln1b_ref,
                qw_ref, qb_ref, kw_ref, kb_ref, vw_ref, vb_ref,
                projw_ref, projb_ref,
                ln2g_ref, ln2b_ref, fc1w_ref, fc1b_ref, fc2w_ref, fc2b_ref,
                normg_ref, normb_ref, headw_ref, headb_ref,
                out_ref, *, b_step):
    f32 = jnp.float32
    bf16 = jnp.bfloat16

    head_mask = headmask_ref[...]          # [HEADS*N_PAD, DIM] f32 {0,1}
    key_mask = keymask_ref[...]            # [1, N_PAD] f32 {0, -1e30}

    # --- patch embedding + cls token + positional embedding ---
    # (conv bias + cls token are folded into posb on the host; padded rows are 0)
    p = patches_ref[...]                                            # [rows, 64] bf16
    x = jnp.dot(p, pew_ref[...], preferred_element_type=f32)
    x = x + jnp.tile(posb_ref[...], (b_step, 1))                    # [rows, DIM] f32

    for d in range(DEPTH):                                          # static unroll
        # ---- attention sub-block (pre-norm) ----
        h1 = _ln(x, ln1g_ref[d], ln1b_ref[d]).astype(bf16)
        # split Q/K/V matmuls (no sub-vreg lane slicing); scale folded into qw/qb
        q_all = jnp.dot(h1, qw_ref[d], preferred_element_type=f32) + qb_ref[d]
        k_all = (jnp.dot(h1, kw_ref[d], preferred_element_type=f32)
                 + kb_ref[d]).astype(bf16)
        v_all = (jnp.dot(h1, vw_ref[d], preferred_element_type=f32)
                 + vb_ref[d]).astype(bf16)

        attn_rows = []
        for b in range(b_step):                                     # per-image attention
            sl = slice(b * N_PAD, (b + 1) * N_PAD)
            q = q_all[sl]                                           # [N_PAD, DIM] f32
            k = k_all[sl]                                           # [N_PAD, DIM] bf16
            v = v_all[sl]                                           # [N_PAD, DIM] bf16

            # heads stacked along sublanes: row (h*N_PAD + n) holds head h, query n
            q_stack = (jnp.tile(q, (HEADS, 1)) * head_mask).astype(bf16)  # [128, DIM]
            s = jnp.einsum("nc,mc->nm", q_stack, k,
                           preferred_element_type=f32)              # [128, N_PAD]
            s = s + key_mask                                         # mask padded keys
            s = s - jnp.max(s, axis=-1, keepdims=True)
            ps = jnp.exp(s)
            ps = ps * pl.reciprocal(jnp.sum(ps, axis=-1, keepdims=True),
                                    approx=True)
            # one PV matmul against the full V; keep head-h columns per row group
            o = jnp.dot(ps.astype(bf16), v, preferred_element_type=f32)  # [128, DIM]
            o = o * head_mask
            acc = o[0:N_PAD]
            for h in range(1, HEADS):
                acc = acc + o[h * N_PAD:(h + 1) * N_PAD]            # head-concat output
            attn_rows.append(acc)                                   # [N_PAD, DIM]
        attn = attn_rows[0] if b_step == 1 else jnp.concatenate(attn_rows, axis=0)
        attn = jnp.dot(attn.astype(bf16), projw_ref[d],
                       preferred_element_type=f32) + projb_ref[d]
        x = x + attn

        # ---- MLP sub-block (pre-norm) ----
        h2 = _ln(x, ln2g_ref[d], ln2b_ref[d]).astype(bf16)
        m = jnp.dot(h2, fc1w_ref[d], preferred_element_type=f32) + fc1b_ref[d]
        m = jax.nn.gelu(m, approximate=True)        # tanh GELU -> EUP (approx of erf)
        m = jnp.dot(m.astype(bf16), fc2w_ref[d],
                    preferred_element_type=f32) + fc2b_ref[d]
        x = x + m

    # ---- final LN + classification head on the cls tokens (row b*N_PAD) ----
    if b_step == 1:
        cls = x[0:1, :]
    else:
        cls = jnp.concatenate([x[b * N_PAD:b * N_PAD + 1, :] for b in range(b_step)],
                              axis=0)                               # [b_step, DIM]
    cls = _ln(cls, normg_ref[...], normb_ref[...])
    logits = jnp.dot(cls.astype(bf16), headw_ref[...],
                     preferred_element_type=f32) + headb_ref[...]   # [b_step, OUT_PAD]
    out_ref[...] = logits.astype(out_ref.dtype)


# ----------------------------------------------------------------------------
# Parameter initialization (deterministic, synthetic — stands in for timm weights)
# ----------------------------------------------------------------------------
def init_params(key):
    keys = iter(jax.random.split(key, 64))
    nrm = lambda shape, std=0.02: std * jax.random.normal(next(keys), shape, jnp.float32)

    params = {
        "patch_w": nrm((DIM, C, PATCH, PATCH)),   # conv weight, PyTorch OIHW
        "patch_b": jnp.zeros((DIM,), jnp.float32),
        "cls_token": nrm((1, 1, DIM)),
        "pos_embed": nrm((1, N_TOK, DIM)),
        "blocks": [],
        "norm_g": jnp.ones((DIM,), jnp.float32),
        "norm_b": jnp.zeros((DIM,), jnp.float32),
        "head_w": nrm((DIM, NUM_CLASSES)),
        "head_b": jnp.zeros((NUM_CLASSES,), jnp.float32),
    }
    for _ in range(DEPTH):
        params["blocks"].append({
            "ln1_g": jnp.ones((DIM,), jnp.float32),
            "ln1_b": jnp.zeros((DIM,), jnp.float32),
            "qkv_w": nrm((DIM, 3 * DIM)),
            "qkv_b": jnp.zeros((3 * DIM,), jnp.float32),
            "proj_w": nrm((DIM, DIM)),
            "proj_b": jnp.zeros((DIM,), jnp.float32),
            "ln2_g": jnp.ones((DIM,), jnp.float32),
            "ln2_b": jnp.zeros((DIM,), jnp.float32),
            "fc1_w": nrm((DIM, MLP_DIM)),
            "fc1_b": jnp.zeros((MLP_DIM,), jnp.float32),
            "fc2_w": nrm((MLP_DIM, DIM)),
            "fc2_b": jnp.zeros((DIM,), jnp.float32),
        })
    return params


# ----------------------------------------------------------------------------
# One-time weight preparation (runs ONCE, outside the jitted forward)
# ----------------------------------------------------------------------------
def prepare_params(params):
    bf16 = jnp.bfloat16
    f32 = jnp.float32
    scale = HEAD_DIM ** -0.5

    # patch-embed weight as a [PATCH_FEAT, DIM] bf16 matmul operand
    pe_w = params["patch_w"].reshape(DIM, PATCH_FEAT).T.astype(bf16)

    # pos-embed slab with cls token and conv bias folded in, padded to N_PAD rows
    pos = params["pos_embed"][0]                              # [N_TOK, DIM]
    posb = jnp.zeros((N_PAD, DIM), f32)
    posb = posb.at[0].set(pos[0] + params["cls_token"][0, 0])
    posb = posb.at[1:N_TOK].set(pos[1:] + params["patch_b"])

    # additive key-padding mask (single row) and head block-diagonal mask
    key_mask = jnp.where(jnp.arange(N_PAD) < N_TOK, 0.0, NEG_INF
                         ).astype(f32)[None, :]               # [1, N_PAD]
    head_mask = ((jnp.arange(HEADS * N_PAD)[:, None] // N_PAD)
                 == (jnp.arange(DIM)[None, :] // HEAD_DIM)).astype(f32)  # [128, DIM]

    blocks = params["blocks"]
    stk = lambda f: jnp.stack([f(blk) for blk in blocks])

    prep = {
        "pe_w": pe_w,
        "posb": posb,
        "key_mask": key_mask,
        "head_mask": head_mask,
        "ln1_g": stk(lambda b: b["ln1_g"].reshape(1, DIM)),
        "ln1_b": stk(lambda b: b["ln1_b"].reshape(1, DIM)),
        # fused QKV split into Q/K/V; softmax scale folded into Q weight/bias
        "q_w": stk(lambda b: b["qkv_w"][:, :DIM] * scale).astype(bf16),
        "q_b": stk(lambda b: (b["qkv_b"][:DIM] * scale).reshape(1, DIM)),
        "k_w": stk(lambda b: b["qkv_w"][:, DIM:2 * DIM]).astype(bf16),
        "k_b": stk(lambda b: b["qkv_b"][DIM:2 * DIM].reshape(1, DIM)),
        "v_w": stk(lambda b: b["qkv_w"][:, 2 * DIM:]).astype(bf16),
        "v_b": stk(lambda b: b["qkv_b"][2 * DIM:].reshape(1, DIM)),
        "proj_w": stk(lambda b: b["proj_w"]).astype(bf16),
        "proj_b": stk(lambda b: b["proj_b"].reshape(1, DIM)),
        "ln2_g": stk(lambda b: b["ln2_g"].reshape(1, DIM)),
        "ln2_b": stk(lambda b: b["ln2_b"].reshape(1, DIM)),
        "fc1_w": stk(lambda b: b["fc1_w"]).astype(bf16),
        "fc1_b": stk(lambda b: b["fc1_b"].reshape(1, MLP_DIM)),
        "fc2_w": stk(lambda b: b["fc2_w"]).astype(bf16),
        "fc2_b": stk(lambda b: b["fc2_b"].reshape(1, DIM)),
        "norm_g": params["norm_g"].reshape(1, DIM),
        "norm_b": params["norm_b"].reshape(1, DIM),
        # lane-dense (128-wide) classification head
        "head_w": jnp.zeros((DIM, OUT_PAD), f32
                            ).at[:, :NUM_CLASSES].set(params["head_w"]).astype(bf16),
        "head_b": jnp.zeros((1, OUT_PAD), f32
                            ).at[0, :NUM_CLASSES].set(params["head_b"]),
    }
    return prep


# ----------------------------------------------------------------------------
# Forward pass: one fused pallas_call over the whole (stacked) batch
# ----------------------------------------------------------------------------
def _full_spec(shape):
    nd = len(shape)
    return pl.BlockSpec(shape, lambda i, _nd=nd: (0,) * _nd)


def vit_forward(prep, x):
    """x: [B, C, H, W] (NCHW, matching the PyTorch module) -> logits [B, classes]."""
    b = x.shape[0]
    assert b % B_STEP == 0
    grid = (b // B_STEP,)

    # host-side patch extraction + row padding (cls slot = row 0, pads zero), bf16
    hp, wp = IMG // PATCH, IMG // PATCH
    p = x.reshape(b, C, hp, PATCH, wp, PATCH).transpose(0, 2, 4, 1, 3, 5)
    p = p.reshape(b, NUM_PATCHES, PATCH_FEAT)
    patches = jnp.zeros((b, N_PAD, PATCH_FEAT), jnp.bfloat16)
    patches = patches.at[:, 1:1 + NUM_PATCHES, :].set(p.astype(jnp.bfloat16))
    patches = patches.reshape(b * N_PAD, PATCH_FEAT)          # batch-stacked rows

    weights = (prep["posb"], prep["pe_w"], prep["key_mask"], prep["head_mask"],
               prep["ln1_g"], prep["ln1_b"],
               prep["q_w"], prep["q_b"], prep["k_w"], prep["k_b"],
               prep["v_w"], prep["v_b"],
               prep["proj_w"], prep["proj_b"],
               prep["ln2_g"], prep["ln2_b"],
               prep["fc1_w"], prep["fc1_b"], prep["fc2_w"], prep["fc2_b"],
               prep["norm_g"], prep["norm_b"], prep["head_w"], prep["head_b"])

    in_specs = [pl.BlockSpec((B_STEP * N_PAD, PATCH_FEAT), lambda i: (i, 0))]
    in_specs += [_full_spec(w.shape) for w in weights]

    out = pl.pallas_call(
        functools.partial(_vit_kernel, b_step=B_STEP),
        out_shape=jax.ShapeDtypeStruct((b, OUT_PAD), jnp.float32),
        grid=grid,
        in_specs=in_specs,
        out_specs=pl.BlockSpec((B_STEP, OUT_PAD), lambda i: (i, 0)),
        compiler_params=pltpu.CompilerParams(
            dimension_semantics=("parallel",)),
    )(patches, *weights)

    # nn.Dropout(0.5) on the logits: identity in eval/inference mode.
    # TODO(synk): training-mode dropout (random mask + 1/(1-p) scaling) not applied.
    return out[:, :NUM_CLASSES]


if __name__ == "__main__":
    key = jax.random.PRNGKey(0)
    pkey, xkey = jax.random.split(key)
    params = init_params(pkey)
    prep = prepare_params(params)                 # one-time weight prep (outside jit)
    x = jax.random.normal(xkey, (B, C, IMG, IMG), dtype=jnp.float32)

    fwd = jax.jit(vit_forward)
    logits = jax.block_until_ready(fwd(prep, x))

    assert logits.shape == (B, NUM_CLASSES)
    assert bool(jnp.all(jnp.isfinite(logits)))
    print("KERNEL_OK")
</pallas_src>

<mosaic_0001>
module attributes {stable_mosaic.version = 11 : i64} {
  func.func @_vit_kernel(%arg0: i32, %arg1: memref<64x64xbf16, #tpu.memory_space<vmem>>, %arg2: memref<32x32xf32, #tpu.memory_space<vmem>>, %arg3: memref<64x32xbf16, #tpu.memory_space<vmem>>, %arg4: memref<1x32xf32, #tpu.memory_space<vmem>>, %arg5: memref<128x32xf32, #tpu.memory_space<vmem>>, %arg6: memref<2x1x32xf32, #tpu.memory_space<vmem>>, %arg7: memref<2x1x32xf32, #tpu.memory_space<vmem>>, %arg8: memref<2x32x32xbf16, #tpu.memory_space<vmem>>, %arg9: memref<2x1x32xf32, #tpu.memory_space<vmem>>, %arg10: memref<2x32x32xbf16, #tpu.memory_space<vmem>>, %arg11: memref<2x1x32xf32, #tpu.memory_space<vmem>>, %arg12: memref<2x32x32xbf16, #tpu.memory_space<vmem>>, %arg13: memref<2x1x32xf32, #tpu.memory_space<vmem>>, %arg14: memref<2x32x32xbf16, #tpu.memory_space<vmem>>, %arg15: memref<2x1x32xf32, #tpu.memory_space<vmem>>, %arg16: memref<2x1x32xf32, #tpu.memory_space<vmem>>, %arg17: memref<2x1x32xf32, #tpu.memory_space<vmem>>, %arg18: memref<2x32x128xbf16, #tpu.memory_space<vmem>>, %arg19: memref<2x1x128xf32, #tpu.memory_space<vmem>>, %arg20: memref<2x128x32xbf16, #tpu.memory_space<vmem>>, %arg21: memref<2x1x32xf32, #tpu.memory_space<vmem>>, %arg22: memref<1x32xf32, #tpu.memory_space<vmem>>, %arg23: memref<1x32xf32, #tpu.memory_space<vmem>>, %arg24: memref<32x128xbf16, #tpu.memory_space<vmem>>, %arg25: memref<1x128xf32, #tpu.memory_space<vmem>>, %arg26: memref<2x128xf32, #tpu.memory_space<vmem>>) attributes {dimension_semantics = [#tpu.dimension_semantics<parallel>], iteration_bounds = array<i64: 1>, scalar_prefetch = 0 : i64, scratch_operands = 0 : i64, tpu.core_type = #tpu.core_type<tc>, window_params = [{transform_indices = @transform_0, window_bounds = array<i64: 64, 64>}, {pipeline_mode = #tpu.pipeline_mode<synchronous>, transform_indices = @transform_1, window_bounds = array<i64: 32, 32>}, {pipeline_mode = #tpu.pipeline_mode<synchronous>, transform_indices = @transform_2, window_bounds = array<i64: 64, 32>}, {pipeline_mode = #tpu.pipeline_mode<synchronous>, transform_indices = @transform_3, window_bounds = array<i64: 1, 32>}, {pipeline_mode = #tpu.pipeline_mode<synchronous>, transform_indices = @transform_4, window_bounds = array<i64: 128, 32>}, {pipeline_mode = #tpu.pipeline_mode<synchronous>, transform_indices = @transform_5, window_bounds = array<i64: 2, 1, 32>}, {pipeline_mode = #tpu.pipeline_mode<synchronous>, transform_indices = @transform_6, window_bounds = array<i64: 2, 1, 32>}, {pipeline_mode = #tpu.pipeline_mode<synchronous>, transform_indices = @transform_7, window_bounds = array<i64: 2, 32, 32>}, {pipeline_mode = #tpu.pipeline_mode<synchronous>, transform_indices = @transform_8, window_bounds = array<i64: 2, 1, 32>}, {pipeline_mode = #tpu.pipeline_mode<synchronous>, transform_indices = @transform_9, window_bounds = array<i64: 2, 32, 32>}, {pipeline_mode = #tpu.pipeline_mode<synchronous>, transform_indices = @transform_10, window_bounds = array<i64: 2, 1, 32>}, {pipeline_mode = #tpu.pipeline_mode<synchronous>, transform_indices = @transform_11, window_bounds = array<i64: 2, 32, 32>}, {pipeline_mode = #tpu.pipeline_mode<synchronous>, transform_indices = @transform_12, window_bounds = array<i64: 2, 1, 32>}, {pipeline_mode = #tpu.pipeline_mode<synchronous>, transform_indices = @transform_13, window_bounds = array<i64: 2, 32, 32>}, {pipeline_mode = #tpu.pipeline_mode<synchronous>, transform_indices = @transform_14, window_bounds = array<i64: 2, 1, 32>}, {pipeline_mode = #tpu.pipeline_mode<synchronous>, transform_indices = @transform_15, window_bounds = array<i64: 2, 1, 32>}, {pipeline_mode = #tpu.pipeline_mode<synchronous>, transform_indices = @transform_16, window_bounds = array<i64: 2, 1, 32>}, {pipeline_mode = #tpu.pipeline_mode<synchronous>, transform_indices = @transform_17, window_bounds = array<i64: 2, 32, 128>}, {pipeline_mode = #tpu.pipeline_mode<synchronous>, transform_indices = @transform_18, window_bounds = array<i64: 2, 1, 128>}, {pipeline_mode = #tpu.pipeline_mode<synchronous>, transform_indices = @transform_19, window_bounds = array<i64: 2, 128, 32>}, {pipeline_mode = #tpu.pipeline_mode<synchronous>, transform_indices = @transform_20, window_bounds = array<i64: 2, 1, 32>}, {pipeline_mode = #tpu.pipeline_mode<synchronous>, transform_indices = @transform_21, window_bounds = array<i64: 1, 32>}, {pipeline_mode = #tpu.pipeline_mode<synchronous>, transform_indices = @transform_22, window_bounds = array<i64: 1, 32>}, {pipeline_mode = #tpu.pipeline_mode<synchronous>, transform_indices = @transform_23, window_bounds = array<i64: 32, 128>}, {pipeline_mode = #tpu.pipeline_mode<synchronous>, transform_indices = @transform_24, window_bounds = array<i64: 1, 128>}, {transform_indices = @transform_25, window_bounds = array<i64: 2, 128>}]} {
    %c0 = arith.constant 0 : index
    %c0_0 = arith.constant 0 : index
    %0 = vector.load %arg5[%c0, %c0_0] : memref<128x32xf32, #tpu.memory_space<vmem>>, vector<128x32xf32>
    %c0_1 = arith.constant 0 : index
    %c0_2 = arith.constant 0 : index
    %1 = vector.load %arg4[%c0_1, %c0_2] : memref<1x32xf32, #tpu.memory_space<vmem>>, vector<1x32xf32>
    %c0_3 = arith.constant 0 : index
    %c0_4 = arith.constant 0 : index
    %2 = vector.load %arg1[%c0_3, %c0_4] : memref<64x64xbf16, #tpu.memory_space<vmem>>, vector<64x64xbf16>
    %c0_5 = arith.constant 0 : index
    %c0_6 = arith.constant 0 : index
    %3 = vector.load %arg3[%c0_5, %c0_6] : memref<64x32xbf16, #tpu.memory_space<vmem>>, vector<64x32xbf16>
    %cst = arith.constant dense<0.000000e+00> : vector<64x32xf32>
    %4 = tpu.matmul %2, %3, %cst {dimension_numbers = #tpu.dot_dimension_numbers<[1], [0], [0], [1], [0, 0, 1, 1], [], []>} : vector<64x64xbf16>, vector<64x32xbf16>, vector<64x32xf32> -> vector<64x32xf32>
    %c0_7 = arith.constant 0 : index
    %c0_8 = arith.constant 0 : index
    %5 = vector.load %arg2[%c0_7, %c0_8] : memref<32x32xf32, #tpu.memory_space<vmem>>, vector<32x32xf32>
    %6 = tpu.concatenate %5, %5 in 0 : vector<32x32xf32>, vector<32x32xf32> -> vector<64x32xf32>
    %7 = arith.addf %4, %6 : vector<64x32xf32>
    %c0_9 = arith.constant 0 : index
    %c0_10 = arith.constant 0 : index
    %c0_11 = arith.constant 0 : index
    %8 = vector.load %arg6[%c0_9, %c0_10, %c0_11] : memref<2x1x32xf32, #tpu.memory_space<vmem>>, vector<1x1x32xf32>
    %9 = vector.shape_cast %8 : vector<1x1x32xf32> to vector<1x32xf32>
    %c0_12 = arith.constant 0 : index
    %c0_13 = arith.constant 0 : index
    %c0_14 = arith.constant 0 : index
    %10 = vector.load %arg7[%c0_12, %c0_13, %c0_14] : memref<2x1x32xf32, #tpu.memory_space<vmem>>, vector<1x1x32xf32>
    %11 = vector.shape_cast %10 : vector<1x1x32xf32> to vector<1x32xf32>
    %cst_15 = arith.constant dense<0.000000e+00> : vector<64xf32>
    %12 = vector.multi_reduction <add>, %7, %cst_15 [1] : vector<64x32xf32> to vector<64xf32>
    %13 = vector.shape_cast %12 : vector<64xf32> to vector<64x1xf32>
    %cst_16 = arith.constant 3.200000e+01 : f32
    %14 = vector.broadcast %cst_16 : f32 to vector<64x1xf32>
    %15 = arith.divf %13, %14 : vector<64x1xf32>
    %16 = vector.broadcast %15 : vector<64x1xf32> to vector<64x32xf32>
    %17 = arith.subf %7, %16 : vector<64x32xf32>
    %18 = arith.mulf %17, %17 : vector<64x32xf32>
    %cst_17 = arith.constant dense<0.000000e+00> : vector<64xf32>
    %19 = vector.multi_reduction <add>, %18, %cst_17 [1] : vector<64x32xf32> to vector<64xf32>
    %20 = vector.shape_cast %19 : vector<64xf32> to vector<64x1xf32>
    %cst_18 = arith.constant 3.200000e+01 : f32
    %21 = vector.broadcast %cst_18 : f32 to vector<64x1xf32>
    %22 = arith.divf %20, %21 : vector<64x1xf32>
    %23 = vector.broadcast %15 : vector<64x1xf32> to vector<64x32xf32>
    %24 = arith.subf %7, %23 : vector<64x32xf32>
    %cst_19 = arith.constant 9.99999997E-7 : f32
    %25 = vector.broadcast %cst_19 : f32 to vector<64x1xf32>
    %26 = arith.addf %22, %25 : vector<64x1xf32>
    %27 = math.rsqrt %26 : vector<64x1xf32>
    %28 = vector.broadcast %27 : vector<64x1xf32> to vector<64x32xf32>
    %29 = arith.mulf %24, %28 : vector<64x32xf32>
    %30 = vector.broadcast %9 : vector<1x32xf32> to vector<64x32xf32>
    %31 = arith.mulf %29, %30 : vector<64x32xf32>
    %32 = vector.broadcast %11 : vector<1x32xf32> to vector<64x32xf32>
    %33 = arith.addf %31, %32 : vector<64x32xf32>
    %34 = arith.truncf %33 : vector<64x32xf32> to vector<64x32xbf16>
    %c0_20 = arith.constant 0 : index
    %c0_21 = arith.constant 0 : index
    %c0_22 = arith.constant 0 : index
    %35 = vector.load %arg8[%c0_20, %c0_21, %c0_22] : memref<2x32x32xbf16, #tpu.memory_space<vmem>>, vector<1x32x32xbf16>
    %36 = vector.shape_cast %35 : vector<1x32x32xbf16> to vector<32x32xbf16>
    %cst_23 = arith.constant dense<0.000000e+00> : vector<64x32xf32>
    %37 = tpu.matmul %34, %36, %cst_23 {dimension_numbers = #tpu.dot_dimension_numbers<[1], [0], [0], [1], [0, 0, 1, 1], [], []>} : vector<64x32xbf16>, vector<32x32xbf16>, vector<64x32xf32> -> vector<64x32xf32>
    %c0_24 = arith.constant 0 : index
    %c0_25 = arith.constant 0 : index
    %c0_26 = arith.constant 0 : index
    %38 = vector.load %arg9[%c0_24, %c0_25, %c0_26] : memref<2x1x32xf32, #tpu.memory_space<vmem>>, vector<1x1x32xf32>
    %39 = vector.shape_cast %38 : vector<1x1x32xf32> to vector<1x32xf32>
    %40 = vector.broadcast %39 : vector<1x32xf32> to vector<64x32xf32>
    %41 = arith.addf %37, %40 : vector<64x32xf32>
    %c0_27 = arith.constant 0 : index
    %c0_28 = arith.constant 0 : index
    %c0_29 = arith.constant 0 : index
    %42 = vector.load %arg10[%c0_27, %c0_28, %c0_29] : memref<2x32x32xbf16, #tpu.memory_space<vmem>>, vector<1x32x32xbf16>
    %43 = vector.shape_cast %42 : vector<1x32x32xbf16> to vector<32x32xbf16>
    %cst_30 = arith.constant dense<0.000000e+00> : vector<64x32xf32>
    %44 = tpu.matmul %34, %43, %cst_30 {dimension_numbers = #tpu.dot_dimension_numbers<[1], [0], [0], [1], [0, 0, 1, 1], [], []>} : vector<64x32xbf16>, vector<32x32xbf16>, vector<64x32xf32> -> vector<64x32xf32>
    %c0_31 = arith.constant 0 : index
    %c0_32 = arith.constant 0 : index
    %c0_33 = arith.constant 0 : index
    %45 = vector.load %arg11[%c0_31, %c0_32, %c0_33] : memref<2x1x32xf32, #tpu.memory_space<vmem>>, vector<1x1x32xf32>
    %46 = vector.shape_cast %45 : vector<1x1x32xf32> to vector<1x32xf32>
    %47 = vector.broadcast %46 : vector<1x32xf32> to vector<64x32xf32>
    %48 = arith.addf %44, %47 : vector<64x32xf32>
    %49 = arith.truncf %48 : vector<64x32xf32> to vector<64x32xbf16>
    %c0_34 = arith.constant 0 : index
    %c0_35 = arith.constant 0 : index
    %c0_36 = arith.constant 0 : index
    %50 = vector.load %arg12[%c0_34, %c0_35, %c0_36] : memref<2x32x32xbf16, #tpu.memory_space<vmem>>, vector<1x32x32xbf16>
    %51 = vector.shape_cast %50 : vector<1x32x32xbf16> to vector<32x32xbf16>
    %cst_37 = arith.constant dense<0.000000e+00> : vector<64x32xf32>
    %52 = tpu.matmul %34, %51, %cst_37 {dimension_numbers = #tpu.dot_dimension_numbers<[1], [0], [0], [1], [0, 0, 1, 1], [], []>} : vector<64x32xbf16>, vector<32x32xbf16>, vector<64x32xf32> -> vector<64x32xf32>
    %c0_38 = arith.constant 0 : index
    %c0_39 = arith.constant 0 : index
    %c0_40 = arith.constant 0 : index
    %53 = vector.load %arg13[%c0_38, %c0_39, %c0_40] : memref<2x1x32xf32, #tpu.memory_space<vmem>>, vector<1x1x32xf32>
    %54 = vector.shape_cast %53 : vector<1x1x32xf32> to vector<1x32xf32>
    %55 = vector.broadcast %54 : vector<1x32xf32> to vector<64x32xf32>
    %56 = arith.addf %52, %55 : vector<64x32xf32>
    %57 = arith.truncf %56 : vector<64x32xf32> to vector<64x32xbf16>
    %58 = vector.extract_strided_slice %41 {offsets = [0, 0], sizes = [32, 32], strides = [1, 1]} : vector<64x32xf32> to vector<32x32xf32>
    %59 = vector.extract_strided_slice %49 {offsets = [0, 0], sizes = [32, 32], strides = [1, 1]} : vector<64x32xbf16> to vector<32x32xbf16>
    %60 = vector.extract_strided_slice %57 {offsets = [0, 0], sizes = [32, 32], strides = [1, 1]} : vector<64x32xbf16> to vector<32x32xbf16>
    %61 = tpu.concatenate %58, %58, %58, %58 in 0 : vector<32x32xf32>, vector<32x32xf32>, vector<32x32xf32>, vector<32x32xf32> -> vector<128x32xf32>
    %62 = arith.mulf %61, %0 : vector<128x32xf32>
    %63 = arith.truncf %62 : vector<128x32xf32> to vector<128x32xbf16>
    "tpu.trace_start"() <{level = 10 : i32, message = "nc,mc->nm"}> : () -> ()
    %cst_41 = arith.constant dense<0.000000e+00> : vector<128x32xf32>
    %64 = tpu.matmul %63, %59, %cst_41 {dimension_numbers = #tpu.dot_dimension_numbers<[1], [1], [0], [0], [0, 0, 1, 0], [], []>} : vector<128x32xbf16>, vector<32x32xbf16>, vector<128x32xf32> -> vector<128x32xf32>
    "tpu.trace_stop"() : () -> ()
    %65 = vector.broadcast %1 : vector<1x32xf32> to vector<128x32xf32>
    %66 = arith.addf %64, %65 : vector<128x32xf32>
    %cst_42 = arith.constant dense<0xFF800000> : vector<128xf32>
    %67 = vector.multi_reduction <maximumf>, %66, %cst_42 [1] : vector<128x32xf32> to vector<128xf32>
    %68 = vector.shape_cast %67 : vector<128xf32> to vector<128x1xf32>
    %69 = vector.broadcast %68 : vector<128x1xf32> to vector<128x32xf32>
    %70 = arith.subf %66, %69 : vector<128x32xf32>
    %71 = math.exp %70 : vector<128x32xf32>
    %cst_43 = arith.constant dense<0.000000e+00> : vector<128xf32>
    %72 = vector.multi_reduction <add>, %71, %cst_43 [1] : vector<128x32xf32> to vector<128xf32>
    %73 = vector.shape_cast %72 : vector<128xf32> to vector<128x1xf32>
    %74 = tpu.reciprocal %73 {approx = true} : vector<128x1xf32> -> vector<128x1xf32>
    %75 = vector.broadcast %74 : vector<128x1xf32> to vector<128x32xf32>
    %76 = arith.mulf %71, %75 : vector<128x32xf32>
    %77 = arith.truncf %76 : vector<128x32xf32> to vector<128x32xbf16>
    %cst_44 = arith.constant dense<0.000000e+00> : vector<128x32xf32>
    %78 = tpu.matmul %77, %60, %cst_44 {dimension_numbers = #tpu.dot_dimension_numbers<[1], [0], [0], [1], [0, 0, 1, 1], [], []>} : vector<128x32xbf16>, vector<32x32xbf16>, vector<128x32xf32> -> vector<128x32xf32>
    %79 = arith.mulf %78, %0 : vector<128x32xf32>
    %80 = vector.extract_strided_slice %79 {offsets = [0, 0], sizes = [32, 32], strides = [1, 1]} : vector<128x32xf32> to vector<32x32xf32>
    %81 = vector.extract_strided_slice %79 {offsets = [32, 0], sizes = [32, 32], strides = [1, 1]} : vector<128x32xf32> to vector<32x32xf32>
    %82 = arith.addf %80, %81 : vector<32x32xf32>
    %83 = vector.extract_strided_slice %79 {offsets = [64, 0], sizes = [32, 32], strides = [1, 1]} : vector<128x32xf32> to vector<32x32xf32>
    %84 = arith.addf %82, %83 : vector<32x32xf32>
    %85 = vector.extract_strided_slice %79 {offsets = [96, 0], sizes = [32, 32], strides = [1, 1]} : vector<128x32xf32> to vector<32x32xf32>
    %86 = arith.addf %84, %85 : vector<32x32xf32>
    %87 = vector.extract_strided_slice %41 {offsets = [32, 0], sizes = [32, 32], strides = [1, 1]} : vector<64x32xf32> to vector<32x32xf32>
    %88 = vector.extract_strided_slice %49 {offsets = [32, 0], sizes = [32, 32], strides = [1, 1]} : vector<64x32xbf16> to vector<32x32xbf16>
    %89 = vector.extract_strided_slice %57 {offsets = [32, 0], sizes = [32, 32], strides = [1, 1]} : vector<64x32xbf16> to vector<32x32xbf16>
    %90 = tpu.concatenate %87, %87, %87, %87 in 0 : vector<32x32xf32>, vector<32x32xf32>, vector<32x32xf32>, vector<32x32xf32> -> vector<128x32xf32>
    %91 = arith.mulf %90, %0 : vector<128x32xf32>
    %92 = arith.truncf %91 : vector<128x32xf32> to vector<128x32xbf16>
    "tpu.trace_start"() <{level = 10 : i32, message = "nc,mc->nm"}> : () -> ()
    %cst_45 = arith.constant dense<0.000000e+00> : vector<128x32xf32>
    %93 = tpu.matmul %92, %88, %cst_45 {dimension_numbers = #tpu.dot_dimension_numbers<[1], [1], [0], [0], [0, 0, 1, 0], [], []>} : vector<128x32xbf16>, vector<32x32xbf16>, vector<128x32xf32> -> vector<128x32xf32>
    "tpu.trace_stop"() : () -> ()
    %94 = vector.broadcast %1 : vector<1x32xf32> to vector<128x32xf32>
    %95 = arith.addf %93, %94 : vector<128x32xf32>
    %cst_46 = arith.constant dense<0xFF800000> : vector<128xf32>
    %96 = vector.multi_reduction <maximumf>, %95, %cst_46 [1] : vector<128x32xf32> to vector<128xf32>
    %97 = vector.shape_cast %96 : vector<128xf32> to vector<128x1xf32>
    %98 = vector.broadcast %97 : vector<128x1xf32> to vector<128x32xf32>
    %99 = arith.subf %95, %98 : vector<128x32xf32>
    %100 = math.exp %99 : vector<128x32xf32>
    %cst_47 = arith.constant dense<0.000000e+00> : vector<128xf32>
    %101 = vector.multi_reduction <add>, %100, %cst_47 [1] : vector<128x32xf32> to vector<128xf32>
    %102 = vector.shape_cast %101 : vector<128xf32> to vector<128x1xf32>
    %103 = tpu.reciprocal %102 {approx = true} : vector<128x1xf32> -> vector<128x1xf32>
    %104 = vector.broadcast %103 : vector<128x1xf32> to vector<128x32xf32>
    %105 = arith.mulf %100, %104 : vector<128x32xf32>
    %106 = arith.truncf %105 : vector<128x32xf32> to vector<128x32xbf16>
    %cst_48 = arith.constant dense<0.000000e+00> : vector<128x32xf32>
    %107 = tpu.matmul %106, %89, %cst_48 {dimension_numbers = #tpu.dot_dimension_numbers<[1], [0], [0], [1], [0, 0, 1, 1], [], []>} : vector<128x32xbf16>, vector<32x32xbf16>, vector<128x32xf32> -> vector<128x32xf32>
    %108 = arith.mulf %107, %0 : vector<128x32xf32>
    %109 = vector.extract_strided_slice %108 {offsets = [0, 0], sizes = [32, 32], strides = [1, 1]} : vector<128x32xf32> to vector<32x32xf32>
    %110 = vector.extract_strided_slice %108 {offsets = [32, 0], sizes = [32, 32], strides = [1, 1]} : vector<128x32xf32> to vector<32x32xf32>
    %111 = arith.addf %109, %110 : vector<32x32xf32>
    %112 = vector.extract_strided_slice %108 {offsets = [64, 0], sizes = [32, 32], strides = [1, 1]} : vector<128x32xf32> to vector<32x32xf32>
    %113 = arith.addf %111, %112 : vector<32x32xf32>
    %114 = vector.extract_strided_slice %108 {offsets = [96, 0], sizes = [32, 32], strides = [1, 1]} : vector<128x32xf32> to vector<32x32xf32>
    %115 = arith.addf %113, %114 : vector<32x32xf32>
    %116 = tpu.concatenate %86, %115 in 0 : vector<32x32xf32>, vector<32x32xf32> -> vector<64x32xf32>
    %117 = arith.truncf %116 : vector<64x32xf32> to vector<64x32xbf16>
    %c0_49 = arith.constant 0 : index
    %c0_50 = arith.constant 0 : index
    %c0_51 = arith.constant 0 : index
    %118 = vector.load %arg14[%c0_49, %c0_50, %c0_51] : memref<2x32x32xbf16, #tpu.memory_space<vmem>>, vector<1x32x32xbf16>
    %119 = vector.shape_cast %118 : vector<1x32x32xbf16> to vector<32x32xbf16>
    %cst_52 = arith.constant dense<0.000000e+00> : vector<64x32xf32>
    %120 = tpu.matmul %117, %119, %cst_52 {dimension_numbers = #tpu.dot_dimension_numbers<[1], [0], [0], [1], [0, 0, 1, 1], [], []>} : vector<64x32xbf16>, vector<32x32xbf16>, vector<64x32xf32> -> vector<64x32xf32>
    %c0_53 = arith.constant 0 : index
    %c0_54 = arith.constant 0 : index
    %c0_55 = arith.constant 0 : index
    %121 = vector.load %arg15[%c0_53, %c0_54, %c0_55] : memref<2x1x32xf32, #tpu.memory_space<vmem>>, vector<1x1x32xf32>
    %122 = vector.shape_cast %121 : vector<1x1x32xf32> to vector<1x32xf32>
    %123 = vector.broadcast %122 : vector<1x32xf32> to vector<64x32xf32>
    %124 = arith.addf %120, %123 : vector<64x32xf32>
    %125 = arith.addf %7, %124 : vector<64x32xf32>
    %c0_56 = arith.constant 0 : index
    %c0_57 = arith.constant 0 : index
    %c0_58 = arith.constant 0 : index
    %126 = vector.load %arg16[%c0_56, %c0_57, %c0_58] : memref<2x1x32xf32, #tpu.memory_space<vmem>>, vector<1x1x32xf32>
    %127 = vector.shape_cast %126 : vector<1x1x32xf32> to vector<1x32xf32>
    %c0_59 = arith.constant 0 : index
    %c0_60 = arith.constant 0 : index
    %c0_61 = arith.constant 0 : index
    %128 = vector.load %arg17[%c0_59, %c0_60, %c0_61] : memref<2x1x32xf32, #tpu.memory_space<vmem>>, vector<1x1x32xf32>
    %129 = vector.shape_cast %128 : vector<1x1x32xf32> to vector<1x32xf32>
    %cst_62 = arith.constant dense<0.000000e+00> : vector<64xf32>
    %130 = vector.multi_reduction <add>, %125, %cst_62 [1] : vector<64x32xf32> to vector<64xf32>
    %131 = vector.shape_cast %130 : vector<64xf32> to vector<64x1xf32>
    %cst_63 = arith.constant 3.200000e+01 : f32
    %132 = vector.broadcast %cst_63 : f32 to vector<64x1xf32>
    %133 = arith.divf %131, %132 : vector<64x1xf32>
    %134 = vector.broadcast %133 : vector<64x1xf32> to vector<64x32xf32>
    %135 = arith.subf %125, %134 : vector<64x32xf32>
    %136 = arith.mulf %135, %135 : vector<64x32xf32>
    %cst_64 = arith.constant dense<0.000000e+00> : vector<64xf32>
    %137 = vector.multi_reduction <add>, %136, %cst_64 [1] : vector<64x32xf32> to vector<64xf32>
    %138 = vector.shape_cast %137 : vector<64xf32> to vector<64x1xf32>
    %cst_65 = arith.constant 3.200000e+01 : f32
    %139 = vector.broadcast %cst_65 : f32 to vector<64x1xf32>
    %140 = arith.divf %138, %139 : vector<64x1xf32>
    %141 = vector.broadcast %133 : vector<64x1xf32> to vector<64x32xf32>
    %142 = arith.subf %125, %141 : vector<64x32xf32>
    %cst_66 = arith.constant 9.99999997E-7 : f32
    %143 = vector.broadcast %cst_66 : f32 to vector<64x1xf32>
    %144 = arith.addf %140, %143 : vector<64x1xf32>
    %145 = math.rsqrt %144 : vector<64x1xf32>
    %146 = vector.broadcast %145 : vector<64x1xf32> to vector<64x32xf32>
    %147 = arith.mulf %142, %146 : vector<64x32xf32>
    %148 = vector.broadcast %127 : vector<1x32xf32> to vector<64x32xf32>
    %149 = arith.mulf %147, %148 : vector<64x32xf32>
    %150 = vector.broadcast %129 : vector<1x32xf32> to vector<64x32xf32>
    %151 = arith.addf %149, %150 : vector<64x32xf32>
    %152 = arith.truncf %151 : vector<64x32xf32> to vector<64x32xbf16>
    %c0_67 = arith.constant 0 : index
    %c0_68 = arith.constant 0 : index
    %c0_69 = arith.constant 0 : index
    %153 = vector.load %arg18[%c0_67, %c0_68, %c0_69] : memref<2x32x128xbf16, #tpu.memory_space<vmem>>, vector<1x32x128xbf16>
    %154 = vector.shape_cast %153 : vector<1x32x128xbf16> to vector<32x128xbf16>
    %cst_70 = arith.constant dense<0.000000e+00> : vector<64x128xf32>
    %155 = tpu.matmul %152, %154, %cst_70 {dimension_numbers = #tpu.dot_dimension_numbers<[1], [0], [0], [1], [0, 0, 1, 1], [], []>} : vector<64x32xbf16>, vector<32x128xbf16>, vector<64x128xf32> -> vector<64x128xf32>
    %c0_71 = arith.constant 0 : index
    %c0_72 = arith.constant 0 : index
    %c0_73 = arith.constant 0 : index
    %156 = vector.load %arg19[%c0_71, %c0_72, %c0_73] : memref<2x1x128xf32, #tpu.memory_space<vmem>>, vector<1x1x128xf32>
    %157 = vector.shape_cast %156 : vector<1x1x128xf32> to vector<1x128xf32>
    %158 = vector.broadcast %157 : vector<1x128xf32> to vector<64x128xf32>
    %159 = arith.addf %155, %158 : vector<64x128xf32>
    %160 = arith.mulf %159, %159 : vector<64x128xf32>
    %161 = arith.mulf %159, %160 : vector<64x128xf32>
    %cst_74 = arith.constant 4.471500e-02 : f32
    %162 = vector.broadcast %cst_74 : f32 to vector<64x128xf32>
    %163 = arith.mulf %162, %161 : vector<64x128xf32>
    %164 = arith.addf %159, %163 : vector<64x128xf32>
    %cst_75 = arith.constant 0.797884583 : f32
    %165 = vector.broadcast %cst_75 : f32 to vector<64x128xf32>
    %166 = arith.mulf %165, %164 : vector<64x128xf32>
    %167 = math.tanh %166 : vector<64x128xf32>
    %cst_76 = arith.constant 1.000000e+00 : f32
    %168 = vector.broadcast %cst_76 : f32 to vector<64x128xf32>
    %169 = arith.addf %168, %167 : vector<64x128xf32>
    %cst_77 = arith.constant 5.000000e-01 : f32
    %170 = vector.broadcast %cst_77 : f32 to vector<64x128xf32>
    %171 = arith.mulf %170, %169 : vector<64x128xf32>
    %172 = arith.mulf %159, %171 : vector<64x128xf32>
    %173 = arith.truncf %172 : vector<64x128xf32> to vector<64x128xbf16>
    %c0_78 = arith.constant 0 : index
    %c0_79 = arith.constant 0 : index
    %c0_80 = arith.constant 0 : index
    %174 = vector.load %arg20[%c0_78, %c0_79, %c0_80] : memref<2x128x32xbf16, #tpu.memory_space<vmem>>, vector<1x128x32xbf16>
    %175 = vector.shape_cast %174 : vector<1x128x32xbf16> to vector<128x32xbf16>
    %cst_81 = arith.constant dense<0.000000e+00> : vector<64x32xf32>
    %176 = tpu.matmul %173, %175, %cst_81 {dimension_numbers = #tpu.dot_dimension_numbers<[1], [0], [0], [1], [0, 0, 1, 1], [], []>} : vector<64x128xbf16>, vector<128x32xbf16>, vector<64x32xf32> -> vector<64x32xf32>
    %c0_82 = arith.constant 0 : index
    %c0_83 = arith.constant 0 : index
    %c0_84 = arith.constant 0 : index
    %177 = vector.load %arg21[%c0_82, %c0_83, %c0_84] : memref<2x1x32xf32, #tpu.memory_space<vmem>>, vector<1x1x32xf32>
    %178 = vector.shape_cast %177 : vector<1x1x32xf32> to vector<1x32xf32>
    %179 = vector.broadcast %178 : vector<1x32xf32> to vector<64x32xf32>
    %180 = arith.addf %176, %179 : vector<64x32xf32>
    %181 = arith.addf %125, %180 : vector<64x32xf32>
    %c1 = arith.constant 1 : index
    %c0_85 = arith.constant 0 : index
    %c0_86 = arith.constant 0 : index
    %182 = vector.load %arg6[%c1, %c0_85, %c0_86] : memref<2x1x32xf32, #tpu.memory_space<vmem>>, vector<1x1x32xf32>
    %183 = vector.shape_cast %182 : vector<1x1x32xf32> to vector<1x32xf32>
    %c1_87 = arith.constant 1 : index
    %c0_88 = arith.constant 0 : index
    %c0_89 = arith.constant 0 : index
    %184 = vector.load %arg7[%c1_87, %c0_88, %c0_89] : memref<2x1x32xf32, #tpu.memory_space<vmem>>, vector<1x1x32xf32>
    %185 = vector.shape_cast %184 : vector<1x1x32xf32> to vector<1x32xf32>
    %cst_90 = arith.constant dense<0.000000e+00> : vector<64xf32>
    %186 = vector.multi_reduction <add>, %181, %cst_90 [1] : vector<64x32xf32> to vector<64xf32>
    %187 = vector.shape_cast %186 : vector<64xf32> to vector<64x1xf32>
    %cst_91 = arith.constant 3.200000e+01 : f32
    %188 = vector.broadcast %cst_91 : f32 to vector<64x1xf32>
    %189 = arith.divf %187, %188 : vector<64x1xf32>
    %190 = vector.broadcast %189 : vector<64x1xf32> to vector<64x32xf32>
    %191 = arith.subf %181, %190 : vector<64x32xf32>
    %192 = arith.mulf %191, %191 : vector<64x32xf32>
    %cst_92 = arith.constant dense<0.000000e+00> : vector<64xf32>
    %193 = vector.multi_reduction <add>, %192, %cst_92 [1] : vector<64x32xf32> to vector<64xf32>
    %194 = vector.shape_cast %193 : vector<64xf32> to vector<64x1xf32>
    %cst_93 = arith.constant 3.200000e+01 : f32
    %195 = vector.broadcast %cst_93 : f32 to vector<64x1xf32>
    %196 = arith.divf %194, %195 : vector<64x1xf32>
    %197 = vector.broadcast %189 : vector<64x1xf32> to vector<64x32xf32>
    %198 = arith.subf %181, %197 : vector<64x32xf32>
    %cst_94 = arith.constant 9.99999997E-7 : f32
    %199 = vector.broadcast %cst_94 : f32 to vector<64x1xf32>
    %200 = arith.addf %196, %199 : vector<64x1xf32>
    %201 = math.rsqrt %200 : vector<64x1xf32>
    %202 = vector.broadcast %201 : vector<64x1xf32> to vector<64x32xf32>
    %203 = arith.mulf %198, %202 : vector<64x32xf32>
    %204 = vector.broadcast %183 : vector<1x32xf32> to vector<64x32xf32>
    %205 = arith.mulf %203, %204 : vector<64x32xf32>
    %206 = vector.broadcast %185 : vector<1x32xf32> to vector<64x32xf32>
    %207 = arith.addf %205, %206 : vector<64x32xf32>
    %208 = arith.truncf %207 : vector<64x32xf32> to vector<64x32xbf16>
    %c1_95 = arith.constant 1 : index
    %c0_96 = arith.constant 0 : index
    %c0_97 = arith.constant 0 : index
    %209 = vector.load %arg8[%c1_95, %c0_96, %c0_97] : memref<2x32x32xbf16, #tpu.memory_space<vmem>>, vector<1x32x32xbf16>
    %210 = vector.shape_cast %209 : vector<1x32x32xbf16> to vector<32x32xbf16>
    %cst_98 = arith.constant dense<0.000000e+00> : vector<64x32xf32>
    %211 = tpu.matmul %208, %210, %cst_98 {dimension_numbers = #tpu.dot_dimension_numbers<[1], [0], [0], [1], [0, 0, 1, 1], [], []>} : vector<64x32xbf16>, vector<32x32xbf16>, vector<64x32xf32> -> vector<64x32xf32>
    %c1_99 = arith.constant 1 : index
    %c0_100 = arith.constant 0 : index
    %c0_101 = arith.constant 0 : index
    %212 = vector.load %arg9[%c1_99, %c0_100, %c0_101] : memref<2x1x32xf32, #tpu.memory_space<vmem>>, vector<1x1x32xf32>
    %213 = vector.shape_cast %212 : vector<1x1x32xf32> to vector<1x32xf32>
    %214 = vector.broadcast %213 : vector<1x32xf32> to vector<64x32xf32>
    %215 = arith.addf %211, %214 : vector<64x32xf32>
    %c1_102 = arith.constant 1 : index
    %c0_103 = arith.constant 0 : index
    %c0_104 = arith.constant 0 : index
    %216 = vector.load %arg10[%c1_102, %c0_103, %c0_104] : memref<2x32x32xbf16, #tpu.memory_space<vmem>>, vector<1x32x32xbf16>
    %217 = vector.shape_cast %216 : vector<1x32x32xbf16> to vector<32x32xbf16>
    %cst_105 = arith.constant dense<0.000000e+00> : vector<64x32xf32>
    %218 = tpu.matmul %208, %217, %cst_105 {dimension_numbers = #tpu.dot_dimension_numbers<[1], [0], [0], [1], [0, 0, 1, 1], [], []>} : vector<64x32xbf16>, vector<32x32xbf16>, vector<64x32xf32> -> vector<64x32xf32>
    %c1_106 = arith.constant 1 : index
    %c0_107 = arith.constant 0 : index
    %c0_108 = arith.constant 0 : index
    %219 = vector.load %arg11[%c1_106, %c0_107, %c0_108] : memref<2x1x32xf32, #tpu.memory_space<vmem>>, vector<1x1x32xf32>
    %220 = vector.shape_cast %219 : vector<1x1x32xf32> to vector<1x32xf32>
    %221 = vector.broadcast %220 : vector<1x32xf32> to vector<64x32xf32>
    %222 = arith.addf %218, %221 : vector<64x32xf32>
    %223 = arith.truncf %222 : vector<64x32xf32> to vector<64x32xbf16>
    %c1_109 = arith.constant 1 : index
    %c0_110 = arith.constant 0 : index
    %c0_111 = arith.constant 0 : index
    %224 = vector.load %arg12[%c1_109, %c0_110, %c0_111] : memref<2x32x32xbf16, #tpu.memory_space<vmem>>, vector<1x32x32xbf16>
    %225 = vector.shape_cast %224 : vector<1x32x32xbf16> to vector<32x32xbf16>
    %cst_112 = arith.constant dense<0.000000e+00> : vector<64x32xf32>
    %226 = tpu.matmul %208, %225, %cst_112 {dimension_numbers = #tpu.dot_dimension_numbers<[1], [0], [0], [1], [0, 0, 1, 1], [], []>} : vector<64x32xbf16>, vector<32x32xbf16>, vector<64x32xf32> -> vector<64x32xf32>
    %c1_113 = arith.constant 1 : index
    %c0_114 = arith.constant 0 : index
    %c0_115 = arith.constant 0 : index
    %227 = vector.load %arg13[%c1_113, %c0_114, %c0_115] : memref<2x1x32xf32, #tpu.memory_space<vmem>>, vector<1x1x32xf32>
    %228 = vector.shape_cast %227 : vector<1x1x32xf32> to vector<1x32xf32>
    %229 = vector.broadcast %228 : vector<1x32xf32> to vector<64x32xf32>
    %230 = arith.addf %226, %229 : vector<64x32xf32>
    %231 = arith.truncf %230 : vector<64x32xf32> to vector<64x32xbf16>
    %232 = vector.extract_strided_slice %215 {offsets = [0, 0], sizes = [32, 32], strides = [1, 1]} : vector<64x32xf32> to vector<32x32xf32>
    %233 = vector.extract_strided_slice %223 {offsets = [0, 0], sizes = [32, 32], strides = [1, 1]} : vector<64x32xbf16> to vector<32x32xbf16>
    %234 = vector.extract_strided_slice %231 {offsets = [0, 0], sizes = [32, 32], strides = [1, 1]} : vector<64x32xbf16> to vector<32x32xbf16>
    %235 = tpu.concatenate %232, %232, %232, %232 in 0 : vector<32x32xf32>, vector<32x32xf32>, vector<32x32xf32>, vector<32x32xf32> -> vector<128x32xf32>
    %236 = arith.mulf %235, %0 : vector<128x32xf32>
    %237 = arith.truncf %236 : vector<128x32xf32> to vector<128x32xbf16>
    "tpu.trace_start"() <{level = 10 : i32, message = "nc,mc->nm"}> : () -> ()
    %cst_116 = arith.constant dense<0.000000e+00> : vector<128x32xf32>
    %238 = tpu.matmul %237, %233, %cst_116 {dimension_numbers = #tpu.dot_dimension_numbers<[1], [1], [0], [0], [0, 0, 1, 0], [], []>} : vector<128x32xbf16>, vector<32x32xbf16>, vector<128x32xf32> -> vector<128x32xf32>
    "tpu.trace_stop"() : () -> ()
    %239 = vector.broadcast %1 : vector<1x32xf32> to vector<128x32xf32>
    %240 = arith.addf %238, %239 : vector<128x32xf32>
    %cst_117 = arith.constant dense<0xFF800000> : vector<128xf32>
    %241 = vector.multi_reduction <maximumf>, %240, %cst_117 [1] : vector<128x32xf32> to vector<128xf32>
    %242 = vector.shape_cast %241 : vector<128xf32> to vector<128x1xf32>
    %243 = vector.broadcast %242 : vector<128x1xf32> to vector<128x32xf32>
    %244 = arith.subf %240, %243 : vector<128x32xf32>
    %245 = math.exp %244 : vector<128x32xf32>
    %cst_118 = arith.constant dense<0.000000e+00> : vector<128xf32>
    %246 = vector.multi_reduction <add>, %245, %cst_118 [1] : vector<128x32xf32> to vector<128xf32>
    %247 = vector.shape_cast %246 : vector<128xf32> to vector<128x1xf32>
    %248 = tpu.reciprocal %247 {approx = true} : vector<128x1xf32> -> vector<128x1xf32>
    %249 = vector.broadcast %248 : vector<128x1xf32> to vector<128x32xf32>
    %250 = arith.mulf %245, %249 : vector<128x32xf32>
    %251 = arith.truncf %250 : vector<128x32xf32> to vector<128x32xbf16>
    %cst_119 = arith.constant dense<0.000000e+00> : vector<128x32xf32>
    %252 = tpu.matmul %251, %234, %cst_119 {dimension_numbers = #tpu.dot_dimension_numbers<[1], [0], [0], [1], [0, 0, 1, 1], [], []>} : vector<128x32xbf16>, vector<32x32xbf16>, vector<128x32xf32> -> vector<128x32xf32>
    %253 = arith.mulf %252, %0 : vector<128x32xf32>
    %254 = vector.extract_strided_slice %253 {offsets = [0, 0], sizes = [32, 32], strides = [1, 1]} : vector<128x32xf32> to vector<32x32xf32>
    %255 = vector.extract_strided_slice %253 {offsets = [32, 0], sizes = [32, 32], strides = [1, 1]} : vector<128x32xf32> to vector<32x32xf32>
    %256 = arith.addf %254, %255 : vector<32x32xf32>
    %257 = vector.extract_strided_slice %253 {offsets = [64, 0], sizes = [32, 32], strides = [1, 1]} : vector<128x32xf32> to vector<32x32xf32>
    %258 = arith.addf %256, %257 : vector<32x32xf32>
    %259 = vector.extract_strided_slice %253 {offsets = [96, 0], sizes = [32, 32], strides = [1, 1]} : vector<128x32xf32> to vector<32x32xf32>
    %260 = arith.addf %258, %259 : vector<32x32xf32>
    %261 = vector.extract_strided_slice %215 {offsets = [32, 0], sizes = [32, 32], strides = [1, 1]} : vector<64x32xf32> to vector<32x32xf32>
    %262 = vector.extract_strided_slice %223 {offsets = [32, 0], sizes = [32, 32], strides = [1, 1]} : vector<64x32xbf16> to vector<32x32xbf16>
    %263 = vector.extract_strided_slice %231 {offsets = [32, 0], sizes = [32, 32], strides = [1, 1]} : vector<64x32xbf16> to vector<32x32xbf16>
    %264 = tpu.concatenate %261, %261, %261, %261 in 0 : vector<32x32xf32>, vector<32x32xf32>, vector<32x32xf32>, vector<32x32xf32> -> vector<128x32xf32>
    %265 = arith.mulf %264, %0 : vector<128x32xf32>
    %266 = arith.truncf %265 : vector<128x32xf32> to vector<128x32xbf16>
    "tpu.trace_start"() <{level = 10 : i32, message = "nc,mc->nm"}> : () -> ()
    %cst_120 = arith.constant dense<0.000000e+00> : vector<128x32xf32>
    %267 = tpu.matmul %266, %262, %cst_120 {dimension_numbers = #tpu.dot_dimension_numbers<[1], [1], [0], [0], [0, 0, 1, 0], [], []>} : vector<128x32xbf16>, vector<32x32xbf16>, vector<128x32xf32> -> vector<128x32xf32>
    "tpu.trace_stop"() : () -> ()
    %268 = vector.broadcast %1 : vector<1x32xf32> to vector<128x32xf32>
    %269 = arith.addf %267, %268 : vector<128x32xf32>
    %cst_121 = arith.constant dense<0xFF800000> : vector<128xf32>
    %270 = vector.multi_reduction <maximumf>, %269, %cst_121 [1] : vector<128x32xf32> to vector<128xf32>
    %271 = vector.shape_cast %270 : vector<128xf32> to vector<128x1xf32>
    %272 = vector.broadcast %271 : vector<128x1xf32> to vector<128x32xf32>
    %273 = arith.subf %269, %272 : vector<128x32xf32>
    %274 = math.exp %273 : vector<128x32xf32>
    %cst_122 = arith.constant dense<0.000000e+00> : vector<128xf32>
    %275 = vector.multi_reduction <add>, %274, %cst_122 [1] : vector<128x32xf32> to vector<128xf32>
    %276 = vector.shape_cast %275 : vector<128xf32> to vector<128x1xf32>
    %277 = tpu.reciprocal %276 {approx = true} : vector<128x1xf32> -> vector<128x1xf32>
    %278 = vector.broadcast %277 : vector<128x1xf32> to vector<128x32xf32>
    %279 = arith.mulf %274, %278 : vector<128x32xf32>
    %280 = arith.truncf %279 : vector<128x32xf32> to vector<128x32xbf16>
    %cst_123 = arith.constant dense<0.000000e+00> : vector<128x32xf32>
    %281 = tpu.matmul %280, %263, %cst_123 {dimension_numbers = #tpu.dot_dimension_numbers<[1], [0], [0], [1], [0, 0, 1, 1], [], []>} : vector<128x32xbf16>, vector<32x32xbf16>, vector<128x32xf32> -> vector<128x32xf32>
    %282 = arith.mulf %281, %0 : vector<128x32xf32>
    %283 = vector.extract_strided_slice %282 {offsets = [0, 0], sizes = [32, 32], strides = [1, 1]} : vector<128x32xf32> to vector<32x32xf32>
    %284 = vector.extract_strided_slice %282 {offsets = [32, 0], sizes = [32, 32], strides = [1, 1]} : vector<128x32xf32> to vector<32x32xf32>
    %285 = arith.addf %283, %284 : vector<32x32xf32>
    %286 = vector.extract_strided_slice %282 {offsets = [64, 0], sizes = [32, 32], strides = [1, 1]} : vector<128x32xf32> to vector<32x32xf32>
    %287 = arith.addf %285, %286 : vector<32x32xf32>
    %288 = vector.extract_strided_slice %282 {offsets = [96, 0], sizes = [32, 32], strides = [1, 1]} : vector<128x32xf32> to vector<32x32xf32>
    %289 = arith.addf %287, %288 : vector<32x32xf32>
    %290 = tpu.concatenate %260, %289 in 0 : vector<32x32xf32>, vector<32x32xf32> -> vector<64x32xf32>
    %291 = arith.truncf %290 : vector<64x32xf32> to vector<64x32xbf16>
    %c1_124 = arith.constant 1 : index
    %c0_125 = arith.constant 0 : index
    %c0_126 = arith.constant 0 : index
    %292 = vector.load %arg14[%c1_124, %c0_125, %c0_126] : memref<2x32x32xbf16, #tpu.memory_space<vmem>>, vector<1x32x32xbf16>
    %293 = vector.shape_cast %292 : vector<1x32x32xbf16> to vector<32x32xbf16>
    %cst_127 = arith.constant dense<0.000000e+00> : vector<64x32xf32>
    %294 = tpu.matmul %291, %293, %cst_127 {dimension_numbers = #tpu.dot_dimension_numbers<[1], [0], [0], [1], [0, 0, 1, 1], [], []>} : vector<64x32xbf16>, vector<32x32xbf16>, vector<64x32xf32> -> vector<64x32xf32>
    %c1_128 = arith.constant 1 : index
    %c0_129 = arith.constant 0 : index
    %c0_130 = arith.constant 0 : index
    %295 = vector.load %arg15[%c1_128, %c0_129, %c0_130] : memref<2x1x32xf32, #tpu.memory_space<vmem>>, vector<1x1x32xf32>
    %296 = vector.shape_cast %295 : vector<1x1x32xf32> to vector<1x32xf32>
    %297 = vector.broadcast %296 : vector<1x32xf32> to vector<64x32xf32>
    %298 = arith.addf %294, %297 : vector<64x32xf32>
    %299 = arith.addf %181, %298 : vector<64x32xf32>
    %c1_131 = arith.constant 1 : index
    %c0_132 = arith.constant 0 : index
    %c0_133 = arith.constant 0 : index
    %300 = vector.load %arg16[%c1_131, %c0_132, %c0_133] : memref<2x1x32xf32, #tpu.memory_space<vmem>>, vector<1x1x32xf32>
    %301 = vector.shape_cast %300 : vector<1x1x32xf32> to vector<1x32xf32>
    %c1_134 = arith.constant 1 : index
    %c0_135 = arith.constant 0 : index
    %c0_136 = arith.constant 0 : index
    %302 = vector.load %arg17[%c1_134, %c0_135, %c0_136] : memref<2x1x32xf32, #tpu.memory_space<vmem>>, vector<1x1x32xf32>
    %303 = vector.shape_cast %302 : vector<1x1x32xf32> to vector<1x32xf32>
    %cst_137 = arith.constant dense<0.000000e+00> : vector<64xf32>
    %304 = vector.multi_reduction <add>, %299, %cst_137 [1] : vector<64x32xf32> to vector<64xf32>
    %305 = vector.shape_cast %304 : vector<64xf32> to vector<64x1xf32>
    %cst_138 = arith.constant 3.200000e+01 : f32
    %306 = vector.broadcast %cst_138 : f32 to vector<64x1xf32>
    %307 = arith.divf %305, %306 : vector<64x1xf32>
    %308 = vector.broadcast %307 : vector<64x1xf32> to vector<64x32xf32>
    %309 = arith.subf %299, %308 : vector<64x32xf32>
    %310 = arith.mulf %309, %309 : vector<64x32xf32>
    %cst_139 = arith.constant dense<0.000000e+00> : vector<64xf32>
    %311 = vector.multi_reduction <add>, %310, %cst_139 [1] : vector<64x32xf32> to vector<64xf32>
    %312 = vector.shape_cast %311 : vector<64xf32> to vector<64x1xf32>
    %cst_140 = arith.constant 3.200000e+01 : f32
    %313 = vector.broadcast %cst_140 : f32 to vector<64x1xf32>
    %314 = arith.divf %312, %313 : vector<64x1xf32>
    %315 = vector.broadcast %307 : vector<64x1xf32> to vector<64x32xf32>
    %316 = arith.subf %299, %315 : vector<64x32xf32>
    %cst_141 = arith.constant 9.99999997E-7 : f32
    %317 = vector.broadcast %cst_141 : f32 to vector<64x1xf32>
    %318 = arith.addf %314, %317 : vector<64x1xf32>
    %319 = math.rsqrt %318 : vector<64x1xf32>
    %320 = vector.broadcast %319 : vector<64x1xf32> to vector<64x32xf32>
    %321 = arith.mulf %316, %320 : vector<64x32xf32>
    %322 = vector.broadcast %301 : vector<1x32xf32> to vector<64x32xf32>
    %323 = arith.mulf %321, %322 : vector<64x32xf32>
    %324 = vector.broadcast %303 : vector<1x32xf32> to vector<64x32xf32>
    %325 = arith.addf %323, %324 : vector<64x32xf32>
    %326 = arith.truncf %325 : vector<64x32xf32> to vector<64x32xbf16>
    %c1_142 = arith.constant 1 : index
    %c0_143 = arith.constant 0 : index
    %c0_144 = arith.constant 0 : index
    %327 = vector.load %arg18[%c1_142, %c0_143, %c0_144] : memref<2x32x128xbf16, #tpu.memory_space<vmem>>, vector<1x32x128xbf16>
    %328 = vector.shape_cast %327 : vector<1x32x128xbf16> to vector<32x128xbf16>
    %cst_145 = arith.constant dense<0.000000e+00> : vector<64x128xf32>
    %329 = tpu.matmul %326, %328, %cst_145 {dimension_numbers = #tpu.dot_dimension_numbers<[1], [0], [0], [1], [0, 0, 1, 1], [], []>} : vector<64x32xbf16>, vector<32x128xbf16>, vector<64x128xf32> -> vector<64x128xf32>
    %c1_146 = arith.constant 1 : index
    %c0_147 = arith.constant 0 : index
    %c0_148 = arith.constant 0 : index
    %330 = vector.load %arg19[%c1_146, %c0_147, %c0_148] : memref<2x1x128xf32, #tpu.memory_space<vmem>>, vector<1x1x128xf32>
    %331 = vector.shape_cast %330 : vector<1x1x128xf32> to vector<1x128xf32>
    %332 = vector.broadcast %331 : vector<1x128xf32> to vector<64x128xf32>
    %333 = arith.addf %329, %332 : vector<64x128xf32>
    %334 = arith.mulf %333, %333 : vector<64x128xf32>
    %335 = arith.mulf %333, %334 : vector<64x128xf32>
    %cst_149 = arith.constant 4.471500e-02 : f32
    %336 = vector.broadcast %cst_149 : f32 to vector<64x128xf32>
    %337 = arith.mulf %336, %335 : vector<64x128xf32>
    %338 = arith.addf %333, %337 : vector<64x128xf32>
    %cst_150 = arith.constant 0.797884583 : f32
    %339 = vector.broadcast %cst_150 : f32 to vector<64x128xf32>
    %340 = arith.mulf %339, %338 : vector<64x128xf32>
    %341 = math.tanh %340 : vector<64x128xf32>
    %cst_151 = arith.constant 1.000000e+00 : f32
    %342 = vector.broadcast %cst_151 : f32 to vector<64x128xf32>
    %343 = arith.addf %342, %341 : vector<64x128xf32>
    %cst_152 = arith.constant 5.000000e-01 : f32
    %344 = vector.broadcast %cst_152 : f32 to vector<64x128xf32>
    %345 = arith.mulf %344, %343 : vector<64x128xf32>
    %346 = arith.mulf %333, %345 : vector<64x128xf32>
    %347 = arith.truncf %346 : vector<64x128xf32> to vector<64x128xbf16>
    %c1_153 = arith.constant 1 : index
    %c0_154 = arith.constant 0 : index
    %c0_155 = arith.constant 0 : index
    %348 = vector.load %arg20[%c1_153, %c0_154, %c0_155] : memref<2x128x32xbf16, #tpu.memory_space<vmem>>, vector<1x128x32xbf16>
    %349 = vector.shape_cast %348 : vector<1x128x32xbf16> to vector<128x32xbf16>
    %cst_156 = arith.constant dense<0.000000e+00> : vector<64x32xf32>
    %350 = tpu.matmul %347, %349, %cst_156 {dimension_numbers = #tpu.dot_dimension_numbers<[1], [0], [0], [1], [0, 0, 1, 1], [], []>} : vector<64x128xbf16>, vector<128x32xbf16>, vector<64x32xf32> -> vector<64x32xf32>
    %c1_157 = arith.constant 1 : index
    %c0_158 = arith.constant 0 : index
    %c0_159 = arith.constant 0 : index
    %351 = vector.load %arg21[%c1_157, %c0_158, %c0_159] : memref<2x1x32xf32, #tpu.memory_space<vmem>>, vector<1x1x32xf32>
    %352 = vector.shape_cast %351 : vector<1x1x32xf32> to vector<1x32xf32>
    %353 = vector.broadcast %352 : vector<1x32xf32> to vector<64x32xf32>
    %354 = arith.addf %350, %353 : vector<64x32xf32>
    %355 = arith.addf %299, %354 : vector<64x32xf32>
    %356 = vector.extract_strided_slice %355 {offsets = [0, 0], sizes = [1, 32], strides = [1, 1]} : vector<64x32xf32> to vector<1x32xf32>
    %357 = vector.extract_strided_slice %355 {offsets = [32, 0], sizes = [1, 32], strides = [1, 1]} : vector<64x32xf32> to vector<1x32xf32>
    %358 = tpu.concatenate %356, %357 in 0 : vector<1x32xf32>, vector<1x32xf32> -> vector<2x32xf32>
    %c0_160 = arith.constant 0 : index
    %c0_161 = arith.constant 0 : index
    %359 = vector.load %arg22[%c0_160, %c0_161] : memref<1x32xf32, #tpu.memory_space<vmem>>, vector<1x32xf32>
    %c0_162 = arith.constant 0 : index
    %c0_163 = arith.constant 0 : index
    %360 = vector.load %arg23[%c0_162, %c0_163] : memref<1x32xf32, #tpu.memory_space<vmem>>, vector<1x32xf32>
    %cst_164 = arith.constant dense<0.000000e+00> : vector<2xf32>
    %361 = vector.multi_reduction <add>, %358, %cst_164 [1] : vector<2x32xf32> to vector<2xf32>
    %362 = vector.shape_cast %361 : vector<2xf32> to vector<2x1xf32>
    %cst_165 = arith.constant 3.200000e+01 : f32
    %363 = vector.broadcast %cst_165 : f32 to vector<2x1xf32>
    %364 = arith.divf %362, %363 : vector<2x1xf32>
    %365 = vector.broadcast %364 : vector<2x1xf32> to vector<2x32xf32>
    %366 = arith.subf %358, %365 : vector<2x32xf32>
    %367 = arith.mulf %366, %366 : vector<2x32xf32>
    %cst_166 = arith.constant dense<0.000000e+00> : vector<2xf32>
    %368 = vector.multi_reduction <add>, %367, %cst_166 [1] : vector<2x32xf32> to vector<2xf32>
    %369 = vector.shape_cast %368 : vector<2xf32> to vector<2x1xf32>
    %cst_167 = arith.constant 3.200000e+01 : f32
    %370 = vector.broadcast %cst_167 : f32 to vector<2x1xf32>
    %371 = arith.divf %369, %370 : vector<2x1xf32>
    %372 = vector.broadcast %364 : vector<2x1xf32> to vector<2x32xf32>
    %373 = arith.subf %358, %372 : vector<2x32xf32>
    %cst_168 = arith.constant 9.99999997E-7 : f32
    %374 = vector.broadcast %cst_168 : f32 to vector<2x1xf32>
    %375 = arith.addf %371, %374 : vector<2x1xf32>
    %376 = math.rsqrt %375 : vector<2x1xf32>
    %377 = vector.broadcast %376 : vector<2x1xf32> to vector<2x32xf32>
    %378 = arith.mulf %373, %377 : vector<2x32xf32>
    %379 = vector.broadcast %359 : vector<1x32xf32> to vector<2x32xf32>
    %380 = arith.mulf %378, %379 : vector<2x32xf32>
    %381 = vector.broadcast %360 : vector<1x32xf32> to vector<2x32xf32>
    %382 = arith.addf %380, %381 : vector<2x32xf32>
    %383 = arith.truncf %382 : vector<2x32xf32> to vector<2x32xbf16>
    %c0_169 = arith.constant 0 : index
    %c0_170 = arith.constant 0 : index
    %384 = vector.load %arg24[%c0_169, %c0_170] : memref<32x128xbf16, #tpu.memory_space<vmem>>, vector<32x128xbf16>
    %cst_171 = arith.constant dense<0.000000e+00> : vector<2x128xf32>
    %385 = tpu.matmul %383, %384, %cst_171 {dimension_numbers = #tpu.dot_dimension_numbers<[1], [0], [0], [1], [0, 0, 1, 1], [], []>} : vector<2x32xbf16>, vector<32x128xbf16>, vector<2x128xf32> -> vector<2x128xf32>
    %c0_172 = arith.constant 0 : index
    %c0_173 = arith.constant 0 : index
    %386 = vector.load %arg25[%c0_172, %c0_173] : memref<1x128xf32, #tpu.memory_space<vmem>>, vector<1x128xf32>
    %387 = vector.broadcast %386 : vector<1x128xf32> to vector<2x128xf32>
    %388 = arith.addf %385, %387 : vector<2x128xf32>
    %c0_174 = arith.constant 0 : index
    %c0_175 = arith.constant 0 : index
    %389 = vector.load %arg26[%c0_174, %c0_175] : memref<2x128xf32, #tpu.memory_space<vmem>>, vector<2x128xf32>
    tpu.vector_store %arg26[%c0_174, %c0_175], %388 {strides = array<i32>} : memref<2x128xf32, #tpu.memory_space<vmem>>, vector<2x128xf32>,
    return
  }
  func.func @transform_0(%arg0: i32) -> (i32, i32) {
    %c0_i32 = arith.constant 0 : i32
    %c0_i32_0 = arith.constant 0 : i32
    return %arg0, %c0_i32 : i32, i32
  }
  func.func @transform_1(%arg0: i32) -> (i32, i32) {
    %c0_i32 = arith.constant 0 : i32
    %c0_i32_0 = arith.constant 0 : i32
    %c0_i32_1 = arith.constant 0 : i32
    return %c0_i32, %c0_i32_0 : i32, i32
  }
  func.func @transform_2(%arg0: i32) -> (i32, i32) {
    %c0_i32 = arith.constant 0 : i32
    %c0_i32_0 = arith.constant 0 : i32
    %c0_i32_1 = arith.constant 0 : i32
    return %c0_i32, %c0_i32_0 : i32, i32
  }
  func.func @transform_3(%arg0: i32) -> (i32, i32) {
    %c0_i32 = arith.constant 0 : i32
    %c0_i32_0 = arith.constant 0 : i32
    %c0_i32_1 = arith.constant 0 : i32
    return %c0_i32, %c0_i32_0 : i32, i32
  }
  func.func @transform_4(%arg0: i32) -> (i32, i32) {
    %c0_i32 = arith.constant 0 : i32
    %c0_i32_0 = arith.constant 0 : i32
    %c0_i32_1 = arith.constant 0 : i32
    return %c0_i32, %c0_i32_0 : i32, i32
  }
  func.func @transform_5(%arg0: i32) -> (i32, i32, i32) {
    %c0_i32 = arith.constant 0 : i32
    %c0_i32_0 = arith.constant 0 : i32
    %c0_i32_1 = arith.constant 0 : i32
    %c0_i32_2 = arith.constant 0 : i32
    return %c0_i32, %c0_i32_0, %c0_i32_1 : i32, i32, i32
  }
  func.func @transform_6(%arg0: i32) -> (i32, i32, i32) {
    %c0_i32 = arith.constant 0 : i32
    %c0_i32_0 = arith.constant 0 : i32
    %c0_i32_1 = arith.constant 0 : i32
    %c0_i32_2 = arith.constant 0 : i32
    return %c0_i32, %c0_i32_0, %c0_i32_1 : i32, i32, i32
  }
  func.func @transform_7(%arg0: i32) -> (i32, i32, i32) {
    %c0_i32 = arith.constant 0 : i32
    %c0_i32_0 = arith.constant 0 : i32
    %c0_i32_1 = arith.constant 0 : i32
    %c0_i32_2 = arith.constant 0 : i32
    return %c0_i32, %c0_i32_0, %c0_i32_1 : i32, i32, i32
  }
  func.func @transform_8(%arg0: i32) -> (i32, i32, i32) {
    %c0_i32 = arith.constant 0 : i32
    %c0_i32_0 = arith.constant 0 : i32
    %c0_i32_1 = arith.constant 0 : i32
    %c0_i32_2 = arith.constant 0 : i32
    return %c0_i32, %c0_i32_0, %c0_i32_1 : i32, i32, i32
  }
  func.func @transform_9(%arg0: i32) -> (i32, i32, i32) {
    %c0_i32 = arith.constant 0 : i32
    %c0_i32_0 = arith.constant 0 : i32
    %c0_i32_1 = arith.constant 0 : i32
    %c0_i32_2 = arith.constant 0 : i32
    return %c0_i32, %c0_i32_0, %c0_i32_1 : i32, i32, i32
  }
  func.func @transform_10(%arg0: i32) -> (i32, i32, i32) {
    %c0_i32 = arith.constant 0 : i32
    %c0_i32_0 = arith.constant 0 : i32
    %c0_i32_1 = arith.constant 0 : i32
    %c0_i32_2 = arith.constant 0 : i32
    return %c0_i32, %c0_i32_0, %c0_i32_1 : i32, i32, i32
  }
  func.func @transform_11(%arg0: i32) -> (i32, i32, i32) {
    %c0_i32 = arith.constant 0 : i32
    %c0_i32_0 = arith.constant 0 : i32
    %c0_i32_1 = arith.constant 0 : i32
    %c0_i32_2 = arith.constant 0 : i32
    return %c0_i32, %c0_i32_0, %c0_i32_1 : i32, i32, i32
  }
  func.func @transform_12(%arg0: i32) -> (i32, i32, i32) {
    %c0_i32 = arith.constant 0 : i32
    %c0_i32_0 = arith.constant 0 : i32
    %c0_i32_1 = arith.constant 0 : i32
    %c0_i32_2 = arith.constant 0 : i32
    return %c0_i32, %c0_i32_0, %c0_i32_1 : i32, i32, i32
  }
  func.func @transform_13(%arg0: i32) -> (i32, i32, i32) {
    %c0_i32 = arith.constant 0 : i32
    %c0_i32_0 = arith.constant 0 : i32
    %c0_i32_1 = arith.constant 0 : i32
    %c0_i32_2 = arith.constant 0 : i32
    return %c0_i32, %c0_i32_0, %c0_i32_1 : i32, i32, i32
  }
  func.func @transform_14(%arg0: i32) -> (i32, i32, i32) {
    %c0_i32 = arith.constant 0 : i32
    %c0_i32_0 = arith.constant 0 : i32
    %c0_i32_1 = arith.constant 0 : i32
    %c0_i32_2 = arith.constant 0 : i32
    return %c0_i32, %c0_i32_0, %c0_i32_1 : i32, i32, i32
  }
  func.func @transform_15(%arg0: i32) -> (i32, i32, i32) {
    %c0_i32 = arith.constant 0 : i32
    %c0_i32_0 = arith.constant 0 : i32
    %c0_i32_1 = arith.constant 0 : i32
    %c0_i32_2 = arith.constant 0 : i32
    return %c0_i32, %c0_i32_0, %c0_i32_1 : i32, i32, i32
  }
  func.func @transform_16(%arg0: i32) -> (i32, i32, i32) {
    %c0_i32 = arith.constant 0 : i32
    %c0_i32_0 = arith.constant 0 : i32
    %c0_i32_1 = arith.constant 0 : i32
    %c0_i32_2 = arith.constant 0 : i32
    return %c0_i32, %c0_i32_0, %c0_i32_1 : i32, i32, i32
  }
  func.func @transform_17(%arg0: i32) -> (i32, i32, i32) {
    %c0_i32 = arith.constant 0 : i32
    %c0_i32_0 = arith.constant 0 : i32
    %c0_i32_1 = arith.constant 0 : i32
    %c0_i32_2 = arith.constant 0 : i32
    return %c0_i32, %c0_i32_0, %c0_i32_1 : i32, i32, i32
  }
  func.func @transform_18(%arg0: i32) -> (i32, i32, i32) {
    %c0_i32 = arith.constant 0 : i32
    %c0_i32_0 = arith.constant 0 : i32
    %c0_i32_1 = arith.constant 0 : i32
    %c0_i32_2 = arith.constant 0 : i32
    return %c0_i32, %c0_i32_0, %c0_i32_1 : i32, i32, i32
  }
  func.func @transform_19(%arg0: i32) -> (i32, i32, i32) {
    %c0_i32 = arith.constant 0 : i32
    %c0_i32_0 = arith.constant 0 : i32
    %c0_i32_1 = arith.constant 0 : i32
    %c0_i32_2 = arith.constant 0 : i32
    return %c0_i32, %c0_i32_0, %c0_i32_1 : i32, i32, i32
  }
  func.func @transform_20(%arg0: i32) -> (i32, i32, i32) {
    %c0_i32 = arith.constant 0 : i32
    %c0_i32_0 = arith.constant 0 : i32
    %c0_i32_1 = arith.constant 0 : i32
    %c0_i32_2 = arith.constant 0 : i32
    return %c0_i32, %c0_i32_0, %c0_i32_1 : i32, i32, i32
  }
  func.func @transform_21(%arg0: i32) -> (i32, i32) {
    %c0_i32 = arith.constant 0 : i32
    %c0_i32_0 = arith.constant 0 : i32
    %c0_i32_1 = arith.constant 0 : i32
    return %c0_i32, %c0_i32_0 : i32, i32
  }
  func.func @transform_22(%arg0: i32) -> (i32, i32) {
    %c0_i32 = arith.constant 0 : i32
    %c0_i32_0 = arith.constant 0 : i32
    %c0_i32_1 = arith.constant 0 : i32
    return %c0_i32, %c0_i32_0 : i32, i32
  }
  func.func @transform_23(%arg0: i32) -> (i32, i32) {
    %c0_i32 = arith.constant 0 : i32
    %c0_i32_0 = arith.constant 0 : i32
    %c0_i32_1 = arith.constant 0 : i32
    return %c0_i32, %c0_i32_0 : i32, i32
  }
  func.func @transform_24(%arg0: i32) -> (i32, i32) {
    %c0_i32 = arith.constant 0 : i32
    %c0_i32_0 = arith.constant 0 : i32
    %c0_i32_1 = arith.constant 0 : i32
    return %c0_i32, %c0_i32_0 : i32, i32
  }
  func.func @transform_25(%arg0: i32) -> (i32, i32) {
    %c0_i32 = arith.constant 0 : i32
    %c0_i32_0 = arith.constant 0 : i32
    return %arg0, %c0_i32 : i32, i32
  }
}

</mosaic_0001>

<bundles_post_ra>
// kernel: vit_forward.1
= control target key start
LH: loop header
LB: loop body
LE: loop exit
PB: predicated region body
PF: predicated region fallthrough
CT: control target
= control target key end

     0   :  { %s7548_s0 = inlined_call_operand.vmem [shape: bf16[64,64], index: 0, kind: input, shape index: {}]   ;;  %s7549_s1 = inlined_call_operand.vmem [shape: f32[32,32], index: 1, kind: input, shape index: {}]   ;;  %s7550_s2 = inlined_call_operand.vmem [shape: bf16[64,32], index: 2, kind: input, shape index: {}]   ;;  %s7551_s3 = inlined_call_operand.vmem [shape: f32[1,32], index: 3, kind: input, shape index: {}]   ;;  %s7552_s4 = inlined_call_operand.vmem [shape: f32[128,32], index: 4, kind: input, shape index: {}]   ;;  %s7553_s5 = inlined_call_operand.vmem [shape: f32[2,1,32], index: 5, kind: input, shape index: {}]   ;;  %s7554_s6 = inlined_call_operand.vmem [shape: f32[2,1,32], index: 6, kind: input, shape index: {}]   ;;  %s7555_s7 = inlined_call_operand.vmem [shape: bf16[2,32,32], index: 7, kind: input, shape index: {}]   ;;  %s7556_s8 = inlined_call_operand.vmem [shape: f32[2,1,32], index: 8, kind: input, shape index: {}]   ;;  %s7557_s9 = inlined_call_operand.vmem [shape: bf16[2,32,32], index: 9, kind: input, shape index: {}]   ;;  %s7558_s10 = inlined_call_operand.vmem [shape: f32[2,1,32], index: 10, kind: input, shape index: {}]   ;;  %s7559_s11 = inlined_call_operand.vmem [shape: bf16[2,32,32], index: 11, kind: input, shape index: {}]   ;;  %s7560_s12 = inlined_call_operand.vmem [shape: f32[2,1,32], index: 12, kind: input, shape index: {}]   ;;  %s7561_s13 = inlined_call_operand.vmem [shape: bf16[2,32,32], index: 13, kind: input, shape index: {}]   ;;  %s7562_s14 = inlined_call_operand.vmem [shape: f32[2,1,32], index: 14, kind: input, shape index: {}]   ;;  %s7563_s15 = inlined_call_operand.vmem [shape: f32[2,1,32], index: 15, kind: input, shape index: {}]   ;;  %s7564_s16 = inlined_call_operand.vmem [shape: f32[2,1,32], index: 16, kind: input, shape index: {}]   ;;  %s7565_s17 = inlined_call_operand.vmem [shape: bf16[2,32,128], index: 17, kind: input, shape index: {}]   ;;  %s7566_s18 = inlined_call_operand.vmem [shape: f32[2,1,128], index: 18, kind: input, shape index: {}]   ;;  %s7567_s19 = inlined_call_operand.vmem [shape: bf16[2,128,32], index: 19, kind: input, shape index: {}]   ;;  %s7568_s20 = inlined_call_operand.vmem [shape: f32[2,1,32], index: 20, kind: input, shape index: {}]   ;;  %s7569_s21 = inlined_call_operand.vmem [shape: f32[1,32], index: 21, kind: input, shape index: {}]   ;;  %s7570_s22 = inlined_call_operand.vmem [shape: f32[1,32], index: 22, kind: input, shape index: {}]   ;;  %s7571_s23 = inlined_call_operand.vmem [shape: bf16[32,128], index: 23, kind: input, shape index: {}]   ;;  %s7572_s24 = inlined_call_operand.vmem [shape: f32[1,128], index: 24, kind: input, shape index: {}]   ;;  %s7573_s25 = inlined_call_operand.hbm [shape: f32[2,128], index: 25, kind: output, shape index: {}]  }
   0x1   :  { %7585 = sst [smem:[#allocation5_spill]] %s7548_s0 }
   0x2   :  { %7586 = sst [smem:[#allocation6_spill]] %s7549_s1 }
   0x3   :  { %7587 = sst [smem:[#allocation7_spill]] %s7550_s2 }
   0x4   :  { %7588 = sst [smem:[#allocation8_spill]] %s7551_s3 }
   0x5   :  { %7589 = sst [smem:[#allocation9_spill]] %s7552_s4 }
   0x6   :  { %7590 = sst [smem:[#allocation10_spill]] %s7553_s5 }
   0x7   :  { %7591 = sst [smem:[#allocation11_spill]] %s7554_s6 }
   0x8   :  { %7592 = sst [smem:[#allocation12_spill]] %s7555_s7 }
   0x9   :  { %7593 = sst [smem:[#allocation13_spill]] %s7556_s8 }
   0xa   :  { %7594 = sst [smem:[#allocation14_spill]] %s7557_s9 }
   0xb   :  { %7595 = sst [smem:[#allocation15_spill]] %s7573_s25 }
   0xc   :  { %s7596_s6 = sld [smem:[#allocation7_spill]]  ;;  %vm163_vm0 = vcmask 523264   ;;  %s7597_s27 = sld [smem:[#allocation5_spill]] }
  0x12   :  { %v5057_v0 = vld [vmem:[%s7596_s6] sm:$0xff]   ;;  %v5058_v1 = vld [vmem:[%s7596_s6 + $0x8] sm:$0xff]   ;;  %v5059_v2 = vld [vmem:[%s7596_s6 + $0x10] sm:$0xff]  }
  0x13   :  { %4690 = vmatprep.subr.bf16.mxu0 %v5057_v0  ;;  %v5061_v3 = vld [vmem:[%s7597_s27] sm:$0xff]   ;;  %v5060_v4 = vld [vmem:[%s7596_s6 + $0x18] sm:$0xff]   ;;  %v5062_v5 = vld [vmem:[%s7597_s27 + $0x8] sm:$0xff]  }
  0x14   :  { %4691 = vmatpush3.bf16.msra.mxu0 %v5057_v0  ;;  %4698 = vmatprep.mubr.msk.bf16.mxu0 %vm163_vm0, %v5061_v3  ;;  %v5063_v6 = vld [vmem:[%s7597_s27 + $0x10] sm:$0xff]   ;;  %v5064_v7 = vld [vmem:[%s7597_s27 + $0x18] sm:$0xff]  }
  0x15   :  { %4692 = vmatprep.subr.bf16.mxu0 %v5058_v1 }
  0x18   :  { %4693 = vmatpush3.bf16.msra.mxu0 %v5058_v1 }
  0x19   :  { %4694 = vmatprep.subr.bf16.mxu0 %v5059_v2 }
  0x1c   :  { %4695 = vmatpush3.bf16.msra.mxu0 %v5059_v2 }
  0x1d   :  { %4696 = vmatprep.subr.bf16.mxu0 %v5060_v4 }
  0x20   :  { %4697 = vmatpush3.bf16.msra.mxu0 %v5060_v4 }
  0x23   :  { %4699 = vmatmul.mubr.msk.bf16.vlgmr.msra.gmra.mrb[0].mxu0 %vm163_vm0, %v5062_v5 }
  0x24   :  { %4702 = vmatprep.mubr.msk.bf16.mxu0 %vm163_vm0, %v5063_v6 }
  0x2b   :  { %4703 = vmatmul.mubr.msk.bf16.gmra.mrb[4].mxu0 %vm163_vm0, %v5064_v7 }
  0x2c   :  { %30 = vsyncpa [#allocation3], 0  ;;  %s7598_s3 = sld [smem:[#allocation6_spill]]  ;;  %vm243_vm1 = vcmask 261120   ;;  %s7599_s0 = sld [smem:[#allocation12_spill]]  ;;  %vm4176_vm2 = vcmask 1040384  }
  0x2d   :  { %s7600_s8 = sld [smem:[#allocation14_spill]]  ;;  %s7601_s28 = sld [smem:[#allocation10_spill]]  ;;  %vm4180_vm3 = vcmask 254976   ;;  %vm5531_vm4 = vmmov 0  }
  0x2e   :  { %s7602_s29 = sld [smem:[#allocation11_spill]]  ;;  %s7604_s4 = sld [smem:[#allocation9_spill]] }
  0x2f   :  { %s7605_s6 = sld [smem:[#allocation8_spill]] }
  0x32   :  { %v117_v8 = vld [vmem:[%s7598_s3 + $0x10] sm:$0xff]  ;;  %v115_v9 = vld [vmem:[%s7598_s3] sm:$0xff]  ;;  %v118_v11 = vld [vmem:[%s7598_s3 + $0x18] sm:$0xff] }
  0x33   :  { %v116_v14 = vld [vmem:[%s7598_s3 + $0x8] sm:$0xff]  ;;  %s7603_s3 = sld [smem:[#allocation13_spill]] }
  0xf6   :  { %v4700_v10 = vpop.f32.mrb[0].mxu0 }
  0xf7   :  { %v5696_v12 = vadd.f32 %v4700_v10, %v117_v8  ;;  %v210_v13 = vpop.f32.mrb[1].mxu0 }
  0xf8   :  { %v5701_v15 = vadd.f32 %v210_v13, %v115_v9  ;;  %v4701_v16 = vpop.f32.mrb[2].mxu0  ;;  %v5065_v13 = vld [vmem:[%s7599_s0] sm:$0xff]  }
  0xf9   :  { %v5703_v17 = vadd.f32 %v4701_v16, %v118_v11  ;;  %v213_v18 = vpop.f32.mrb[3].mxu0  ;;  %v250_v19 = vsel %vm243_vm1, %v5696_v12, 0.0  ;;  %v5067_v16 = vld [vmem:[%s7599_s0 + $0x8] sm:$0xff]   ;;  %4706 = vmatprep.subr.bf16.mxu1 %v5065_v13 }
  0xfa   :  { %v5707_v20 = vadd.f32 %v213_v18, %v116_v14  ;;  %251 = vadd.xlane.f32.xlu1 %v250_v19  ;;  %v244_v21 = vsel %vm243_vm1, %v5701_v15, 0.0  ;;  %4707 = vmatpush3.bf16.msra.mxu1 %v5065_v13  ;;  %v5068_v18 = vld [vmem:[%s7559_s11 + $0x8] sm:$0xff]   ;;  %v5794_v19 = vld [vmem:[%s7600_s8] sm:$0xff]  }
  0xfb   :  { %245 = vadd.xlane.f32.xlu0 %v244_v21  ;;  %v253_v22 = vsel %vm243_vm1, %v5703_v17, 0.0  ;;  %4708 = vmatprep.subr.bf16.mxu1 %v5067_v16 }
  0xfc   :  { %v247_v24 = vsel %vm243_vm1, %v5707_v20, 0.0 }
  0xfe   :  { %254 = vadd.xlane.f32.xlu1 %v253_v22  ;;  %v4704_v23 = vpop.f32.mrb[4].mxu0  ;;  %4709 = vmatpush3.bf16.msra.mxu1 %v5067_v16 }
  0xff   :  { %v226_v25 = vpop.f32.mrb[5].mxu0  ;;  %248 = vadd.xlane.f32.xlu0 %v247_v24  ;;  %v5717_v29 = vadd.f32 %v4704_v23, %v117_v8  ;;  %4718 = vmatprep.subr.bf16.mxu1 %v5794_v19 }
 0x100   :  { %v5715_v26 = vadd.f32 %v226_v25, %v115_v9  ;;  %v4705_v27 = vpop.f32.mrb[6].mxu0 }
 0x101   :  { %v229_v28 = vpop.f32.mrb[7].mxu0  ;;  %v5723_v32 = vadd.f32 %v4705_v27, %v118_v11  ;;  %v262_v34 = vsel %vm243_vm1, %v5717_v29, 0.0 }
 0x102   :  { %v5719_v30 = vadd.f32 %v229_v28, %v116_v14  ;;  %v256_v31 = vsel %vm243_vm1, %v5715_v26, 0.0  ;;  %v5066_v14 = vld [vmem:[%s7559_s11] sm:$0xff]  }
 0x103   :  { %257 = vadd.xlane.f32.xlu0 %v256_v31  ;;  %v265_v35 = vsel %vm243_vm1, %v5723_v32, 0.0  ;;  %4730 = vmatprep.subr.bf16.mxu0 %v5066_v14 }
 0x104   :  { %v259_v33 = vsel %vm243_vm1, %v5719_v30, 0.0  ;;  %4731 = vmatpush3.bf16.msra.mxu0 %v5066_v14 }
 0x105   :  { %260 = vadd.xlane.f32.xlu1 %v259_v33  ;;  %4732 = vmatprep.subr.bf16.mxu0 %v5068_v18 }
 0x107   :  { %263 = vadd.xlane.f32.xlu0 %v262_v34 }
 0x108   :  { %4733 = vmatpush3.bf16.msra.mxu0 %v5068_v18 }
 0x109   :  { %266 = vadd.xlane.f32.xlu1 %v265_v35 }
 0x187   :  { %v252_v36 = vpop.xlane.xlu1 %251 }
 0x188   :  { %v271_v37 = vmul.f32 0.03125, %v252_v36  ;;  %v246_v38 = vpop.xlane.xlu0 %245 }
 0x189   :  { %v269_v39 = vmul.f32 0.03125, %v246_v38 }
 0x18a   :  { %v5732_v40 = vsub.f32 %v5696_v12, %v271_v37 }
 0x18b   :  { %v5735_v41 = vsub.f32 %v5701_v15, %v269_v39  ;;  %v255_v42 = vpop.xlane.xlu1 %254 }
 0x18c   :  { %v272_v43 = vmul.f32 0.03125, %v255_v42  ;;  %v249_v44 = vpop.xlane.xlu0 %248  ;;  %v287_v50 = vmul.f32 %v5732_v40, %v5732_v40 }
 0x18d   :  { %v270_v45 = vmul.f32 0.03125, %v249_v44  ;;  %v285_v46 = vmul.f32 %v5735_v41, %v5735_v41 }
 0x18e   :  { %v5740_v47 = vsub.f32 %v5703_v17, %v272_v43  ;;  %v299_v58 = vsel %vm243_vm1, %v287_v50, 0.0 }
 0x18f   :  { %v5743_v48 = vsub.f32 %v5707_v20, %v270_v45  ;;  %v293_v49 = vsel %vm243_vm1, %v285_v46, 0.0 }
 0x190   :  { %294 = vadd.xlane.f32.xlu0 %v293_v49  ;;  %v258_v51 = vpop.xlane.xlu0 %257  ;;  %v288_v55 = vmul.f32 %v5740_v47, %v5740_v47 }
 0x191   :  { %v273_v52 = vmul.f32 0.03125, %v258_v51  ;;  %v286_v53 = vmul.f32 %v5743_v48, %v5743_v48 }
 0x192   :  { %v261_v54 = vpop.xlane.xlu1 %260  ;;  %v302_v1 = vsel %vm243_vm1, %v288_v55, 0.0 }
 0x193   :  { %v5753_v56 = vsub.f32 %v5715_v26, %v273_v52  ;;  %v274_v57 = vmul.f32 0.03125, %v261_v54  ;;  %v296_v59 = vsel %vm243_vm1, %v286_v53, 0.0  ;;  %v4302_v54 = vld [vmem:[%s7601_s28] ss:$0 sm:$0xff] }
 0x194   :  { %300 = vadd.xlane.f32.xlu0 %v299_v58  ;;  %297 = vadd.xlane.f32.xlu1 %v296_v59  ;;  %v264_v60 = vpop.xlane.xlu0 %263 }
 0x195   :  { %v5758_v61 = vsub.f32 %v5719_v30, %v274_v57  ;;  %v275_v62 = vmul.f32 0.03125, %v264_v60  ;;  %v289_v63 = vmul.f32 %v5753_v56, %v5753_v56 }
 0x196   :  { %v267_v0 = vpop.xlane.xlu1 %266 }
 0x197   :  { %v5764_v2 = vsub.f32 %v5717_v29, %v275_v62  ;;  %v276_v3 = vmul.f32 0.03125, %v267_v0  ;;  %v305_v4 = vsel %vm243_vm1, %v289_v63, 0.0  ;;  %v290_v5 = vmul.f32 %v5758_v61, %v5758_v61  ;;  %v4303_v62 = vld [vmem:[%s7602_s29] ss:$0 sm:$0xff] }
 0x198   :  { %303 = vadd.xlane.f32.xlu1 %v302_v1  ;;  %306 = vadd.xlane.f32.xlu0 %v305_v4 }
 0x199   :  { %v5770_v6 = vsub.f32 %v5723_v32, %v276_v3  ;;  %v291_v7 = vmul.f32 %v5764_v2, %v5764_v2  ;;  %v308_v8 = vsel %vm243_vm1, %v290_v5, 0.0 }
 0x19b   :  { %v311_v9 = vsel %vm243_vm1, %v291_v7, 0.0  ;;  %v292_v10 = vmul.f32 %v5770_v6, %v5770_v6 }
 0x19c   :  { %309 = vadd.xlane.f32.xlu1 %v308_v8  ;;  %312 = vadd.xlane.f32.xlu0 %v311_v9 }
 0x19d   :  { %v314_v11 = vsel %vm243_vm1, %v292_v10, 0.0 }
 0x1a0   :  { %315 = vadd.xlane.f32.xlu1 %v314_v11 }
 0x21d   :  { %v295_v21 = vpop.xlane.xlu0 %294 }
 0x21e   :  { %v317_v22 = vmul.f32 0.03125, %v295_v21 }
 0x220   :  { %v325_v23 = vadd.f32 1e-06, %v317_v22 }
 0x221   :  { %v298_v24 = vpop.xlane.xlu1 %297  ;;  %v301_v25 = vpop.xlane.xlu0 %300 }
 0x222   :  { %5103 = vrsqrt.f32 %v325_v23  ;;  %v318_v27 = vmul.f32 0.03125, %v298_v24  ;;  %v319_v28 = vmul.f32 0.03125, %v301_v25 }
 0x224   :  { %v326_v31 = vadd.f32 1e-06, %v318_v27  ;;  %v327_v33 = vadd.f32 1e-06, %v319_v28 }
 0x225   :  { %v304_v34 = vpop.xlane.xlu1 %303  ;;  %v307_v35 = vpop.xlane.xlu0 %306 }
 0x226   :  { %5105 = vrsqrt.f32 %v326_v31  ;;  %v320_v36 = vmul.f32 0.03125, %v304_v34  ;;  %v321_v37 = vmul.f32 0.03125, %v307_v35 }
 0x227   :  { %5107 = vrsqrt.f32 %v327_v33 }
 0x228   :  { %v328_v38 = vadd.f32 1e-06, %v320_v36  ;;  %v329_v39 = vadd.f32 1e-06, %v321_v37  ;;  %v5840_v36 = vld [vmem:[%s7560_s12] ss:$0 sm:$0xff] }
 0x229   :  { %v310_v42 = vpop.xlane.xlu1 %309  ;;  %v313_v43 = vpop.xlane.xlu0 %312  ;;  %v88_v37 = vld [vmem:[%s7604_s4 + $0x30] sm:$0xff] }
 0x22a   :  { %5109 = vrsqrt.f32 %v328_v38  ;;  %v322_v44 = vmul.f32 0.03125, %v310_v42  ;;  %v323_v45 = vmul.f32 0.03125, %v313_v43  ;;  %v92_v38 = vld [vmem:[%s7604_s4 + $0x50] sm:$0xff] }
 0x22b   :  { %5111 = vrsqrt.f32 %v329_v39  ;;  %v96_v39 = vld [vmem:[%s7604_s4 + $0x70] sm:$0xff] }
 0x22c   :  { %v5104_v46 = vpop.eup %5103  ;;  %v330_v49 = vadd.f32 1e-06, %v322_v44  ;;  %v331_v50 = vadd.f32 1e-06, %v323_v45  ;;  %v82_v45 = vld [vmem:[%s7604_s4] sm:$0xff] }
 0x22d   :  { %v316_v51 = vpop.xlane.xlu1 %315  ;;  %v341_v52 = vmul.f32 %v5104_v46, %v5735_v41  ;;  %v86_v46 = vld [vmem:[%s7604_s4 + $0x20] sm:$0xff] }
 0x22e   :  { %5113 = vrsqrt.f32 %v330_v49  ;;  %v324_v53 = vmul.f32 0.03125, %v316_v51 }
 0x22f   :  { %5115 = vrsqrt.f32 %v331_v50  ;;  %v355_v60 = vmul.f32 %v4302_v54, %v341_v52 }
 0x230   :  { %v5106_v55 = vpop.eup %5105  ;;  %v332_v57 = vadd.f32 1e-06, %v324_v53  ;;  %v90_v53 = vld [vmem:[%s7604_s4 + $0x40] sm:$0xff] }
 0x231   :  { %v5108_v58 = vpop.eup %5107  ;;  %v342_v59 = vmul.f32 %v5106_v55, %v5743_v48  ;;  %v369_v3 = vadd.f32 %v4303_v62, %v355_v60 }
 0x232   :  { %5117 = vrsqrt.f32 %v332_v57  ;;  %v343_v41 = vmul.f32 %v5108_v58, %v5732_v40  ;;  %v5870_v57 = vld [vmem:[%s7604_s4 + $0x18] sm:$0xff] }
 0x233   :  { %v356_v63 = vmul.f32 %v4302_v54, %v342_v59 }
 0x234   :  { %v5110_v0 = vpop.eup %5109  ;;  %v357_v7 = vmul.f32 %v4302_v54, %v343_v41 }
 0x235   :  { %v5112_v1 = vpop.eup %5111  ;;  %v370_v4 = vadd.f32 %v4303_v62, %v356_v63  ;;  %v344_v5 = vmul.f32 %v5110_v0, %v5740_v47  ;;  %v89_v0 = vld [vmem:[%s7604_s4 + $0x38] sm:$0xff] }
 0x236   :  { %v345_v8 = vmul.f32 %v5112_v1, %v5753_v56  ;;  %v371_v40 = vadd.f32 %v4303_v62, %v357_v7  ;;  %v5070_v56 = vld [vmem:[%s7600_s8 + $0x8] sm:$0xff]   ;;  %v93_v1 = vld [vmem:[%s7604_s4 + $0x58] sm:$0xff] }
 0x237   :  { %v377_v9 = vpack.c.bf16 %v370_v4, %v369_v3  ;;  %v358_v48 = vmul.f32 %v4302_v54, %v344_v5  ;;  %v97_v3 = vld [vmem:[%s7604_s4 + $0x78] sm:$0xff]  ;;  %v83_v7 = vld [vmem:[%s7604_s4 + $0x8] sm:$0xff] }
 0x238   :  { %v5114_v10 = vpop.eup %5113  ;;  %v359_v11 = vmul.f32 %v4302_v54, %v345_v8  ;;  %v87_v8 = vld [vmem:[%s7604_s4 + $0x28] sm:$0xff] }
 0x239   :  { %v5116_v13 = vpop.eup %5115  ;;  %4710 = vmatprep.mubr.msk.bf16.mxu1 %vm243_vm1, %v377_v9  ;;  %4734 = vmatprep.mubr.msk.bf16.mxu0 %vm243_vm1, %v377_v9  ;;  %v372_v14 = vadd.f32 %v4303_v62, %v358_v48  ;;  %v346_v16 = vmul.f32 %v5114_v10, %v5758_v61 }
 0x23a   :  { %v347_v18 = vmul.f32 %v5116_v13, %v5764_v2  ;;  %v373_v23 = vadd.f32 %v4303_v62, %v359_v11 }
 0x23b   :  { %v378_v21 = vpack.c.bf16 %v372_v14, %v371_v40  ;;  %v360_v47 = vmul.f32 %v4302_v54, %v346_v16  ;;  %v95_v16 = vld [vmem:[%s7604_s4 + $0x68] sm:$0xff] }
 0x23c   :  { %v5118_v22 = vpop.eup %5117  ;;  %v361_v27 = vmul.f32 %v4302_v54, %v347_v18 }
 0x23d   :  { %4711 = vmatmul.mubr.msk.bf16.vlgmr.msra.gmra.mrb[0].mxu1 %vm243_vm1, %v378_v21  ;;  %4735 = vmatmul.mubr.msk.bf16.vlgmr.msra.gmra.mrb[8].mxu0 %vm243_vm1, %v378_v21  ;;  %v374_v24 = vadd.f32 %v4303_v62, %v360_v47  ;;  %v348_v25 = vmul.f32 %v5118_v22, %v5770_v6  ;;  %v5830_v6 = vld [vmem:[%s7603_s3] ss:$0 sm:$0xff] }
 0x23e   :  { %4719 = vmatpush3.bf16.msra.mxu1 %v5794_v19  ;;  %v375_v28 = vadd.f32 %v4303_v62, %v361_v27  ;;  %v5835_v19 = vld [vmem:[%s7604_s4 + $0x10] sm:$0xff] }
 0x23f   :  { %v379_v61 = vpack.c.bf16 %v374_v24, %v373_v23  ;;  %v362_v2 = vmul.f32 %v4302_v54, %v348_v25  ;;  %4720 = vmatprep.subr.bf16.mxu1 %v5070_v56  ;;  %v94_v54 = vld [vmem:[%s7604_s4 + $0x60] sm:$0xff] }
 0x241   :  { %4714 = vmatprep.mubr.msk.bf16.mxu1 %vm243_vm1, %v379_v61  ;;  %4738 = vmatprep.mubr.msk.bf16.mxu0 %vm243_vm1, %v379_v61  ;;  %v376_v31 = vadd.f32 %v4303_v62, %v362_v2 }
 0x242   :  { %4721 = vmatpush3.bf16.msra.mxu1 %v5070_v56 }
 0x243   :  { %v380_v33 = vpack.c.bf16 %v376_v31, %v375_v28 }
 0x245   :  { %4715 = vmatmul.mubr.msk.bf16.gmra.mrb[4].mxu1 %vm243_vm1, %v380_v33  ;;  %4739 = vmatmul.mubr.msk.bf16.gmra.mrb[12].mxu0 %vm243_vm1, %v380_v33 }
 0x246   :  { %4722 = vmatprep.mubr.msk.bf16.mxu1 %vm243_vm1, %v377_v9  ;;  %v91_v9 = vld [vmem:[%s7604_s4 + $0x48] sm:$0xff] }
 0x24d   :  { %4723 = vmatmul.mubr.msk.bf16.vlgmr.msra.gmra.mrb[8].mxu1 %vm243_vm1, %v378_v21 }
 0x24e   :  { %4726 = vmatprep.mubr.msk.bf16.mxu1 %vm243_vm1, %v379_v61 }
 0x255   :  { %4727 = vmatmul.mubr.msk.bf16.gmra.mrb[12].mxu1 %vm243_vm1, %v380_v33 }
 0x310   :  { %v4712_v34 = vpop.f32.mrb[0].mxu1  ;;  %v4736_v35 = vpop.f32.mrb[8].mxu0 }
 0x311   :  { %v459_v42 = vadd.f32 %v4712_v34, %v5830_v6  ;;  %v450_v43 = vpop.f32.mrb[1].mxu1  ;;  %v630_v44 = vpop.f32.mrb[9].mxu0  ;;  %v639_v52 = vadd.f32 %v4736_v35, %v5840_v36 }
 0x312   :  { %v451_v49 = vadd.f32 %v5830_v6, %v450_v43  ;;  %v4713_v50 = vpop.f32.mrb[2].mxu1  ;;  %v4737_v51 = vpop.f32.mrb[10].mxu0  ;;  %v631_v55 = vadd.f32 %v5840_v36, %v630_v44 }
 0x313   :  { %v453_v58 = vpop.f32.mrb[3].mxu1  ;;  %v633_v59 = vpop.f32.mrb[11].mxu0  ;;  %v5873_v60 = vmul.f32 %v459_v42, %v5835_v19  ;;  %v5875_v62 = vmul.f32 %v459_v42, %v88_v37  ;;  %v5877_v41 = vmul.f32 %v459_v42, %v92_v38  ;;  %v5879_v63 = vmul.f32 %v459_v42, %v96_v39 }
 0x314   :  { %v462_v4 = vadd.f32 %v4713_v50, %v5830_v6  ;;  %v642_v5 = vadd.f32 %v4737_v51, %v5840_v36  ;;  %v454_v48 = vadd.f32 %v5830_v6, %v453_v58  ;;  %v634_v10 = vadd.f32 %v5840_v36, %v633_v59 }
 0x315   :  { %v665_v11 = vmul.f32 %v451_v49, %v82_v45  ;;  %v5903_v13 = vmul.f32 %v451_v49, %v86_v46  ;;  %v5905_v40 = vmul.f32 %v451_v49, %v90_v53  ;;  %v5907_v14 = vmul.f32 %v451_v49, %v94_v54 }
 0x316   :  { %v5913_v18 = vmul.f32 %v462_v4, %v5870_v57  ;;  %v5915_v21 = vmul.f32 %v462_v4, %v89_v0  ;;  %v5917_v47 = vmul.f32 %v462_v4, %v93_v1  ;;  %v5919_v56 = vmul.f32 %v462_v4, %v97_v3 }
 0x317   :  { %v662_v22 = vpack.c.bf16 %v642_v5, %v639_v52  ;;  %v666_v23 = vmul.f32 %v454_v48, %v83_v7  ;;  %v5921_v24 = vmul.f32 %v454_v48, %v87_v8  ;;  %v5923_v25 = vmul.f32 %v454_v48, %v91_v9 }
 0x318   :  { %v4716_v27 = vpop.f32.mrb[4].mxu1  ;;  %v4740_v61 = vpop.f32.mrb[12].mxu0  ;;  %v682_v2 = vpack.c.bf16 %v5913_v18, %v5873_v60  ;;  %v5927_v28 = vmul.f32 %v454_v48, %v95_v16  ;;  %v661_v31 = vpack.c.bf16 %v634_v10, %v631_v55  ;;  %v6032_v60 = vld [vmem:[%s7605_s6] ss:$0 sm:$0xff] }
 0x319   :  { %v475_v33 = vadd.f32 %v4716_v27, %v5830_v6  ;;  %v466_v34 = vpop.f32.mrb[5].mxu1  ;;  %v646_v35 = vpop.f32.mrb[13].mxu0  ;;  %v655_v42 = vadd.f32 %v4740_v61, %v5840_v36  ;;  %v681_v51 = vpack.c.bf16 %v666_v23, %v665_v11 }
 0x31a   :  { %v467_v43 = vadd.f32 %v5830_v6, %v466_v34  ;;  %v647_v44 = vadd.f32 %v5840_v36, %v646_v35  ;;  %v4717_v49 = vpop.f32.mrb[6].mxu1  ;;  %v4741_v50 = vpop.f32.mrb[14].mxu0  ;;  %4762 = vmatprep.subr.bf16.mxu0 %v661_v31 }
 0x31b   :  { %v5934_v52 = vmul.f32 %v475_v33, %v5835_v19  ;;  %v5936_v58 = vmul.f32 %v475_v33, %v88_v37  ;;  %v5938_v59 = vmul.f32 %v475_v33, %v92_v38  ;;  %v5940_v55 = vmul.f32 %v475_v33, %v96_v39  ;;  %v469_v4 = vpop.f32.mrb[7].mxu1  ;;  %v649_v5 = vpop.f32.mrb[15].mxu0  ;;  %4763 = vmatpush3.bf16.msra.mxu0 %v661_v31 }
 0x31c   :  { %v5942_v48 = vmul.f32 %v467_v43, %v82_v45  ;;  %v5944_v10 = vmul.f32 %v467_v43, %v86_v46  ;;  %v5946_v27 = vmul.f32 %v467_v43, %v90_v53  ;;  %v5948_v61 = vmul.f32 %v467_v43, %v94_v54  ;;  %4746 = vmatprep.mubr.msk.bf16.mxu1 %vm243_vm1, %v681_v51  ;;  %v4311_v45 = vld [vmem:[%s7558_s10] ss:$0 sm:$0xff] }
 0x31d   :  { %v478_v19 = vadd.f32 %v4717_v49, %v5830_v6  ;;  %v658_v37 = vadd.f32 %v4741_v50, %v5840_v36  ;;  %4764 = vmatprep.subr.bf16.mxu0 %v662_v22  ;;  %v470_v38 = vadd.f32 %v5830_v6, %v469_v4  ;;  %v650_v39 = vadd.f32 %v5840_v36, %v649_v5 }
 0x31e   :  { %v683_v46 = vpack.c.bf16 %v5921_v24, %v5903_v13  ;;  %v684_v53 = vpack.c.bf16 %v5915_v21, %v5875_v62  ;;  %v685_v54 = vpack.c.bf16 %v5923_v25, %v5905_v40 }
 0x31f   :  { %v5965_v11 = vmul.f32 %v478_v19, %v5870_v57  ;;  %v5967_v23 = vmul.f32 %v478_v19, %v89_v0  ;;  %v5969_v6 = vmul.f32 %v478_v19, %v93_v1  ;;  %v5971_v36 = vmul.f32 %v478_v19, %v97_v3  ;;  %4765 = vmatpush3.bf16.msra.mxu0 %v662_v22 }
 0x320   :  { %v5973_v31 = vpack.c.bf16 %v658_v37, %v655_v42  ;;  %v1156_v33 = vmul.f32 %v470_v38, %v83_v7  ;;  %v1160_v34 = vmul.f32 %v470_v38, %v87_v8  ;;  %v5975_v13 = vmul.f32 %v470_v38, %v91_v9  ;;  %v4724_v62 = vpop.f32.mrb[8].mxu1 }
 0x321   :  { %v1172_v40 = vpack.c.bf16 %v5965_v11, %v5934_v52  ;;  %v1168_v21 = vmul.f32 %v470_v38, %v95_v16  ;;  %v5979_v57 = vpack.c.bf16 %v650_v39, %v647_v44  ;;  %v547_v0 = vadd.f32 %v4724_v62, %v4311_v45  ;;  %v538_v24 = vpop.f32.mrb[9].mxu1 }
 0x322   :  { %v539_v1 = vadd.f32 %v4311_v45, %v538_v24  ;;  %v4725_v25 = vpop.f32.mrb[10].mxu1  ;;  %v686_v3 = vpack.c.bf16 %v5917_v47, %v5877_v41  ;;  %v687_v7 = vpack.c.bf16 %v5927_v28, %v5907_v14  ;;  %v688_v8 = vpack.c.bf16 %v5919_v56, %v5879_v63 }
 0x323   :  { %4802 = vmatprep.subr.bf16.mxu0 %v5979_v57  ;;  %v550_v9 = vadd.f32 %v4725_v25, %v4311_v45  ;;  %v541_v22 = vpop.f32.mrb[11].mxu1  ;;  %v1171_v16 = vpack.c.bf16 %v1156_v33, %v5942_v48  ;;  %v1173_v35 = vpack.c.bf16 %v1160_v34, %v5944_v10  ;;  %v1174_v42 = vpack.c.bf16 %v5967_v23, %v5936_v58 }
 0x324   :  { %v542_v43 = vadd.f32 %v4311_v45, %v541_v22  ;;  %v1175_v41 = vpack.c.bf16 %v5975_v13, %v5946_v27  ;;  %v1176_v14 = vpack.c.bf16 %v5969_v6, %v5938_v59  ;;  %v1177_v63 = vpack.c.bf16 %v1168_v21, %v5948_v61 }
 0x325   :  { %v570_v47 = vpack.c.bf16 %v550_v9, %v547_v0  ;;  %v1178_v56 = vpack.c.bf16 %v5971_v36, %v5940_v55 }
 0x326   :  { %v569_v28 = vpack.c.bf16 %v542_v43, %v539_v1 }
 0x327   :  { %v723_v55 = vsel %vm243_vm1, %v570_v47, 0 }
 0x328   :  { %v4728_v44 = vpop.f32.mrb[12].mxu1  ;;  %5046 = vmatprep.subr.msk.bf16.mxu1 %vm243_vm1, %v569_v28  ;;  %v720_v49 = vsel %vm243_vm1, %v569_v28, 0 }
 0x329   :  { %v554_v50 = vpop.f32.mrb[13].mxu1  ;;  %4743 = vmatpush3.bf16.xpose.msra.mxu1 %v720_v49  ;;  %v563_v52 = vadd.f32 %v4728_v44, %v4311_v45 }
 0x32a   :  { %v4729_v51 = vpop.f32.mrb[14].mxu1  ;;  %5047 = vmatprep.subr.msk.bf16.mxu1 %vm243_vm1, %v570_v47  ;;  %v555_v4 = vadd.f32 %v4311_v45, %v554_v50 }
 0x32b   :  { %v566_v58 = vadd.f32 %v4729_v51, %v4311_v45  ;;  %v557_v59 = vpop.f32.mrb[15].mxu1 }
 0x32c   :  { %v558_v5 = vadd.f32 %v4311_v45, %v557_v59 }
 0x32d   :  { %v572_v48 = vpack.c.bf16 %v566_v58, %v563_v52 }
 0x32e   :  { %v571_v10 = vpack.c.bf16 %v558_v5, %v555_v4 }
 0x32f   :  { %v1207_v61 = vsel %vm243_vm1, %v572_v48, 0 }
 0x330   :  { %v1204_v27 = vsel %vm243_vm1, %v571_v10, 0 }
 0x331   :  { %4745 = vmatpush3.bf16.xpose.msra.mxu1 %v723_v55 }
 0x332   :  { %5048 = vmatprep.subr.msk.bf16.mxu1 %vm243_vm1, %v571_v10 }
 0x338   :  { %4747 = vmatmul.mubr.msk.bf16.vlgmr.msra.gmra.mrb[16].mxu1 %vm243_vm1, %v682_v2 }
 0x339   :  { %4750 = vmatprep.mubr.msk.bf16.mxu1 %vm243_vm1, %v683_v46  ;;  %4783 = vmatpush3.bf16.xpose.msra.mxu1 %v1204_v27 }
 0x33a   :  { %5049 = vmatprep.subr.msk.bf16.mxu1 %vm243_vm1, %v572_v48 }
 0x340   :  { %4751 = vmatmul.mubr.msk.bf16.gmra.mrb[20].mxu1 %vm243_vm1, %v684_v53 }
 0x341   :  { %4754 = vmatprep.mubr.msk.bf16.mxu1 %vm243_vm1, %v685_v54  ;;  %4785 = vmatpush3.bf16.xpose.msra.mxu1 %v1207_v61 }
 0x342   :  { %5042 = vmatprep.subr.bf16.mxu1 %v5979_v57 }
 0x348   :  { %4755 = vmatmul.mubr.msk.bf16.gmra.mrb[24].mxu1 %vm243_vm1, %v686_v3 }
 0x349   :  { %4758 = vmatprep.mubr.msk.bf16.mxu1 %vm243_vm1, %v687_v7 }
 0x350   :  { %4759 = vmatmul.mubr.msk.bf16.gmra.mrb[28].mxu1 %vm243_vm1, %v688_v8 }
 0x351   :  { %4786 = vmatprep.mubr.msk.bf16.mxu1 %vm243_vm1, %v1171_v16 }
 0x358   :  { %4787 = vmatmul.mubr.msk.bf16.vlgmr.msra.gmra.mrb[32].mxu1 %vm243_vm1, %v1172_v40 }
 0x359   :  { %5044 = vmatpush3.bf16.msra.mxu1 %v5979_v57  ;;  %4790 = vmatprep.mubr.msk.bf16.mxu1 %vm243_vm1, %v1173_v35 }
 0x35a   :  { %5043 = vmatprep.subr.bf16.mxu1 %v5973_v31 }
 0x35d   :  { %5045 = vmatpush3.bf16.msra.mxu1 %v5973_v31 }
 0x360   :  { %4791 = vmatmul.mubr.msk.bf16.gmra.mrb[36].mxu1 %vm243_vm1, %v1174_v42 }
 0x361   :  { %4794 = vmatprep.mubr.msk.bf16.mxu1 %vm243_vm1, %v1175_v41 }
 0x368   :  { %4795 = vmatmul.mubr.msk.bf16.gmra.mrb[40].mxu1 %vm243_vm1, %v1176_v14 }
 0x369   :  { %4798 = vmatprep.mubr.msk.bf16.mxu1 %vm243_vm1, %v1177_v63 }
 0x370   :  { %4799 = vmatmul.mubr.msk.bf16.gmra.mrb[44].mxu1 %vm243_vm1, %v1178_v56 }
 0x40b   :  { %v4748_v18 = vpop.f32.mrb[16].mxu1 }
 0x40c   :  { %v6035_v2 = vadd.f32 %v4748_v18, %v6032_v60  ;;  %v759_v19 = vpop.f32.mrb[17].mxu1 }
 0x40d   :  { %v4749_v37 = vpop.f32.mrb[18].mxu1  ;;  %v6038_v38 = vadd.f32 %v6032_v60, %v759_v19 }
 0x40e   :  { %v6041_v39 = vadd.f32 %v4749_v37, %v6032_v60  ;;  %v762_v45 = vpop.f32.mrb[19].mxu1  ;;  %v828_v46 = vsel %vm243_vm1, %v6035_v2, -inf }
 0x40f   :  { %829 = vmax.xlane.f32.xlu0 %v828_v46  ;;  %v6046_v53 = vadd.f32 %v6032_v60, %v762_v45  ;;  %v822_v11 = vsel %vm243_vm1, %v6038_v38, -inf }
 0x410   :  { %v831_v54 = vsel %vm243_vm1, %v6041_v39, -inf }
 0x411   :  { %832 = vmax.xlane.f32.xlu1 %v831_v54  ;;  %v825_v33 = vsel %vm243_vm1, %v6046_v53, -inf }
 0x413   :  { %v4752_v23 = vpop.f32.mrb[20].mxu1  ;;  %823 = vmax.xlane.f32.xlu0 %v822_v11 }
 0x414   :  { %v6053_v6 = vadd.f32 %v4752_v23, %v6032_v60  ;;  %v775_v36 = vpop.f32.mrb[21].mxu1 }
 0x415   :  { %v4753_v34 = vpop.f32.mrb[22].mxu1  ;;  %826 = vmax.xlane.f32.xlu1 %v825_v33  ;;  %v6058_v13 = vadd.f32 %v6032_v60, %v775_v36 }
 0x416   :  { %v6061_v62 = vadd.f32 %v4753_v34, %v6032_v60  ;;  %v778_v40 = vpop.f32.mrb[23].mxu1  ;;  %v840_v21 = vsel %vm243_vm1, %v6053_v6, -inf }
 0x417   :  { %841 = vmax.xlane.f32.xlu0 %v840_v21  ;;  %v6066_v0 = vadd.f32 %v6032_v60, %v778_v40  ;;  %v834_v1 = vsel %vm243_vm1, %v6058_v13, -inf }
 0x418   :  { %v843_v24 = vsel %vm243_vm1, %v6061_v62, -inf }
 0x419   :  { %844 = vmax.xlane.f32.xlu1 %v843_v24  ;;  %v837_v8 = vsel %vm243_vm1, %v6066_v0, -inf }
 0x41b   :  { %v4756_v25 = vpop.f32.mrb[24].mxu1  ;;  %835 = vmax.xlane.f32.xlu0 %v834_v1 }
 0x41c   :  { %v6073_v3 = vadd.f32 %v4756_v25, %v6032_v60  ;;  %v791_v7 = vpop.f32.mrb[25].mxu1 }
 0x41d   :  { %v4757_v9 = vpop.f32.mrb[26].mxu1  ;;  %838 = vmax.xlane.f32.xlu1 %v837_v8  ;;  %v6078_v22 = vadd.f32 %v6032_v60, %v791_v7 }
 0x41e   :  { %v6081_v16 = vadd.f32 %v4757_v9, %v6032_v60  ;;  %v794_v35 = vpop.f32.mrb[27].mxu1  ;;  %v852_v42 = vsel %vm243_vm1, %v6073_v3, -inf }
 0x41f   :  { %853 = vmax.xlane.f32.xlu0 %v852_v42  ;;  %v6086_v43 = vadd.f32 %v6032_v60, %v794_v35  ;;  %v846_v14 = vsel %vm243_vm1, %v6078_v22, -inf }
 0x420   :  { %v855_v41 = vsel %vm243_vm1, %v6081_v16, -inf }
 0x421   :  { %856 = vmax.xlane.f32.xlu1 %v855_v41  ;;  %v849_v28 = vsel %vm243_vm1, %v6086_v43, -inf }
 0x423   :  { %v4760_v63 = vpop.f32.mrb[28].mxu1  ;;  %847 = vmax.xlane.f32.xlu0 %v846_v14 }
 0x424   :  { %v6093_v47 = vadd.f32 %v4760_v63, %v6032_v60  ;;  %v807_v56 = vpop.f32.mrb[29].mxu1 }
 0x425   :  { %v4761_v44 = vpop.f32.mrb[30].mxu1  ;;  %850 = vmax.xlane.f32.xlu1 %v849_v28  ;;  %v6098_v49 = vadd.f32 %v6032_v60, %v807_v56 }
 0x426   :  { %v6101_v50 = vadd.f32 %v4761_v44, %v6032_v60  ;;  %v810_v51 = vpop.f32.mrb[31].mxu1  ;;  %v864_v52 = vsel %vm243_vm1, %v6093_v47, -inf }
 0x427   :  { %865 = vmax.xlane.f32.xlu0 %v864_v52  ;;  %v6106_v58 = vadd.f32 %v6032_v60, %v810_v51  ;;  %v858_v4 = vsel %vm243_vm1, %v6098_v49, -inf }
 0x428   :  { %v867_v59 = vsel %vm243_vm1, %v6101_v50, -inf }
 0x429   :  { %868 = vmax.xlane.f32.xlu1 %v867_v59  ;;  %v861_v55 = vsel %vm243_vm1, %v6106_v58, -inf }
 0x42b   :  { %v4788_v5 = vpop.f32.mrb[32].mxu1  ;;  %859 = vmax.xlane.f32.xlu0 %v858_v4 }
 0x42c   :  { %v6113_v48 = vadd.f32 %v4788_v5, %v6032_v60  ;;  %v1243_v10 = vpop.f32.mrb[33].mxu1 }
 0x42d   :  { %v4789_v27 = vpop.f32.mrb[34].mxu1  ;;  %862 = vmax.xlane.f32.xlu1 %v861_v55  ;;  %v6118_v61 = vadd.f32 %v6032_v60, %v1243_v10 }
 0x42e   :  { %v6121_v18 = vadd.f32 %v4789_v27, %v6032_v60  ;;  %v1246_v19 = vpop.f32.mrb[35].mxu1  ;;  %v1312_v37 = vsel %vm243_vm1, %v6113_v48, -inf }
 0x42f   :  { %1313 = vmax.xlane.f32.xlu0 %v1312_v37  ;;  %v6126_v45 = vadd.f32 %v6032_v60, %v1246_v19  ;;  %v1306_v54 = vsel %vm243_vm1, %v6118_v61, -inf }
 0x430   :  { %v1315_v46 = vsel %vm243_vm1, %v6121_v18, -inf }
 0x431   :  { %1316 = vmax.xlane.f32.xlu1 %v1315_v46  ;;  %v1309_v33 = vsel %vm243_vm1, %v6126_v45, -inf }
 0x433   :  { %v4792_v11 = vpop.f32.mrb[36].mxu1  ;;  %1307 = vmax.xlane.f32.xlu0 %v1306_v54 }
 0x434   :  { %v6133_v23 = vadd.f32 %v4792_v11, %v6032_v60  ;;  %v1259_v36 = vpop.f32.mrb[37].mxu1 }
 0x435   :  { %v4793_v34 = vpop.f32.mrb[38].mxu1  ;;  %1310 = vmax.xlane.f32.xlu1 %v1309_v33  ;;  %v6138_v40 = vadd.f32 %v6032_v60, %v1259_v36 }
 0x436   :  { %v6141_v21 = vadd.f32 %v4793_v34, %v6032_v60  ;;  %v1262_v24 = vpop.f32.mrb[39].mxu1  ;;  %v1324_v1 = vsel %vm243_vm1, %v6133_v23, -inf }
 0x437   :  { %1325 = vmax.xlane.f32.xlu0 %v1324_v1  ;;  %v6146_v25 = vadd.f32 %v6032_v60, %v1262_v24  ;;  %v1318_v8 = vsel %vm243_vm1, %v6138_v40, -inf }
 0x438   :  { %v1327_v7 = vsel %vm243_vm1, %v6141_v21, -inf }
 0x439   :  { %1328 = vmax.xlane.f32.xlu1 %v1327_v7  ;;  %v1321_v41 = vsel %vm243_vm1, %v6146_v25, -inf }
 0x43b   :  { %v4796_v9 = vpop.f32.mrb[40].mxu1  ;;  %1319 = vmax.xlane.f32.xlu0 %v1318_v8 }
 0x43c   :  { %v6153_v35 = vadd.f32 %v4796_v9, %v6032_v60  ;;  %v1275_v42 = vpop.f32.mrb[41].mxu1 }
 0x43d   :  { %v4797_v14 = vpop.f32.mrb[42].mxu1  ;;  %1322 = vmax.xlane.f32.xlu1 %v1321_v41  ;;  %v6158_v63 = vadd.f32 %v6032_v60, %v1275_v42 }
 0x43e   :  { %v6161_v56 = vadd.f32 %v4797_v14, %v6032_v60  ;;  %v1278_v28 = vpop.f32.mrb[43].mxu1  ;;  %v1336_v44 = vsel %vm243_vm1, %v6153_v35, -inf }
 0x43f   :  { %1337 = vmax.xlane.f32.xlu0 %v1336_v44  ;;  %v6166_v51 = vadd.f32 %v6032_v60, %v1278_v28  ;;  %v1330_v59 = vsel %vm243_vm1, %v6158_v63, -inf }
 0x440   :  { %v1339_v52 = vsel %vm243_vm1, %v6161_v56, -inf }
 0x441   :  { %1340 = vmax.xlane.f32.xlu1 %v1339_v52  ;;  %v1333_v10 = vsel %vm243_vm1, %v6166_v51, -inf }
 0x443   :  { %v4800_v4 = vpop.f32.mrb[44].mxu1  ;;  %1331 = vmax.xlane.f32.xlu0 %v1330_v59 }
 0x444   :  { %v1291_v5 = vpop.f32.mrb[45].mxu1  ;;  %v6178_v37 = vadd.f32 %v4800_v4, %v6032_v60 }
 0x445   :  { %v6175_v55 = vadd.f32 %v6032_v60, %v1291_v5  ;;  %v4801_v27 = vpop.f32.mrb[46].mxu1  ;;  %1334 = vmax.xlane.f32.xlu1 %v1333_v10 }
 0x446   :  { %v1294_v19 = vpop.f32.mrb[47].mxu1  ;;  %v6186_v11 = vadd.f32 %v4801_v27, %v6032_v60  ;;  %v1348_v33 = vsel %vm243_vm1, %v6178_v37, -inf }
 0x447   :  { %v6181_v46 = vadd.f32 %v6032_v60, %v1294_v19  ;;  %v1342_v54 = vsel %vm243_vm1, %v6175_v55, -inf }
 0x448   :  { %1343 = vmax.xlane.f32.xlu0 %v1342_v54  ;;  %v1351_v34 = vsel %vm243_vm1, %v6186_v11, -inf }
 0x449   :  { %v1345_v36 = vsel %vm243_vm1, %v6181_v46, -inf }
 0x44a   :  { %1346 = vmax.xlane.f32.xlu1 %v1345_v36 }
 0x44c   :  { %1349 = vmax.xlane.f32.xlu0 %v1348_v33 }
 0x44e   :  { %1352 = vmax.xlane.f32.xlu1 %v1351_v34 }
 0x49c   :  { %v830_v24 = vpop.xlane.xlu0 %829 }
 0x49d   :  { %v872_v1 = vsub.f32 %v6035_v2, %v830_v24 }
 0x49e   :  { %v833_v7 = vpop.xlane.xlu1 %832 }
 0x49f   :  { %v890_v8 = vmul.f32 1.442695, %v872_v1  ;;  %v873_v60 = vsub.f32 %v6041_v39, %v833_v7 }
 0x4a0   :  { %v824_v9 = vpop.xlane.xlu0 %823 }
 0x4a1   :  { %5119 = vpow2.f32 %v890_v8  ;;  %v892_v42 = vmul.f32 1.442695, %v873_v60  ;;  %v870_v41 = vsub.f32 %v6038_v38, %v824_v9 }
 0x4a2   :  { %v827_v14 = vpop.xlane.xlu1 %826 }
 0x4a3   :  { %5121 = vpow2.f32 %v892_v42  ;;  %v886_v28 = vmul.f32 1.442695, %v870_v41  ;;  %v871_v44 = vsub.f32 %v6046_v53, %v827_v14 }
 0x4a4   :  { %v842_v52 = vpop.xlane.xlu0 %841 }
 0x4a5   :  { %5123 = vpow2.f32 %v886_v28  ;;  %v888_v59 = vmul.f32 1.442695, %v871_v44  ;;  %v876_v4 = vsub.f32 %v6053_v6, %v842_v52 }
 0x4a6   :  { %v845_v2 = vpop.xlane.xlu1 %844 }
 0x4a7   :  { %5125 = vpow2.f32 %v888_v59  ;;  %v898_v5 = vmul.f32 1.442695, %v876_v4  ;;  %v877_v39 = vsub.f32 %v6061_v62, %v845_v2 }
 0x4a8   :  { %v836_v10 = vpop.xlane.xlu0 %835 }
 0x4a9   :  { %5127 = vpow2.f32 %v898_v5  ;;  %v900_v27 = vmul.f32 1.442695, %v877_v39  ;;  %v874_v38 = vsub.f32 %v6058_v13, %v836_v10 }
 0x4aa   :  { %v839_v19 = vpop.xlane.xlu1 %838 }
 0x4ab   :  { %v6201_v54 = vpop.eup %5119  ;;  %5129 = vpow2.f32 %v900_v27  ;;  %v894_v53 = vmul.f32 1.442695, %v874_v38  ;;  %v875_v36 = vsub.f32 %v6066_v0, %v839_v19 }
 0x4ac   :  { %v854_v33 = vpop.xlane.xlu0 %853  ;;  %v924_v6 = vsel %vm243_vm1, %v6201_v54, 0.0 }
 0x4ad   :  { %v6206_v34 = vpop.eup %5121  ;;  %5131 = vpow2.f32 %v894_v53  ;;  %v896_v62 = vmul.f32 1.442695, %v875_v36  ;;  %v880_v24 = vsub.f32 %v6073_v3, %v854_v33  ;;  %925 = vadd.xlane.f32.xlu0 %v924_v6 }
 0x4ae   :  { %v857_v1 = vpop.xlane.xlu1 %856  ;;  %v927_v13 = vsel %vm243_vm1, %v6206_v34, 0.0 }
 0x4af   :  { %v6211_v7 = vpop.eup %5123  ;;  %5133 = vpow2.f32 %v896_v62  ;;  %v906_v8 = vmul.f32 1.442695, %v880_v24  ;;  %v881_v0 = vsub.f32 %v6081_v16, %v857_v1  ;;  %928 = vadd.xlane.f32.xlu1 %v927_v13 }
 0x4b0   :  { %v848_v60 = vpop.xlane.xlu0 %847  ;;  %v918_v9 = vsel %vm243_vm1, %v6211_v7, 0.0 }
 0x4b1   :  { %v6216_v42 = vpop.eup %5125  ;;  %5135 = vpow2.f32 %v906_v8  ;;  %v908_v3 = vmul.f32 1.442695, %v881_v0  ;;  %v878_v41 = vsub.f32 %v6078_v22, %v848_v60  ;;  %919 = vadd.xlane.f32.xlu0 %v918_v9 }
 0x4b2   :  { %v851_v14 = vpop.xlane.xlu1 %850  ;;  %v921_v28 = vsel %vm243_vm1, %v6216_v42, 0.0 }
 0x4b3   :  { %v6221_v44 = vpop.eup %5127  ;;  %5137 = vpow2.f32 %v908_v3  ;;  %v902_v16 = vmul.f32 1.442695, %v878_v41  ;;  %v879_v52 = vsub.f32 %v6086_v43, %v851_v14  ;;  %922 = vadd.xlane.f32.xlu1 %v921_v28 }
 0x4b4   :  { %v866_v59 = vpop.xlane.xlu0 %865  ;;  %v936_v4 = vsel %vm243_vm1, %v6221_v44, 0.0 }
 0x4b5   :  { %v6226_v2 = vpop.eup %5129  ;;  %5139 = vpow2.f32 %v902_v16  ;;  %v904_v22 = vmul.f32 1.442695, %v879_v52  ;;  %v884_v5 = vsub.f32 %v6093_v47, %v866_v59  ;;  %937 = vadd.xlane.f32.xlu0 %v936_v4 }
 0x4b6   :  { %v869_v39 = vpop.xlane.xlu1 %868  ;;  %v939_v10 = vsel %vm243_vm1, %v6226_v2, 0.0 }
 0x4b7   :  { %v6231_v27 = vpop.eup %5131  ;;  %5141 = vpow2.f32 %v904_v22  ;;  %v914_v43 = vmul.f32 1.442695, %v884_v5  ;;  %v885_v38 = vsub.f32 %v6101_v50, %v869_v39  ;;  %940 = vadd.xlane.f32.xlu1 %v939_v10 }
 0x4b8   :  { %v860_v19 = vpop.xlane.xlu0 %859  ;;  %v930_v53 = vsel %vm243_vm1, %v6231_v27, 0.0 }
 0x4b9   :  { %v6236_v36 = vpop.eup %5133  ;;  %5143 = vpow2.f32 %v914_v43  ;;  %v916_v47 = vmul.f32 1.442695, %v885_v38  ;;  %v882_v33 = vsub.f32 %v6098_v49, %v860_v19  ;;  %931 = vadd.xlane.f32.xlu0 %v930_v53 }
 0x4ba   :  { %v863_v6 = vpop.xlane.xlu1 %862  ;;  %v933_v62 = vsel %vm243_vm1, %v6236_v36, 0.0 }
 0x4bb   :  { %v6241_v24 = vpop.eup %5135  ;;  %5145 = vpow2.f32 %v916_v47  ;;  %v910_v50 = vmul.f32 1.442695, %v882_v33  ;;  %v883_v1 = vsub.f32 %v6106_v58, %v863_v6  ;;  %934 = vadd.xlane.f32.xlu1 %v933_v62 }
 0x4bc   :  { %v1314_v13 = vpop.xlane.xlu0 %1313  ;;  %v948_v8 = vsel %vm243_vm1, %v6241_v24, 0.0 }
 0x4bd   :  { %v6246_v0 = vpop.eup %5137  ;;  %5147 = vpow2.f32 %v910_v50  ;;  %v912_v49 = vmul.f32 1.442695, %v883_v1  ;;  %v1356_v60 = vsub.f32 %v6113_v48, %v1314_v13  ;;  %949 = vadd.xlane.f32.xlu0 %v948_v8 }
 0x4be   :  { %v1317_v9 = vpop.xlane.xlu1 %1316  ;;  %v951_v3 = vsel %vm243_vm1, %v6246_v0, 0.0 }
 0x4bf   :  { %v6251_v41 = vpop.eup %5139  ;;  %5149 = vpow2.f32 %v912_v49  ;;  %v1374_v58 = vmul.f32 1.442695, %v1356_v60  ;;  %v1357_v14 = vsub.f32 %v6121_v18, %v1317_v9  ;;  %952 = vadd.xlane.f32.xlu1 %v951_v3 }
 0x4c0   :  { %v1308_v28 = vpop.xlane.xlu0 %1307  ;;  %v942_v16 = vsel %vm243_vm1, %v6251_v41, 0.0 }
 0x4c1   :  { %v6256_v52 = vpop.eup %5141  ;;  %5151 = vpow2.f32 %v1374_v58  ;;  %v1376_v48 = vmul.f32 1.442695, %v1357_v14  ;;  %v1354_v59 = vsub.f32 %v6118_v61, %v1308_v28  ;;  %943 = vadd.xlane.f32.xlu0 %v942_v16 }
 0x4c2   :  { %v1311_v4 = vpop.xlane.xlu1 %1310  ;;  %v945_v22 = vsel %vm243_vm1, %v6256_v52, 0.0 }
 0x4c3   :  { %v6261_v5 = vpop.eup %5143  ;;  %5153 = vpow2.f32 %v1376_v48  ;;  %v1370_v18 = vmul.f32 1.442695, %v1354_v59  ;;  %v1355_v39 = vsub.f32 %v6126_v45, %v1311_v4  ;;  %946 = vadd.xlane.f32.xlu1 %v945_v22 }
 0x4c4   :  { %v1326_v10 = vpop.xlane.xlu0 %1325  ;;  %v960_v43 = vsel %vm243_vm1, %v6261_v5, 0.0 }
 0x4c5   :  { %v6266_v38 = vpop.eup %5145  ;;  %5155 = vpow2.f32 %v1370_v18  ;;  %v1372_v61 = vmul.f32 1.442695, %v1355_v39  ;;  %v1360_v19 = vsub.f32 %v6133_v23, %v1326_v10  ;;  %961 = vadd.xlane.f32.xlu0 %v960_v43 }
 0x4c6   :  { %v1329_v53 = vpop.xlane.xlu1 %1328  ;;  %v963_v47 = vsel %vm243_vm1, %v6266_v38, 0.0 }
 0x4c7   :  { %v6271_v33 = vpop.eup %5147  ;;  %5157 = vpow2.f32 %v1372_v61  ;;  %v1382_v45 = vmul.f32 1.442695, %v1360_v19  ;;  %v1361_v6 = vsub.f32 %v6141_v21, %v1329_v53  ;;  %964 = vadd.xlane.f32.xlu1 %v963_v47 }
 0x4c8   :  { %v1320_v62 = vpop.xlane.xlu0 %1319  ;;  %v954_v50 = vsel %vm243_vm1, %v6271_v33, 0.0 }
 0x4c9   :  { %v6276_v1 = vpop.eup %5149  ;;  %5159 = vpow2.f32 %v1382_v45  ;;  %v1384_v23 = vmul.f32 1.442695, %v1361_v6  ;;  %v1358_v13 = vsub.f32 %v6138_v40, %v1320_v62  ;;  %955 = vadd.xlane.f32.xlu0 %v954_v50 }
 0x4ca   :  { %v1323_v8 = vpop.xlane.xlu1 %1322  ;;  %v957_v49 = vsel %vm243_vm1, %v6276_v1, 0.0 }
 0x4cb   :  { %v6281_v60 = vpop.eup %5151  ;;  %5161 = vpow2.f32 %v1384_v23  ;;  %v1378_v21 = vmul.f32 1.442695, %v1358_v13  ;;  %v1359_v9 = vsub.f32 %v6146_v25, %v1323_v8  ;;  %958 = vadd.xlane.f32.xlu1 %v957_v49 }
 0x4cc   :  { %v1338_v3 = vpop.xlane.xlu0 %1337  ;;  %v1408_v58 = vsel %vm243_vm1, %v6281_v60, 0.0 }
 0x4cd   :  { %v6286_v14 = vpop.eup %5153  ;;  %5163 = vpow2.f32 %v1378_v21  ;;  %v1380_v40 = vmul.f32 1.442695, %v1359_v9  ;;  %v1364_v28 = vsub.f32 %v6153_v35, %v1338_v3  ;;  %1409 = vadd.xlane.f32.xlu0 %v1408_v58 }
 0x4ce   :  { %v1341_v16 = vpop.xlane.xlu1 %1340  ;;  %v1411_v48 = vsel %vm243_vm1, %v6286_v14, 0.0 }
 0x4cf   :  { %v6291_v59 = vpop.eup %5155  ;;  %5165 = vpow2.f32 %v1380_v40  ;;  %v1390_v25 = vmul.f32 1.442695, %v1364_v28  ;;  %v1365_v4 = vsub.f32 %v6161_v56, %v1341_v16  ;;  %1412 = vadd.xlane.f32.xlu1 %v1411_v48 }
 0x4d0   :  { %v1332_v22 = vpop.xlane.xlu0 %1331  ;;  %v1402_v18 = vsel %vm243_vm1, %v6291_v59, 0.0 }
 0x4d1   :  { %v6296_v39 = vpop.eup %5157  ;;  %5167 = vpow2.f32 %v1390_v25  ;;  %v1392_v35 = vmul.f32 1.442695, %v1365_v4  ;;  %v1362_v10 = vsub.f32 %v6158_v63, %v1332_v22  ;;  %1403 = vadd.xlane.f32.xlu0 %v1402_v18 }
 0x4d2   :  { %v1335_v43 = vpop.xlane.xlu1 %1334  ;;  %v1405_v61 = vsel %vm243_vm1, %v6296_v39, 0.0 }
 0x4d3   :  { %v6301_v19 = vpop.eup %5159  ;;  %5169 = vpow2.f32 %v1392_v35  ;;  %v1386_v56 = vmul.f32 1.442695, %v1362_v10  ;;  %v1363_v53 = vsub.f32 %v6166_v51, %v1335_v43  ;;  %1406 = vadd.xlane.f32.xlu1 %v1405_v61 }
 0x4d4   :  { %v1420_v47 = vsel %vm243_vm1, %v6301_v19, 0.0 }
 0x4d5   :  { %v6306_v45 = vpop.eup %5161  ;;  %5171 = vpow2.f32 %v1386_v56  ;;  %v1388_v6 = vmul.f32 1.442695, %v1363_v53  ;;  %1421 = vadd.xlane.f32.xlu0 %v1420_v47  ;;  %v1344_v63 = vpop.xlane.xlu0 %1343 }
 0x4d6   :  { %v1366_v62 = vsub.f32 %v6175_v55, %v1344_v63  ;;  %v1423_v50 = vsel %vm243_vm1, %v6306_v45, 0.0 }
 0x4d7   :  { %v6311_v23 = vpop.eup %5163  ;;  %5173 = vpow2.f32 %v1388_v6  ;;  %1424 = vadd.xlane.f32.xlu1 %v1423_v50  ;;  %v1347_v51 = vpop.xlane.xlu1 %1346 }
 0x4d8   :  { %v1394_v13 = vmul.f32 1.442695, %v1366_v62  ;;  %v1367_v8 = vsub.f32 %v6181_v46, %v1347_v51  ;;  %v1414_v49 = vsel %vm243_vm1, %v6311_v23, 0.0 }
 0x4d9   :  { %v6316_v21 = vpop.eup %5165  ;;  %1415 = vadd.xlane.f32.xlu0 %v1414_v49  ;;  %v1350_v9 = vpop.xlane.xlu0 %1349 }
 0x4da   :  { %5175 = vpow2.f32 %v1394_v13  ;;  %v1396_v55 = vmul.f32 1.442695, %v1367_v8  ;;  %v1368_v3 = vsub.f32 %v6178_v37, %v1350_v9  ;;  %v1417_v58 = vsel %vm243_vm1, %v6316_v21, 0.0 }
 0x4db   :  { %v6321_v40 = vpop.eup %5167  ;;  %1418 = vadd.xlane.f32.xlu1 %v1417_v58  ;;  %v1353_v28 = vpop.xlane.xlu1 %1352 }
 0x4dc   :  { %5177 = vpow2.f32 %v1396_v55  ;;  %v1398_v46 = vmul.f32 1.442695, %v1368_v3  ;;  %v1369_v16 = vsub.f32 %v6186_v11, %v1353_v28  ;;  %v1432_v48 = vsel %vm243_vm1, %v6321_v40, 0.0 }
 0x4dd   :  { %v6326_v25 = vpop.eup %5169  ;;  %1433 = vadd.xlane.f32.xlu0 %v1432_v48 }
 0x4de   :  { %5179 = vpow2.f32 %v1398_v46  ;;  %v1400_v4 = vmul.f32 1.442695, %v1369_v16  ;;  %v1435_v37 = vsel %vm243_vm1, %v6326_v25, 0.0 }
 0x4df   :  { %v6330_v22 = vpop.eup %5171  ;;  %1436 = vadd.xlane.f32.xlu1 %v1435_v37 }
 0x4e0   :  { %5181 = vpow2.f32 %v1400_v4  ;;  %v1426_v18 = vsel %vm243_vm1, %v6330_v22, 0.0 }
 0x4e1   :  { %v6334_v35 = vpop.eup %5173  ;;  %1427 = vadd.xlane.f32.xlu0 %v1426_v18 }
 0x4e2   :  { %v1429_v11 = vsel %vm243_vm1, %v6334_v35, 0.0 }
 0x4e3   :  { %1430 = vadd.xlane.f32.xlu1 %v1429_v11 }
 0x4e4   :  { %v6338_v10 = vpop.eup %5175 }
 0x4e5   :  { %v1438_v43 = vsel %vm243_vm1, %v6338_v10, 0.0 }
 0x4e6   :  { %v6342_v61 = vpop.eup %5177  ;;  %1439 = vadd.xlane.f32.xlu0 %v1438_v43 }
 0x4e7   :  { %v1441_v56 = vsel %vm243_vm1, %v6342_v61, 0.0 }
 0x4e8   :  { %v6346_v53 = vpop.eup %5179  ;;  %1442 = vadd.xlane.f32.xlu1 %v1441_v56 }
 0x4e9   :  { %v1444_v47 = vsel %vm243_vm1, %v6346_v53, 0.0 }
 0x4ea   :  { %v6350_v6 = vpop.eup %5181  ;;  %1445 = vadd.xlane.f32.xlu0 %v1444_v47 }
 0x4eb   :  { %v1447_v63 = vsel %vm243_vm1, %v6350_v6, 0.0 }
 0x4ec   :  { %1448 = vadd.xlane.f32.xlu1 %v1447_v63 }
 0x53a   :  { %v926_v62 = vpop.xlane.xlu0 %925 }
 0x53c   :  { %v929_v50 = vpop.xlane.xlu1 %928 }
 0x53d   :  { %5183 = vrcp.f32 %v929_v50 }
 0x53e   :  { %v920_v51 = vpop.xlane.xlu0 %919 }
 0x53f   :  { %5185 = vrcp.f32 %v920_v51 }
 0x540   :  { %5187 = vrcp.f32 %v926_v62  ;;  %v923_v13 = vpop.xlane.xlu1 %922 }
 0x541   :  { %5189 = vrcp.f32 %v923_v13 }
 0x542   :  { %v938_v8 = vpop.xlane.xlu0 %937 }
 0x544   :  { %v941_v49 = vpop.xlane.xlu1 %940 }
 0x545   :  { %5191 = vrcp.f32 %v941_v49 }
 0x546   :  { %v932_v9 = vpop.xlane.xlu0 %931 }
 0x547   :  { %5193 = vrcp.f32 %v932_v9  ;;  %v5184_v55 = vpop.eup %5183 }
 0x548   :  { %5195 = vrcp.f32 %v938_v8  ;;  %v935_v3 = vpop.xlane.xlu1 %934  ;;  %v985_v48 = vmul.f32 %v5184_v55, %v6206_v34 }
 0x549   :  { %v5186_v58 = vpop.eup %5185  ;;  %5197 = vrcp.f32 %v935_v3 }
 0x54a   :  { %v5188_v28 = vpop.eup %5187  ;;  %v950_v46 = vpop.xlane.xlu0 %949  ;;  %v982_v37 = vmul.f32 %v5186_v58, %v6211_v7 }
 0x54b   :  { %v5190_v16 = vpop.eup %5189  ;;  %v984_v11 = vmul.f32 %v5188_v28, %v6201_v54 }
 0x54c   :  { %v953_v4 = vpop.xlane.xlu1 %952  ;;  %v983_v18 = vmul.f32 %v5190_v16, %v6216_v42 }
 0x54d   :  { %5199 = vrcp.f32 %v953_v4  ;;  %v999_v47 = vpack.c.bf16 %v985_v48, %v984_v11 }
 0x54e   :  { %v944_v43 = vpop.xlane.xlu0 %943  ;;  %v998_v56 = vpack.c.bf16 %v983_v18, %v982_v37 }
 0x54f   :  { %5201 = vrcp.f32 %v944_v43  ;;  %v5192_v63 = vpop.eup %5191 }
 0x550   :  { %5203 = vrcp.f32 %v950_v46  ;;  %v947_v62 = vpop.xlane.xlu1 %946  ;;  %4766 = vmatprep.mubr.msk.bf16.mxu0 %vm243_vm1, %v998_v56  ;;  %v989_v54 = vmul.f32 %v5192_v63, %v6226_v2 }
 0x551   :  { %v5194_v50 = vpop.eup %5193  ;;  %5205 = vrcp.f32 %v947_v62  ;;  %4767 = vmatmul.mubr.msk.bf16.vlgmr.msra.gmra.mrb[16].mxu0 %vm243_vm1, %v999_v47 }
 0x552   :  { %v5196_v34 = vpop.eup %5195  ;;  %4803 = vmatpush3.bf16.msra.mxu0 %v5979_v57  ;;  %v962_v7 = vpop.xlane.xlu0 %961  ;;  %v986_v13 = vmul.f32 %v5194_v50, %v6231_v27 }
 0x553   :  { %v5198_v42 = vpop.eup %5197  ;;  %4804 = vmatprep.subr.bf16.mxu0 %v5973_v31  ;;  %v988_v49 = vmul.f32 %v5196_v34, %v6221_v44 }
 0x554   :  { %v965_v51 = vpop.xlane.xlu1 %964  ;;  %v987_v8 = vmul.f32 %v5198_v42, %v6236_v36 }
 0x555   :  { %5207 = vrcp.f32 %v965_v51  ;;  %v1001_v57 = vpack.c.bf16 %v989_v54, %v988_v49 }
 0x556   :  { %4805 = vmatpush3.bf16.msra.mxu0 %v5973_v31  ;;  %v956_v9 = vpop.xlane.xlu0 %955  ;;  %v1000_v55 = vpack.c.bf16 %v987_v8, %v986_v13 }
 0x557   :  { %5209 = vrcp.f32 %v956_v9  ;;  %v5200_v3 = vpop.eup %5199 }
 0x558   :  { %5211 = vrcp.f32 %v962_v7  ;;  %v959_v58 = vpop.xlane.xlu1 %958  ;;  %4770 = vmatprep.mubr.msk.bf16.mxu0 %vm243_vm1, %v1000_v55  ;;  %v993_v44 = vmul.f32 %v5200_v3, %v6246_v0 }
 0x559   :  { %v5202_v2 = vpop.eup %5201  ;;  %5213 = vrcp.f32 %v959_v58  ;;  %4771 = vmatmul.mubr.msk.bf16.gmra.mrb[20].mxu0 %vm243_vm1, %v1001_v57 }
 0x55a   :  { %v5204_v27 = vpop.eup %5203  ;;  %v1410_v36 = vpop.xlane.xlu0 %1409  ;;  %v990_v31 = vmul.f32 %v5202_v2, %v6251_v41 }
 0x55b   :  { %v5206_v28 = vpop.eup %5205  ;;  %v992_v48 = vmul.f32 %v5204_v27, %v6241_v24 }
 0x55c   :  { %v1413_v46 = vpop.xlane.xlu1 %1412  ;;  %v991_v16 = vmul.f32 %v5206_v28, %v6256_v52 }
 0x55d   :  { %5215 = vrcp.f32 %v1413_v46  ;;  %v1003_v18 = vpack.c.bf16 %v993_v44, %v992_v48 }
 0x55e   :  { %v1404_v4 = vpop.xlane.xlu0 %1403  ;;  %v1002_v37 = vpack.c.bf16 %v991_v16, %v990_v31 }
 0x55f   :  { %5217 = vrcp.f32 %v1404_v4  ;;  %v5208_v11 = vpop.eup %5207 }
 0x560   :  { %5219 = vrcp.f32 %v1410_v36  ;;  %v1407_v43 = vpop.xlane.xlu1 %1406  ;;  %4774 = vmatprep.mubr.msk.bf16.mxu0 %vm243_vm1, %v1002_v37  ;;  %v997_v52 = vmul.f32 %v5208_v11, %v6266_v38 }
 0x561   :  { %v5210_v56 = vpop.eup %5209  ;;  %5221 = vrcp.f32 %v1407_v43  ;;  %4775 = vmatmul.mubr.msk.bf16.gmra.mrb[24].mxu0 %vm243_vm1, %v1003_v18 }
 0x562   :  { %v5212_v0 = vpop.eup %5211  ;;  %v1422_v41 = vpop.xlane.xlu0 %1421  ;;  %v994_v63 = vmul.f32 %v5210_v56, %v6271_v33 }
 0x563   :  { %v5214_v47 = vpop.eup %5213  ;;  %v996_v50 = vmul.f32 %v5212_v0, %v6261_v5 }
 0x564   :  { %v1425_v24 = vpop.xlane.xlu1 %1424  ;;  %v995_v62 = vmul.f32 %v5214_v47, %v6276_v1 }
 0x565   :  { %5223 = vrcp.f32 %v1425_v24  ;;  %v1005_v42 = vpack.c.bf16 %v997_v52, %v996_v50 }
 0x566   :  { %v1416_v34 = vpop.xlane.xlu0 %1415  ;;  %v1004_v7 = vpack.c.bf16 %v995_v62, %v994_v63 }
 0x567   :  { %5225 = vrcp.f32 %v1416_v34  ;;  %v5216_v54 = vpop.eup %5215  ;;  %v5071_v34 = vld [vmem:[%s7561_s13] sm:$0xff]  }
 0x568   :  { %5227 = vrcp.f32 %v1422_v41  ;;  %v1419_v51 = vpop.xlane.xlu1 %1418  ;;  %4778 = vmatprep.mubr.msk.bf16.mxu0 %vm243_vm1, %v1004_v7  ;;  %v1469_v1 = vmul.f32 %v5216_v54, %v6286_v14  ;;  %4822 = vmatprep.subr.bf16.mxu1 %v5071_v34  ;;  %v6414_v54 = vld [vmem:[%s7604_s4 + $0x10] sm:$0xff] }
 0x569   :  { %v5218_v13 = vpop.eup %5217  ;;  %5229 = vrcp.f32 %v1419_v51  ;;  %4779 = vmatmul.mubr.msk.bf16.gmra.mrb[28].mxu0 %vm243_vm1, %v1005_v42 }
 0x56a   :  { %v5220_v38 = vpop.eup %5219  ;;  %v1434_v33 = vpop.xlane.xlu0 %1433  ;;  %v1466_v49 = vmul.f32 %v5218_v13, %v6291_v59  ;;  %v6420_v13 = vld [vmem:[%s7604_s4 + $0x30] sm:$0xff] }
 0x56b   :  { %v5222_v8 = vpop.eup %5221  ;;  %v1468_v55 = vmul.f32 %v5220_v38, %v6281_v60 }
 0x56c   :  { %v1437_v5 = vpop.xlane.xlu1 %1436  ;;  %v1467_v9 = vmul.f32 %v5222_v8, %v6296_v39  ;;  %v5459_v8 = vld [vmem:[%s7604_s4] sm:$0xff] }
 0x56d   :  { %5231 = vrcp.f32 %v1437_v5  ;;  %v1483_v58 = vpack.c.bf16 %v1469_v1, %v1468_v55  ;;  %v5460_v5 = vld [vmem:[%s7604_s4 + $0x20] sm:$0xff]  ;;  %v5461_v55 = vld [vmem:[%s7604_s4 + $0x18] sm:$0xff] }
 0x56e   :  { %v1428_v57 = vpop.xlane.xlu0 %1427  ;;  %v1482_v3 = vpack.c.bf16 %v1467_v9, %v1466_v49 }
 0x56f   :  { %5233 = vrcp.f32 %v1428_v57  ;;  %v5224_v2 = vpop.eup %5223 }
 0x570   :  { %5235 = vrcp.f32 %v1434_v33  ;;  %v1431_v27 = vpop.xlane.xlu1 %1430  ;;  %4806 = vmatprep.mubr.msk.bf16.mxu0 %vm243_vm1, %v1482_v3  ;;  %v1473_v39 = vmul.f32 %v5224_v2, %v6306_v45 }
 0x571   :  { %v5226_v36 = vpop.eup %5225  ;;  %5237 = vrcp.f32 %v1431_v27  ;;  %4807 = vmatmul.mubr.msk.bf16.vlgmr.msra.gmra.mrb[32].mxu0 %vm243_vm1, %v1483_v58  ;;  %v5462_v58 = vld [vmem:[%s7604_s4 + $0x38] sm:$0xff] }
 0x572   :  { %v5228_v14 = vpop.eup %5227  ;;  %v1470_v60 = vmul.f32 %v5226_v36, %v6311_v23  ;;  %v5463_v36 = vld [vmem:[%s7604_s4 + $0x8] sm:$0xff] }
 0x573   :  { %v5230_v59 = vpop.eup %5229  ;;  %v1440_v28 = vpop.xlane.xlu0 %1439  ;;  %v1472_v31 = vmul.f32 %v5228_v14, %v6301_v19 }
 0x574   :  { %5239 = vrcp.f32 %v1440_v28  ;;  %v1471_v44 = vmul.f32 %v5230_v59, %v6316_v21  ;;  %v5464_v28 = vld [vmem:[%s7604_s4 + $0x28] sm:$0xff] }
 0x575   :  { %v1443_v46 = vpop.xlane.xlu1 %1442  ;;  %v1485_v4 = vpack.c.bf16 %v1473_v39, %v1472_v31  ;;  %v5465_v31 = vld [vmem:[%s7604_s4 + $0x50] sm:$0xff] }
 0x576   :  { %5241 = vrcp.f32 %v1443_v46  ;;  %v1484_v16 = vpack.c.bf16 %v1471_v44, %v1470_v60 }
 0x577   :  { %v1446_v48 = vpop.xlane.xlu0 %1445  ;;  %v5232_v37 = vpop.eup %5231 }
 0x578   :  { %5243 = vrcp.f32 %v1446_v48  ;;  %4810 = vmatprep.mubr.msk.bf16.mxu0 %vm243_vm1, %v1484_v16  ;;  %v1477_v21 = vmul.f32 %v5232_v37, %v6326_v25 }
 0x579   :  { %v5234_v18 = vpop.eup %5233  ;;  %v1449_v11 = vpop.xlane.xlu1 %1448  ;;  %4811 = vmatmul.mubr.msk.bf16.gmra.mrb[36].mxu0 %vm243_vm1, %v1485_v4  ;;  %v5466_v4 = vld [vmem:[%s7604_s4 + $0x40] sm:$0xff] }
 0x57a   :  { %v5236_v45 = vpop.eup %5235  ;;  %5245 = vrcp.f32 %v1449_v11  ;;  %v1474_v43 = vmul.f32 %v5234_v18, %v6330_v22 }
 0x57b   :  { %v5238_v23 = vpop.eup %5237  ;;  %v1476_v56 = vmul.f32 %v5236_v45, %v6321_v40  ;;  %v5467_v45 = vld [vmem:[%s7604_s4 + $0x58] sm:$0xff] }
 0x57c   :  { %v1475_v19 = vmul.f32 %v5238_v23, %v6334_v35 }
 0x57d   :  { %v1487_v47 = vpack.c.bf16 %v1477_v21, %v1476_v56 }
 0x57e   :  { %v5240_v0 = vpop.eup %5239  ;;  %v1486_v41 = vpack.c.bf16 %v1475_v19, %v1474_v43  ;;  %v5468_v19 = vld [vmem:[%s7604_s4 + $0x48] sm:$0xff] }
 0x57f   :  { %v1478_v24 = vmul.f32 %v5240_v0, %v6338_v10  ;;  %v5072_v10 = vld [vmem:[%s7561_s13 + $0x8] sm:$0xff]  }
 0x580   :  { %v5242_v52 = vpop.eup %5241  ;;  %4814 = vmatprep.mubr.msk.bf16.mxu0 %vm243_vm1, %v1486_v41 }
 0x581   :  { %4815 = vmatmul.mubr.msk.bf16.gmra.mrb[40].mxu0 %vm243_vm1, %v1487_v47  ;;  %v1479_v63 = vmul.f32 %v5242_v52, %v6342_v61  ;;  %v5469_v52 = vld [vmem:[%s7604_s4 + $0x70] sm:$0xff] }
 0x582   :  { %v5244_v62 = vpop.eup %5243 }
 0x583   :  { %v1488_v25 = vpack.c.bf16 %v1479_v63, %v1478_v24  ;;  %v1480_v22 = vmul.f32 %v5244_v62, %v6346_v53  ;;  %v5470_v62 = vld [vmem:[%s7604_s4 + $0x60] sm:$0xff] }
 0x584   :  { %v5246_v50 = vpop.eup %5245 }
 0x585   :  { %v1481_v35 = vmul.f32 %v5246_v50, %v6350_v6  ;;  %4818 = vmatprep.mubr.msk.bf16.mxu1 %vm243_vm1, %v1488_v25 }
 0x587   :  { %v1489_v40 = vpack.c.bf16 %v1481_v35, %v1480_v22  ;;  %v5471_v35 = vld [vmem:[%s7604_s4 + $0x78] sm:$0xff] }
 0x589   :  { %4819 = vmatmul.mubr.msk.bf16.vlgmr.msra.gmra.mrb[48].mxu1 %vm243_vm1, %v1489_v40 }
 0x58a   :  { %4823 = vmatpush3.bf16.msra.mxu1 %v5071_v34 }
 0x58b   :  { %4824 = vmatprep.subr.bf16.mxu1 %v5072_v10 }
 0x58e   :  { %4825 = vmatpush3.bf16.msra.mxu1 %v5072_v10 }
 0x624   :  { %v4768_v61 = vpop.f32.mrb[16].mxu0 }
 0x625   :  { %v1064_v53 = vpop.f32.mrb[17].mxu0  ;;  %v1129_v51 = vmul.f32 %v6414_v54, %v4768_v61  ;;  %v5472_v61 = vld [vmem:[%s7604_s4 + $0x68] sm:$0xff] }
 0x626   :  { %v4769_v6 = vpop.f32.mrb[18].mxu0  ;;  %v1127_v1 = vmul.f32 %v5459_v8, %v1064_v53 }
 0x627   :  { %v1067_v7 = vpop.f32.mrb[19].mxu0  ;;  %v1130_v57 = vmul.f32 %v5461_v55, %v4769_v6 }
 0x628   :  { %v1128_v14 = vmul.f32 %v5463_v36, %v1067_v7 }
 0x62c   :  { %v4772_v42 = vpop.f32.mrb[20].mxu0 }
 0x62d   :  { %v1133_v38 = vmul.f32 %v6420_v13, %v4772_v42  ;;  %v1080_v33 = vpop.f32.mrb[21].mxu0 }
 0x62e   :  { %v1131_v49 = vmul.f32 %v5460_v5, %v1080_v33  ;;  %v4773_v9 = vpop.f32.mrb[22].mxu0 }
 0x62f   :  { %v1145_v3 = vadd.f32 %v1133_v38, %v1129_v51  ;;  %v1134_v2 = vmul.f32 %v5462_v58, %v4773_v9  ;;  %v1083_v27 = vpop.f32.mrb[23].mxu0 }
 0x630   :  { %v1143_v59 = vadd.f32 %v1131_v49, %v1127_v1  ;;  %v1132_v39 = vmul.f32 %v5464_v28, %v1083_v27 }
 0x631   :  { %v1146_v60 = vadd.f32 %v1134_v2, %v1130_v57 }
 0x632   :  { %v1144_v44 = vadd.f32 %v1132_v39, %v1128_v14 }
 0x634   :  { %v4776_v46 = vpop.f32.mrb[24].mxu0 }
 0x635   :  { %v1137_v16 = vmul.f32 %v5465_v31, %v4776_v46  ;;  %v1096_v48 = vpop.f32.mrb[25].mxu0 }
 0x636   :  { %v1135_v37 = vmul.f32 %v5466_v4, %v1096_v48  ;;  %v4777_v18 = vpop.f32.mrb[26].mxu0 }
 0x637   :  { %v1149_v11 = vadd.f32 %v1145_v3, %v1137_v16  ;;  %v1138_v23 = vmul.f32 %v5467_v45, %v4777_v18  ;;  %v1099_v21 = vpop.f32.mrb[27].mxu0 }
 0x638   :  { %v1147_v43 = vadd.f32 %v1143_v59, %v1135_v37  ;;  %v1136_v56 = vmul.f32 %v5468_v19, %v1099_v21 }
 0x639   :  { %v1150_v0 = vadd.f32 %v1146_v60, %v1138_v23 }
 0x63a   :  { %v1148_v41 = vadd.f32 %v1144_v44, %v1136_v56 }
 0x63c   :  { %v4780_v47 = vpop.f32.mrb[28].mxu0 }
 0x63d   :  { %v1141_v24 = vmul.f32 %v5469_v52, %v4780_v47  ;;  %v1112_v63 = vpop.f32.mrb[29].mxu0 }
 0x63e   :  { %v1139_v25 = vmul.f32 %v5470_v62, %v1112_v63  ;;  %v4781_v50 = vpop.f32.mrb[30].mxu0 }
 0x63f   :  { %v1153_v22 = vadd.f32 %v1149_v11, %v1141_v24  ;;  %v1142_v40 = vmul.f32 %v5471_v35, %v4781_v50  ;;  %v1115_v34 = vpop.f32.mrb[31].mxu0 }
 0x640   :  { %v1151_v10 = vadd.f32 %v1147_v43, %v1139_v25  ;;  %v1140_v53 = vmul.f32 %v5472_v61, %v1115_v34 }
 0x641   :  { %v1154_v6 = vadd.f32 %v1150_v0, %v1142_v40 }
 0x642   :  { %v1152_v7 = vadd.f32 %v1148_v41, %v1140_v53 }
 0x643   :  { %v1640_v42 = vpack.c.bf16 %v1154_v6, %v1153_v22 }
 0x644   :  { %v1639_v51 = vpack.c.bf16 %v1152_v7, %v1151_v10  ;;  %v4808_v38 = vpop.f32.mrb[32].mxu0 }
 0x645   :  { %v1548_v33 = vpop.f32.mrb[33].mxu0  ;;  %v1613_v57 = vmul.f32 %v6414_v54, %v4808_v38 }
 0x646   :  { %v4809_v1 = vpop.f32.mrb[34].mxu0  ;;  %4826 = vmatprep.mubr.msk.bf16.mxu1 %vm243_vm1, %v1639_v51  ;;  %v1611_v27 = vmul.f32 %v5459_v8, %v1548_v33 }
 0x647   :  { %v1551_v49 = vpop.f32.mrb[35].mxu0  ;;  %4827 = vmatmul.mubr.msk.bf16.vlgmr.msra.gmra.mrb[52].mxu1 %vm243_vm1, %v1640_v42  ;;  %v1614_v39 = vmul.f32 %v5461_v55, %v4809_v1 }
 0x648   :  { %v1612_v16 = vmul.f32 %v5463_v36, %v1551_v49 }
 0x64c   :  { %v4812_v9 = vpop.f32.mrb[36].mxu0 }
 0x64d   :  { %v1617_v3 = vmul.f32 %v6420_v13, %v4812_v9  ;;  %v1564_v2 = vpop.f32.mrb[37].mxu0 }
 0x64e   :  { %v1615_v14 = vmul.f32 %v5460_v5, %v1564_v2  ;;  %v4813_v59 = vpop.f32.mrb[38].mxu0 }
 0x64f   :  { %v1629_v60 = vadd.f32 %v1617_v3, %v1613_v57  ;;  %v1618_v44 = vmul.f32 %v5462_v58, %v4813_v59  ;;  %v1567_v46 = vpop.f32.mrb[39].mxu0 }
 0x650   :  { %v1627_v48 = vadd.f32 %v1615_v14, %v1611_v27  ;;  %v1616_v37 = vmul.f32 %v5464_v28, %v1567_v46 }
 0x651   :  { %v1630_v18 = vadd.f32 %v1618_v44, %v1614_v39 }
 0x652   :  { %v1628_v11 = vadd.f32 %v1616_v37, %v1612_v16 }
 0x654   :  { %v4816_v23 = vpop.f32.mrb[40].mxu0 }
 0x655   :  { %v1621_v21 = vmul.f32 %v5465_v31, %v4816_v23  ;;  %v1580_v43 = vpop.f32.mrb[41].mxu0 }
 0x656   :  { %v1619_v56 = vmul.f32 %v5466_v4, %v1580_v43  ;;  %v4817_v54 = vpop.f32.mrb[42].mxu0 }
 0x657   :  { %v1633_v0 = vadd.f32 %v1629_v60, %v1621_v21  ;;  %v1622_v13 = vmul.f32 %v5467_v45, %v4817_v54  ;;  %v1583_v41 = vpop.f32.mrb[43].mxu0  ;;  %v4358_v45 = vld [vmem:[%s7562_s14] ss:$0 sm:$0xff] }
 0x658   :  { %v1631_v8 = vadd.f32 %v1627_v48, %v1619_v56  ;;  %v1620_v5 = vmul.f32 %v5468_v19, %v1583_v41 }
 0x659   :  { %v1634_v47 = vadd.f32 %v1630_v18, %v1622_v13 }
 0x65a   :  { %v1632_v55 = vadd.f32 %v1628_v11, %v1620_v5 }
 0x65c   :  { %v4820_v24 = vpop.f32.mrb[48].mxu1 }
 0x65d   :  { %v1625_v58 = vmul.f32 %v5469_v52, %v4820_v24  ;;  %v1596_v63 = vpop.f32.mrb[49].mxu1 }
 0x65e   :  { %v1623_v36 = vmul.f32 %v5470_v62, %v1596_v63  ;;  %v4821_v25 = vpop.f32.mrb[50].mxu1 }
 0x65f   :  { %v1637_v28 = vadd.f32 %v1633_v0, %v1625_v58  ;;  %v1626_v50 = vmul.f32 %v5471_v35, %v4821_v25  ;;  %v1599_v22 = vpop.f32.mrb[51].mxu1 }
 0x660   :  { %v1635_v40 = vadd.f32 %v1631_v8, %v1623_v36  ;;  %v1624_v31 = vmul.f32 %v5472_v61, %v1599_v22 }
 0x661   :  { %v1638_v34 = vadd.f32 %v1634_v47, %v1626_v50 }
 0x662   :  { %v1636_v4 = vadd.f32 %v1632_v55, %v1624_v31 }
 0x663   :  { %v1642_v10 = vpack.c.bf16 %v1638_v34, %v1637_v28 }
 0x664   :  { %v1641_v53 = vpack.c.bf16 %v1636_v4, %v1635_v40 }
 0x666   :  { %4830 = vmatprep.mubr.msk.bf16.mxu1 %vm243_vm1, %v1641_v53 }
 0x667   :  { %4831 = vmatmul.mubr.msk.bf16.gmra.mrb[56].mxu1 %vm243_vm1, %v1642_v10 }
 0x71a   :  { %v4828_v19 = vpop.f32.mrb[52].mxu1 }
 0x71b   :  { %v1712_v52 = vpop.f32.mrb[53].mxu1  ;;  %v1721_v62 = vadd.f32 %v4828_v19, %v4358_v45 }
 0x71c   :  { %v1713_v6 = vadd.f32 %v4358_v45, %v1712_v52  ;;  %v4829_v35 = vpop.f32.mrb[54].mxu1 }
 0x71d   :  { %v1715_v7 = vpop.f32.mrb[55].mxu1  ;;  %v1724_v42 = vadd.f32 %v4829_v35, %v4358_v45  ;;  %v6478_v38 = vadd.f32 %v1721_v62, %v5696_v12 }
 0x71e   :  { %v6475_v61 = vadd.f32 %v1713_v6, %v5701_v15  ;;  %v1716_v51 = vadd.f32 %v4358_v45, %v1715_v7 }
 0x71f   :  { %v6486_v49 = vadd.f32 %v1724_v42, %v5703_v17  ;;  %v1759_v15 = vsel %vm243_vm1, %v6478_v38, 0.0 }
 0x720   :  { %v6481_v33 = vadd.f32 %v1716_v51, %v5707_v20  ;;  %v1753_v1 = vsel %vm243_vm1, %v6475_v61, 0.0 }
 0x721   :  { %1754 = vadd.xlane.f32.xlu0 %v1753_v1  ;;  %v1762_v12 = vsel %vm243_vm1, %v6486_v49, 0.0  ;;  %v5073_v1 = vld [vmem:[%s7565_s17] sm:$0xff]  }
 0x722   :  { %v1756_v9 = vsel %vm243_vm1, %v6481_v33, 0.0  ;;  %4834 = vmatprep.subr.bf16.mxu0 %v5073_v1 }
 0x723   :  { %1757 = vadd.xlane.f32.xlu1 %v1756_v9  ;;  %v5074_v9 = vld [vmem:[%s7565_s17 + $0x8] sm:$0xff]   ;;  %4835 = vmatpush3.bf16.msra.mxu0 %v5073_v1 }
 0x724   :  { %4836 = vmatprep.subr.bf16.mxu0 %v5074_v9 }
 0x725   :  { %1760 = vadd.xlane.f32.xlu0 %v1759_v15 }
 0x727   :  { %1763 = vadd.xlane.f32.xlu1 %v1762_v12  ;;  %4837 = vmatpush3.bf16.msra.mxu0 %v5074_v9 }
 0x73a   :  { %v4832_v20 = vpop.f32.mrb[56].mxu1 }
 0x73b   :  { %v1728_v57 = vpop.f32.mrb[57].mxu1  ;;  %v1737_v3 = vadd.f32 %v4832_v20, %v4358_v45 }
 0x73c   :  { %v1729_v2 = vadd.f32 %v4358_v45, %v1728_v57  ;;  %v4833_v27 = vpop.f32.mrb[58].mxu1 }
 0x73d   :  { %v1731_v14 = vpop.f32.mrb[59].mxu1  ;;  %v1740_v59 = vadd.f32 %v4833_v27, %v4358_v45  ;;  %v6498_v60 = vadd.f32 %v1737_v3, %v5717_v29 }
 0x73e   :  { %v6495_v17 = vadd.f32 %v1729_v2, %v5715_v26  ;;  %v1732_v39 = vadd.f32 %v4358_v45, %v1731_v14 }
 0x73f   :  { %v6506_v16 = vadd.f32 %v1740_v59, %v5723_v32  ;;  %v1771_v26 = vsel %vm243_vm1, %v6498_v60, 0.0 }
 0x740   :  { %v6501_v44 = vadd.f32 %v1732_v39, %v5719_v30  ;;  %v1765_v46 = vsel %vm243_vm1, %v6495_v17, 0.0 }
 0x741   :  { %1766 = vadd.xlane.f32.xlu0 %v1765_v46  ;;  %v1774_v29 = vsel %vm243_vm1, %v6506_v16, 0.0 }
 0x742   :  { %v1768_v48 = vsel %vm243_vm1, %v6501_v44, 0.0 }
 0x743   :  { %1769 = vadd.xlane.f32.xlu1 %v1768_v48 }
 0x745   :  { %1772 = vadd.xlane.f32.xlu0 %v1771_v26 }
 0x747   :  { %1775 = vadd.xlane.f32.xlu1 %v1774_v29  ;;  %v4365_v29 = vld [vmem:[%s7563_s15] ss:$0 sm:$0xff] }
 0x7ae   :  { %v1755_v30 = vpop.xlane.xlu0 %1754 }
 0x7af   :  { %v1777_v37 = vmul.f32 0.03125, %v1755_v30 }
 0x7b0   :  { %v1758_v18 = vpop.xlane.xlu1 %1757 }
 0x7b1   :  { %v6515_v11 = vsub.f32 %v6475_v61, %v1777_v37  ;;  %v1778_v32 = vmul.f32 0.03125, %v1758_v18 }
 0x7b2   :  { %v1761_v23 = vpop.xlane.xlu0 %1760 }
 0x7b3   :  { %v6518_v21 = vsub.f32 %v6481_v33, %v1778_v32  ;;  %v1779_v43 = vmul.f32 0.03125, %v1761_v23  ;;  %v1793_v56 = vmul.f32 %v6515_v11, %v6515_v11 }
 0x7b4   :  { %v1764_v54 = vpop.xlane.xlu1 %1763 }
 0x7b5   :  { %v6523_v0 = vsub.f32 %v6478_v38, %v1779_v43  ;;  %v1780_v13 = vmul.f32 0.03125, %v1764_v54  ;;  %v1801_v41 = vsel %vm243_vm1, %v1793_v56, 0.0  ;;  %v1794_v8 = vmul.f32 %v6518_v21, %v6518_v21  ;;  %v4366_v43 = vld [vmem:[%s7564_s16] ss:$0 sm:$0xff] }
 0x7b6   :  { %1802 = vadd.xlane.f32.xlu0 %v1801_v41 }
 0x7b7   :  { %v6529_v5 = vsub.f32 %v6486_v49, %v1780_v13  ;;  %v1804_v47 = vsel %vm243_vm1, %v1794_v8, 0.0  ;;  %v1795_v55 = vmul.f32 %v6523_v0, %v6523_v0 }
 0x7b8   :  { %1805 = vadd.xlane.f32.xlu1 %v1804_v47 }
 0x7b9   :  { %v1807_v24 = vsel %vm243_vm1, %v1795_v55, 0.0  ;;  %v1796_v58 = vmul.f32 %v6529_v5, %v6529_v5 }
 0x7ba   :  { %1808 = vadd.xlane.f32.xlu0 %v1807_v24 }
 0x7bb   :  { %v1810_v63 = vsel %vm243_vm1, %v1796_v58, 0.0 }
 0x7bc   :  { %1811 = vadd.xlane.f32.xlu1 %v1810_v63 }
 0x7ce   :  { %v1767_v36 = vpop.xlane.xlu0 %1766 }
 0x7cf   :  { %v1781_v25 = vmul.f32 0.03125, %v1767_v36 }
 0x7d0   :  { %v1770_v28 = vpop.xlane.xlu1 %1769 }
 0x7d1   :  { %v6539_v50 = vsub.f32 %v6495_v17, %v1781_v25  ;;  %v1782_v22 = vmul.f32 0.03125, %v1770_v28 }
 0x7d2   :  { %v1773_v40 = vpop.xlane.xlu0 %1772 }
 0x7d3   :  { %v6542_v31 = vsub.f32 %v6501_v44, %v1782_v22  ;;  %v1783_v34 = vmul.f32 0.03125, %v1773_v40  ;;  %v1797_v4 = vmul.f32 %v6539_v50, %v6539_v50 }
 0x7d4   :  { %v1776_v10 = vpop.xlane.xlu1 %1775 }
 0x7d5   :  { %v6547_v53 = vsub.f32 %v6498_v60, %v1783_v34  ;;  %v1784_v45 = vmul.f32 0.03125, %v1776_v10  ;;  %v1813_v19 = vsel %vm243_vm1, %v1797_v4, 0.0  ;;  %v1798_v52 = vmul.f32 %v6542_v31, %v6542_v31 }
 0x7d6   :  { %1814 = vadd.xlane.f32.xlu0 %v1813_v19 }
 0x7d7   :  { %v6553_v62 = vsub.f32 %v6506_v16, %v1784_v45  ;;  %v1816_v6 = vsel %vm243_vm1, %v1798_v52, 0.0  ;;  %v1799_v35 = vmul.f32 %v6547_v53, %v6547_v53 }
 0x7d8   :  { %1817 = vadd.xlane.f32.xlu1 %v1816_v6 }
 0x7d9   :  { %v1819_v7 = vsel %vm243_vm1, %v1799_v35, 0.0  ;;  %v1800_v42 = vmul.f32 %v6553_v62, %v6553_v62 }
 0x7da   :  { %1820 = vadd.xlane.f32.xlu0 %v1819_v7 }
 0x7db   :  { %v1822_v51 = vsel %vm243_vm1, %v1800_v42, 0.0 }
 0x7dc   :  { %1823 = vadd.xlane.f32.xlu1 %v1822_v51 }
 0x843   :  { %v1803_v15 = vpop.xlane.xlu0 %1802 }
 0x844   :  { %v1825_v12 = vmul.f32 0.03125, %v1803_v15 }
 0x845   :  { %v1806_v20 = vpop.xlane.xlu1 %1805 }
 0x846   :  { %v1833_v57 = vadd.f32 1e-06, %v1825_v12  ;;  %v1826_v3 = vmul.f32 0.03125, %v1806_v20 }
 0x847   :  { %v1809_v2 = vpop.xlane.xlu0 %1808 }
 0x848   :  { %5247 = vrsqrt.f32 %v1833_v57  ;;  %v1834_v27 = vadd.f32 1e-06, %v1826_v3  ;;  %v1827_v14 = vmul.f32 0.03125, %v1809_v2 }
 0x849   :  { %v1812_v59 = vpop.xlane.xlu1 %1811 }
 0x84a   :  { %5249 = vrsqrt.f32 %v1834_v27  ;;  %v1835_v39 = vadd.f32 1e-06, %v1827_v14  ;;  %v1828_v46 = vmul.f32 0.03125, %v1812_v59 }
 0x84c   :  { %5251 = vrsqrt.f32 %v1835_v39  ;;  %v1836_v48 = vadd.f32 1e-06, %v1828_v46  ;;  %v5078_v39 = vld [vmem:[%s7567_s19 + $0x18] sm:$0xff]   ;;  %v5079_v46 = vld [vmem:[%s7567_s19 + $0x20] sm:$0xff]  }
 0x84e   :  { %5253 = vrsqrt.f32 %v1836_v48  ;;  %v5080_v48 = vld [vmem:[%s7567_s19 + $0x28] sm:$0xff]  }
 0x852   :  { %v5248_v26 = vpop.eup %5247 }
 0x853   :  { %v1849_v30 = vmul.f32 %v5248_v26, %v6515_v11  ;;  %v5081_v26 = vld [vmem:[%s7567_s19 + $0x30] sm:$0xff]  }
 0x854   :  { %v5250_v37 = vpop.eup %5249 }
 0x855   :  { %v1850_v18 = vmul.f32 %v5250_v37, %v6518_v21  ;;  %v1863_v32 = vmul.f32 %v4365_v29, %v1849_v30  ;;  %v4367_v30 = vld [vmem:[%s7566_s18] ss:$0 sm:$0xff] }
 0x856   :  { %v5252_v23 = vpop.eup %5251 }
 0x857   :  { %v1851_v56 = vmul.f32 %v5252_v23, %v6523_v0  ;;  %v1864_v54 = vmul.f32 %v4365_v29, %v1850_v18  ;;  %v1877_v47 = vadd.f32 %v4366_v43, %v1863_v32 }
 0x858   :  { %v5254_v13 = vpop.eup %5253 }
 0x859   :  { %v1865_v41 = vmul.f32 %v4365_v29, %v1851_v56  ;;  %v1852_v8 = vmul.f32 %v5254_v13, %v6529_v5  ;;  %v1878_v55 = vadd.f32 %v4366_v43, %v1864_v54 }
 0x85b   :  { %v1866_v24 = vmul.f32 %v4365_v29, %v1852_v8  ;;  %v1885_v11 = vpack.c.bf16 %v1878_v55, %v1877_v47  ;;  %v1879_v58 = vadd.f32 %v4366_v43, %v1865_v41 }
 0x85d   :  { %v1880_v63 = vadd.f32 %v4366_v43, %v1866_v24  ;;  %4838 = vmatprep.mubr.msk.bf16.mxu0 %vm243_vm1, %v1885_v11 }
 0x85f   :  { %v1886_v21 = vpack.c.bf16 %v1880_v63, %v1879_v58 }
 0x861   :  { %4839 = vmatmul.mubr.msk.bf16.vlgmr.msra.gmra.mrb[44].mxu0 %vm243_vm1, %v1886_v21 }
 0x863   :  { %v1815_v36 = vpop.xlane.xlu0 %1814 }
 0x864   :  { %v1829_v25 = vmul.f32 0.03125, %v1815_v36 }
 0x865   :  { %v1818_v28 = vpop.xlane.xlu1 %1817 }
 0x866   :  { %v1837_v0 = vadd.f32 1e-06, %v1829_v25  ;;  %v1830_v22 = vmul.f32 0.03125, %v1818_v28 }
 0x867   :  { %v1821_v40 = vpop.xlane.xlu0 %1820 }
 0x868   :  { %5255 = vrsqrt.f32 %v1837_v0  ;;  %v1838_v34 = vadd.f32 1e-06, %v1830_v22  ;;  %v1831_v5 = vmul.f32 0.03125, %v1821_v40 }
 0x869   :  { %v1824_v4 = vpop.xlane.xlu1 %1823 }
 0x86a   :  { %5257 = vrsqrt.f32 %v1838_v34  ;;  %v1839_v10 = vadd.f32 1e-06, %v1831_v5  ;;  %v1832_v45 = vmul.f32 0.03125, %v1824_v4 }
 0x86c   :  { %5259 = vrsqrt.f32 %v1839_v10  ;;  %v1840_v19 = vadd.f32 1e-06, %v1832_v45 }
 0x86e   :  { %5261 = vrsqrt.f32 %v1840_v19 }
 0x872   :  { %v5256_v52 = vpop.eup %5255 }
 0x873   :  { %v1853_v6 = vmul.f32 %v5256_v52, %v6539_v50 }
 0x874   :  { %v5258_v35 = vpop.eup %5257 }
 0x875   :  { %v1854_v7 = vmul.f32 %v5258_v35, %v6542_v31  ;;  %v1867_v42 = vmul.f32 %v4365_v29, %v1853_v6  ;;  %v5075_v31 = vld [vmem:[%s7567_s19] sm:$0xff]  }
 0x876   :  { %v5260_v51 = vpop.eup %5259  ;;  %4846 = vmatprep.subr.bf16.mxu1 %v5075_v31 }
 0x877   :  { %v1868_v1 = vmul.f32 %v4365_v29, %v1854_v7  ;;  %v1855_v9 = vmul.f32 %v5260_v51, %v6547_v53  ;;  %v1881_v12 = vadd.f32 %v4366_v43, %v1867_v42  ;;  %4847 = vmatpush3.bf16.msra.mxu1 %v5075_v31  ;;  %v5076_v53 = vld [vmem:[%s7567_s19 + $0x8] sm:$0xff]  }
 0x878   :  { %v5262_v15 = vpop.eup %5261  ;;  %4848 = vmatprep.subr.bf16.mxu1 %v5076_v53 }
 0x879   :  { %v1882_v20 = vadd.f32 %v4366_v43, %v1868_v1  ;;  %v1856_v57 = vmul.f32 %v5262_v15, %v6553_v62  ;;  %v1869_v3 = vmul.f32 %v4365_v29, %v1855_v9  ;;  %v5077_v62 = vld [vmem:[%s7567_s19 + $0x10] sm:$0xff]  }
 0x87b   :  { %v1887_v2 = vpack.c.bf16 %v1882_v20, %v1881_v12  ;;  %v1870_v27 = vmul.f32 %v4365_v29, %v1856_v57  ;;  %v1883_v14 = vadd.f32 %v4366_v43, %v1869_v3  ;;  %4849 = vmatpush3.bf16.msra.mxu1 %v5076_v53  ;;  %v5082_v29 = vld [vmem:[%s7567_s19 + $0x38] sm:$0xff]  }
 0x87c   :  { %4850 = vmatprep.subr.bf16.mxu1 %v5077_v62 }
 0x87d   :  { %4842 = vmatprep.mubr.msk.bf16.mxu0 %vm243_vm1, %v1887_v2  ;;  %v1884_v50 = vadd.f32 %v4366_v43, %v1870_v27 }
 0x87f   :  { %v1888_v59 = vpack.c.bf16 %v1884_v50, %v1883_v14  ;;  %4851 = vmatpush3.bf16.msra.mxu1 %v5077_v62 }
 0x880   :  { %4852 = vmatprep.subr.bf16.mxu1 %v5078_v39 }
 0x881   :  { %4843 = vmatmul.mubr.msk.bf16.gmra.mrb[48].mxu0 %vm243_vm1, %v1888_v59 }
 0x883   :  { %4853 = vmatpush3.bf16.msra.mxu1 %v5078_v39 }
 0x884   :  { %4854 = vmatprep.subr.bf16.mxu1 %v5079_v46 }
 0x887   :  { %4855 = vmatpush3.bf16.msra.mxu1 %v5079_v46 }
 0x888   :  { %4856 = vmatprep.subr.bf16.mxu1 %v5080_v48 }
 0x88b   :  { %4857 = vmatpush3.bf16.msra.mxu1 %v5080_v48 }
 0x88c   :  { %4858 = vmatprep.subr.bf16.mxu1 %v5081_v26 }
 0x88f   :  { %4859 = vmatpush3.bf16.msra.mxu1 %v5081_v26 }
 0x890   :  { %4860 = vmatprep.subr.bf16.mxu1 %v5082_v29 }
 0x893   :  { %4861 = vmatpush3.bf16.msra.mxu1 %v5082_v29 }
 0x934   :  { %v4840_v37 = vpop.f32.mrb[44].mxu0 }
 0x935   :  { %v1967_v18 = vadd.f32 %v4840_v37, %v4367_v30  ;;  %v1958_v32 = vpop.f32.mrb[45].mxu0 }
 0x936   :  { %v1959_v23 = vadd.f32 %v4367_v30, %v1958_v32  ;;  %v4841_v43 = vpop.f32.mrb[46].mxu0 }
 0x937   :  { %v1991_v56 = vmul.f32 %v1967_v18, %v1967_v18  ;;  %v1970_v54 = vadd.f32 %v4841_v43, %v4367_v30  ;;  %v1961_v13 = vpop.f32.mrb[47].mxu0 }
 0x938   :  { %v1989_v41 = vmul.f32 %v1959_v23, %v1959_v23  ;;  %v1962_v8 = vadd.f32 %v4367_v30, %v1961_v13 }
 0x939   :  { %v1999_v47 = vmul.f32 %v1991_v56, %v1967_v18  ;;  %v1992_v55 = vmul.f32 %v1970_v54, %v1970_v54 }
 0x93a   :  { %v1997_v24 = vmul.f32 %v1989_v41, %v1959_v23  ;;  %v1990_v11 = vmul.f32 %v1962_v8, %v1962_v8 }
 0x93b   :  { %v2007_v58 = vmul.f32 0.044715, %v1999_v47  ;;  %v2000_v63 = vmul.f32 %v1992_v55, %v1970_v54 }
 0x93c   :  { %v2005_v21 = vmul.f32 0.044715, %v1997_v24  ;;  %v1998_v36 = vmul.f32 %v1990_v11, %v1962_v8 }
 0x93d   :  { %v2015_v25 = vadd.f32 %v2007_v58, %v1967_v18  ;;  %v2008_v28 = vmul.f32 0.044715, %v2000_v63 }
 0x93e   :  { %v2013_v0 = vadd.f32 %v2005_v21, %v1959_v23  ;;  %v2006_v22 = vmul.f32 0.044715, %v1998_v36 }
 0x93f   :  { %v2023_v40 = vmul.f32 0.7978846, %v2015_v25  ;;  %v2016_v34 = vadd.f32 %v2008_v28, %v1970_v54 }
 0x940   :  { %v2021_v5 = vmul.f32 0.7978846, %v2013_v0  ;;  %v2014_v4 = vadd.f32 %v2006_v22, %v1962_v8 }
 0x941   :  { %5263 = vtanh.f32 %v2023_v40  ;;  %v2024_v10 = vmul.f32 0.7978846, %v2016_v34 }
 0x942   :  { %5265 = vtanh.f32 %v2021_v5  ;;  %v2022_v45 = vmul.f32 0.7978846, %v2014_v4 }
 0x943   :  { %5267 = vtanh.f32 %v2024_v10 }
 0x944   :  { %5269 = vtanh.f32 %v2022_v45 }
 0x94b   :  { %v5264_v19 = vpop.eup %5263 }
 0x94c   :  { %v5266_v52 = vpop.eup %5265  ;;  %v2039_v6 = vadd.f32 1.0, %v5264_v19 }
 0x94d   :  { %v5268_v35 = vpop.eup %5267  ;;  %v2037_v7 = vadd.f32 1.0, %v5266_v52 }
 0x94e   :  { %v5270_v42 = vpop.eup %5269  ;;  %v2047_v51 = vmul.f32 0.5, %v2039_v6  ;;  %v2040_v1 = vadd.f32 1.0, %v5268_v35 }
 0x94f   :  { %v2038_v9 = vadd.f32 1.0, %v5270_v42  ;;  %v2045_v15 = vmul.f32 0.5, %v2037_v7 }
 0x950   :  { %v2048_v12 = vmul.f32 0.5, %v2040_v1  ;;  %v2055_v57 = vmul.f32 %v2047_v51, %v1967_v18 }
 0x951   :  { %v2046_v20 = vmul.f32 0.5, %v2038_v9  ;;  %v2053_v2 = vmul.f32 %v2045_v15, %v1959_v23  ;;  %v4374_v9 = vld [vmem:[%s7568_s20] ss:$0 sm:$0xff] }
 0x952   :  { %v2056_v3 = vmul.f32 %v2048_v12, %v1970_v54 }
 0x953   :  { %v2054_v27 = vmul.f32 %v2046_v20, %v1962_v8 }
 0x954   :  { %v2062_v14 = vpack.c.bf16 %v2056_v3, %v2055_v57  ;;  %v4844_v50 = vpop.f32.mrb[48].mxu0 }
 0x955   :  { %v1983_v59 = vadd.f32 %v4844_v50, %v4367_v30  ;;  %v1974_v31 = vpop.f32.mrb[49].mxu0  ;;  %v2061_v53 = vpack.c.bf16 %v2054_v27, %v2053_v2 }
 0x956   :  { %v1975_v62 = vadd.f32 %v4367_v30, %v1974_v31  ;;  %v4845_v39 = vpop.f32.mrb[50].mxu0 }
 0x957   :  { %v1995_v46 = vmul.f32 %v1983_v59, %v1983_v59  ;;  %v1986_v48 = vadd.f32 %v4845_v39, %v4367_v30  ;;  %v1977_v26 = vpop.f32.mrb[51].mxu0  ;;  %4862 = vmatprep.mubr.bf16.mxu1 %v2061_v53 }
 0x958   :  { %v1993_v29 = vmul.f32 %v1975_v62, %v1975_v62  ;;  %v1978_v37 = vadd.f32 %v4367_v30, %v1977_v26  ;;  %4863 = vmatmul.mubr.bf16.vlgmr.msra.gmra.mrb[60].mxu1 %v2062_v14 }
 0x959   :  { %v2003_v32 = vmul.f32 %v1995_v46, %v1983_v59  ;;  %v1996_v43 = vmul.f32 %v1986_v48, %v1986_v48 }
 0x95a   :  { %v2001_v18 = vmul.f32 %v1993_v29, %v1975_v62  ;;  %v1994_v56 = vmul.f32 %v1978_v37, %v1978_v37 }
 0x95b   :  { %v2011_v23 = vmul.f32 0.044715, %v2003_v32  ;;  %v2004_v54 = vmul.f32 %v1996_v43, %v1986_v48 }
 0x95c   :  { %v2009_v13 = vmul.f32 0.044715, %v2001_v18  ;;  %v2002_v41 = vmul.f32 %v1994_v56, %v1978_v37 }
 0x95d   :  { %v2019_v8 = vadd.f32 %v2011_v23, %v1983_v59  ;;  %v2012_v47 = vmul.f32 0.044715, %v2004_v54 }
 0x95e   :  { %v2017_v55 = vadd.f32 %v2009_v13, %v1975_v62  ;;  %v2010_v24 = vmul.f32 0.044715, %v2002_v41 }
 0x95f   :  { %v2027_v11 = vmul.f32 0.7978846, %v2019_v8  ;;  %v2020_v58 = vadd.f32 %v2012_v47, %v1986_v48 }
 0x960   :  { %v2025_v63 = vmul.f32 0.7978846, %v2017_v55  ;;  %v2018_v21 = vadd.f32 %v2010_v24, %v1978_v37 }
 0x961   :  { %5271 = vtanh.f32 %v2027_v11  ;;  %v2028_v36 = vmul.f32 0.7978846, %v2020_v58 }
 0x962   :  { %5273 = vtanh.f32 %v2025_v63  ;;  %v2026_v30 = vmul.f32 0.7978846, %v2018_v21 }
 0x963   :  { %5275 = vtanh.f32 %v2028_v36 }
 0x964   :  { %5277 = vtanh.f32 %v2026_v30 }
 0x96b   :  { %v5272_v25 = vpop.eup %5271 }
 0x96c   :  { %v5274_v28 = vpop.eup %5273  ;;  %v2043_v0 = vadd.f32 1.0, %v5272_v25 }
 0x96d   :  { %v5276_v22 = vpop.eup %5275  ;;  %v2041_v40 = vadd.f32 1.0, %v5274_v28 }
 0x96e   :  { %v5278_v34 = vpop.eup %5277  ;;  %v2044_v5 = vadd.f32 1.0, %v5276_v22  ;;  %v2051_v4 = vmul.f32 0.5, %v2043_v0 }
 0x96f   :  { %v2042_v10 = vadd.f32 1.0, %v5278_v34  ;;  %v2049_v45 = vmul.f32 0.5, %v2041_v40 }
 0x970   :  { %v2052_v19 = vmul.f32 0.5, %v2044_v5  ;;  %v2059_v6 = vmul.f32 %v2051_v4, %v1983_v59 }
 0x971   :  { %v2050_v52 = vmul.f32 0.5, %v2042_v10  ;;  %v2057_v7 = vmul.f32 %v2049_v45, %v1975_v62 }
 0x972   :  { %v2060_v35 = vmul.f32 %v2052_v19, %v1986_v48 }
 0x973   :  { %v2058_v42 = vmul.f32 %v2050_v52, %v1978_v37 }
 0x974   :  { %v2064_v51 = vpack.c.bf16 %v2060_v35, %v2059_v6 }
 0x975   :  { %v2063_v1 = vpack.c.bf16 %v2058_v42, %v2057_v7 }
 0x977   :  { %4866 = vmatprep.mubr.bf16.mxu1 %v2063_v1 }
 0x978   :  { %4867 = vmatmul.mubr.bf16.gmra.mrb[64].mxu1 %v2064_v51 }
 0xa2b   :  { %v4864_v15 = vpop.f32.mrb[60].mxu1 }
 0xa2c   :  { %v2170_v12 = vpop.f32.mrb[61].mxu1  ;;  %v2179_v20 = vadd.f32 %v4864_v15, %v4374_v9 }
 0xa2d   :  { %v2171_v57 = vadd.f32 %v4374_v9, %v2170_v12  ;;  %v4865_v3 = vpop.f32.mrb[62].mxu1 }
 0xa2e   :  { %v2173_v2 = vpop.f32.mrb[63].mxu1  ;;  %v2182_v14 = vadd.f32 %v4865_v3, %v4374_v9  ;;  %v6620_v59 = vadd.f32 %v2179_v20, %v6478_v38 }
 0xa2f   :  { %v6617_v27 = vadd.f32 %v2171_v57, %v6475_v61  ;;  %v2174_v50 = vadd.f32 %v4374_v9, %v2173_v2 }
 0xa30   :  { %v6628_v62 = vadd.f32 %v2182_v14, %v6486_v49  ;;  %v2219_v61 = vsel %vm243_vm1, %v6620_v59, 0.0 }
 0xa31   :  { %v6623_v31 = vadd.f32 %v2174_v50, %v6481_v33  ;;  %v2213_v53 = vsel %vm243_vm1, %v6617_v27, 0.0 }
 0xa32   :  { %2214 = vadd.xlane.f32.xlu0 %v2213_v53  ;;  %v2222_v38 = vsel %vm243_vm1, %v6628_v62, 0.0  ;;  %v5083_v53 = vld [vmem:[%s7599_s0 + $0x10] sm:$0xff]  }
 0xa33   :  { %v2216_v39 = vsel %vm243_vm1, %v6623_v31, 0.0  ;;  %4870 = vmatprep.subr.bf16.mxu0 %v5083_v53 }
 0xa34   :  { %2217 = vadd.xlane.f32.xlu1 %v2216_v39  ;;  %v5084_v39 = vld [vmem:[%s7559_s11 + $0x10] sm:$0xff]   ;;  %4871 = vmatpush3.bf16.msra.mxu0 %v5083_v53 }
 0xa35   :  { %4894 = vmatprep.subr.bf16.mxu1 %v5084_v39 }
 0xa36   :  { %2220 = vadd.xlane.f32.xlu0 %v2219_v61  ;;  %v5085_v61 = vld [vmem:[%s7599_s0 + $0x18] sm:$0xff]   ;;  %4895 = vmatpush3.bf16.msra.mxu1 %v5084_v39  ;;  %s5532_s0 = smov [#allocation2]  }
 0xa37   :  { %4872 = vmatprep.subr.bf16.mxu0 %v5085_v61  ;;  %s4282_s9 = sshll.u32 %s5532_s0, 4  ;;  %s4283_s9 = int_to_ptr.vmem [resolvable:$true] %s4282_s9 }
 0xa38   :  { %2223 = vadd.xlane.f32.xlu1 %v2222_v38  ;;  %v5086_v38 = vld [vmem:[%s7559_s11 + $0x18] sm:$0xff]   ;;  %4873 = vmatpush3.bf16.msra.mxu0 %v5085_v61  ;;  %p5511_p1 = scmp.lt.s32.totalorder %s4283_s9, %s4283_s9 }
 0xa39   :  { %4896 = vmatprep.subr.bf16.mxu1 %v5086_v38 }
 0xa3a   :  { %4897 = vmatpush3.bf16.msra.mxu1 %v5086_v38 }
 0xa4b   :  { %v4868_v33 = vpop.f32.mrb[64].mxu1 }
 0xa4c   :  { %v2186_v46 = vpop.f32.mrb[65].mxu1  ;;  %v2195_v48 = vadd.f32 %v4868_v33, %v4374_v9  ;;  %v5087_v33 = vld [vmem:[%s7600_s8 + $0x10] sm:$0xff]  }
 0xa4d   :  { %v2187_v26 = vadd.f32 %v4374_v9, %v2186_v46  ;;  %v4869_v29 = vpop.f32.mrb[66].mxu1  ;;  %4882 = vmatprep.subr.bf16.mxu0 %v5087_v33 }
 0xa4e   :  { %v2189_v37 = vpop.f32.mrb[67].mxu1  ;;  %v2198_v32 = vadd.f32 %v4869_v29, %v4374_v9  ;;  %v6640_v18 = vadd.f32 %v2195_v48, %v6498_v60 }
 0xa4f   :  { %v6637_v49 = vadd.f32 %v2187_v26, %v6495_v17  ;;  %v2190_v43 = vadd.f32 %v4374_v9, %v2189_v37 }
 0xa50   :  { %v6648_v54 = vadd.f32 %v2198_v32, %v6506_v16  ;;  %v2231_v17 = vsel %vm243_vm1, %v6640_v18, 0.0 }
 0xa51   :  { %v6643_v56 = vadd.f32 %v2190_v43, %v6501_v44  ;;  %v2225_v23 = vsel %vm243_vm1, %v6637_v49, 0.0 }
 0xa52   :  { %2226 = vadd.xlane.f32.xlu0 %v2225_v23  ;;  %v2234_v60 = vsel %vm243_vm1, %v6648_v54, 0.0 }
 0xa53   :  { %v2228_v13 = vsel %vm243_vm1, %v6643_v56, 0.0 }
 0xa54   :  { %2229 = vadd.xlane.f32.xlu1 %v2228_v13 }
 0xa56   :  { %2232 = vadd.xlane.f32.xlu0 %v2231_v17 }
 0xa58   :  { %2235 = vadd.xlane.f32.xlu1 %v2234_v60 }
 0xabf   :  { %v2215_v44 = vpop.xlane.xlu0 %2214 }
 0xac0   :  { %v2237_v41 = vmul.f32 0.03125, %v2215_v44 }
 0xac1   :  { %v2218_v8 = vpop.xlane.xlu1 %2217 }
 0xac2   :  { %v6657_v47 = vsub.f32 %v6617_v27, %v2237_v41  ;;  %v2238_v16 = vmul.f32 0.03125, %v2218_v8  ;;  %v4385_v8 = vld [vmem:[%s7601_s28 + $0x1] ss:$0 sm:$0xff] }
 0xac3   :  { %v2221_v55 = vpop.xlane.xlu0 %2220 }
 0xac4   :  { %v6660_v24 = vsub.f32 %v6623_v31, %v2238_v16  ;;  %v2239_v11 = vmul.f32 0.03125, %v2221_v55  ;;  %v2253_v58 = vmul.f32 %v6657_v47, %v6657_v47 }
 0xac5   :  { %v2224_v63 = vpop.xlane.xlu1 %2223 }
 0xac6   :  { %v6665_v21 = vsub.f32 %v6620_v59, %v2239_v11  ;;  %v2240_v36 = vmul.f32 0.03125, %v2224_v63  ;;  %v2261_v30 = vsel %vm243_vm1, %v2253_v58, 0.0  ;;  %v2254_v25 = vmul.f32 %v6660_v24, %v6660_v24 }
 0xac7   :  { %2262 = vadd.xlane.f32.xlu0 %v2261_v30 }
 0xac8   :  { %v6671_v28 = vsub.f32 %v6628_v62, %v2240_v36  ;;  %v2264_v0 = vsel %vm243_vm1, %v2254_v25, 0.0  ;;  %v2255_v22 = vmul.f32 %v6665_v21, %v6665_v21  ;;  %v4386_v36 = vld [vmem:[%s7602_s29 + $0x1] ss:$0 sm:$0xff] }
 0xac9   :  { %2265 = vadd.xlane.f32.xlu1 %v2264_v0 }
 0xaca   :  { %v2267_v40 = vsel %vm243_vm1, %v2255_v22, 0.0  ;;  %v2256_v34 = vmul.f32 %v6671_v28, %v6671_v28 }
 0xacb   :  { %2268 = vadd.xlane.f32.xlu0 %v2267_v40 }
 0xacc   :  { %v2270_v5 = vsel %vm243_vm1, %v2256_v34, 0.0 }
 0xacd   :  { %2271 = vadd.xlane.f32.xlu1 %v2270_v5 }
 0xadf   :  { %v2227_v4 = vpop.xlane.xlu0 %2226 }
 0xae0   :  { %v2241_v10 = vmul.f32 0.03125, %v2227_v4 }
 0xae1   :  { %v2230_v45 = vpop.xlane.xlu1 %2229 }
 0xae2   :  { %v6681_v19 = vsub.f32 %v6637_v49, %v2241_v10  ;;  %v2242_v52 = vmul.f32 0.03125, %v2230_v45 }
 0xae3   :  { %v2233_v6 = vpop.xlane.xlu0 %2232 }
 0xae4   :  { %v6684_v35 = vsub.f32 %v6643_v56, %v2242_v52  ;;  %v2243_v7 = vmul.f32 0.03125, %v2233_v6  ;;  %v2257_v42 = vmul.f32 %v6681_v19, %v6681_v19 }
 0xae5   :  { %v2236_v51 = vpop.xlane.xlu1 %2235 }
 0xae6   :  { %v6689_v1 = vsub.f32 %v6640_v18, %v2243_v7  ;;  %v2244_v9 = vmul.f32 0.03125, %v2236_v51  ;;  %v2273_v15 = vsel %vm243_vm1, %v2257_v42, 0.0  ;;  %v2258_v12 = vmul.f32 %v6684_v35, %v6684_v35 }
 0xae7   :  { %2274 = vadd.xlane.f32.xlu0 %v2273_v15 }
 0xae8   :  { %v6695_v20 = vsub.f32 %v6648_v54, %v2244_v9  ;;  %v2276_v57 = vsel %vm243_vm1, %v2258_v12, 0.0  ;;  %v2259_v3 = vmul.f32 %v6689_v1, %v6689_v1 }
 0xae9   :  { %2277 = vadd.xlane.f32.xlu1 %v2276_v57 }
 0xaea   :  { %v2279_v2 = vsel %vm243_vm1, %v2259_v3, 0.0  ;;  %v2260_v14 = vmul.f32 %v6695_v20, %v6695_v20 }
 0xaeb   :  { %2280 = vadd.xlane.f32.xlu0 %v2279_v2 }
 0xaec   :  { %v2282_v50 = vsel %vm243_vm1, %v2260_v14, 0.0 }
 0xaed   :  { %2283 = vadd.xlane.f32.xlu1 %v2282_v50 }
 0xb54   :  { %v2263_v46 = vpop.xlane.xlu0 %2262 }
 0xb55   :  { %v2285_v48 = vmul.f32 0.03125, %v2263_v46 }
 0xb56   :  { %v2266_v26 = vpop.xlane.xlu1 %2265 }
 0xb57   :  { %v2293_v29 = vadd.f32 1e-06, %v2285_v48  ;;  %v2286_v37 = vmul.f32 0.03125, %v2266_v26 }
 0xb58   :  { %v2269_v32 = vpop.xlane.xlu0 %2268 }
 0xb59   :  { %5279 = vrsqrt.f32 %v2293_v29  ;;  %v2294_v43 = vadd.f32 1e-06, %v2286_v37  ;;  %v2287_v23 = vmul.f32 0.03125, %v2269_v32 }
 0xb5a   :  { %v2272_v13 = vpop.xlane.xlu1 %2271 }
 0xb5b   :  { %5281 = vrsqrt.f32 %v2294_v43  ;;  %v2295_v17 = vadd.f32 1e-06, %v2287_v23  ;;  %v2288_v60 = vmul.f32 0.03125, %v2272_v13 }
 0xb5d   :  { %5283 = vrsqrt.f32 %v2295_v17  ;;  %v2296_v44 = vadd.f32 1e-06, %v2288_v60  ;;  %v6756_v60 = vld [vmem:[%s7560_s12 + $0x1] ss:$0 sm:$0xff] }
 0xb5f   :  { %5285 = vrsqrt.f32 %v2296_v44 }
 0xb63   :  { %v5280_v41 = vpop.eup %5279 }
 0xb64   :  { %v2309_v16 = vmul.f32 %v5280_v41, %v6657_v47 }
 0xb65   :  { %v5282_v55 = vpop.eup %5281 }
 0xb66   :  { %v2310_v11 = vmul.f32 %v5282_v55, %v6660_v24  ;;  %v2323_v58 = vmul.f32 %v4385_v8, %v2309_v16 }
 0xb67   :  { %v5284_v63 = vpop.eup %5283 }
 0xb68   :  { %v2311_v30 = vmul.f32 %v5284_v63, %v6665_v21  ;;  %v2324_v25 = vmul.f32 %v4385_v8, %v2310_v11  ;;  %v2337_v34 = vadd.f32 %v4386_v36, %v2323_v58  ;;  %v5088_v21 = vld [vmem:[%s7600_s8 + $0x18] sm:$0xff]  }
 0xb69   :  { %v5286_v0 = vpop.eup %5285 }
 0xb6a   :  { %v2325_v22 = vmul.f32 %v4385_v8, %v2311_v30  ;;  %v2312_v40 = vmul.f32 %v5286_v0, %v6671_v28  ;;  %v2338_v5 = vadd.f32 %v4386_v36, %v2324_v25  ;;  %v5473_v25 = vld [vmem:[%s7604_s4 + $0x10] sm:$0xff] }
 0xb6c   :  { %v2326_v4 = vmul.f32 %v4385_v8, %v2312_v40  ;;  %v2345_v47 = vpack.c.bf16 %v2338_v5, %v2337_v34  ;;  %v2339_v10 = vadd.f32 %v4386_v36, %v2325_v22  ;;  %v5474_v22 = vld [vmem:[%s7604_s4 + $0x30] sm:$0xff] }
 0xb6d   :  { %v5475_v34 = vld [vmem:[%s7604_s4 + $0x50] sm:$0xff] }
 0xb6e   :  { %v2340_v45 = vadd.f32 %v4386_v36, %v2326_v4  ;;  %4874 = vmatprep.mubr.msk.bf16.mxu0 %vm243_vm1, %v2345_v47  ;;  %4898 = vmatprep.mubr.msk.bf16.mxu1 %vm243_vm1, %v2345_v47  ;;  %v6780_v4 = vld [vmem:[%s7604_s4 + $0x70] sm:$0xff] }
 0xb70   :  { %v2346_v24 = vpack.c.bf16 %v2340_v45, %v2339_v10 }
 0xb72   :  { %4875 = vmatmul.mubr.msk.bf16.vlgmr.msra.gmra.mrb[52].mxu0 %vm243_vm1, %v2346_v24  ;;  %4899 = vmatmul.mubr.msk.bf16.vlgmr.msra.gmra.mrb[68].mxu1 %vm243_vm1, %v2346_v24 }
 0xb73   :  { %4883 = vmatpush3.bf16.msra.mxu0 %v5087_v33 }
 0xb74   :  { %v2275_v28 = vpop.xlane.xlu0 %2274  ;;  %4884 = vmatprep.subr.bf16.mxu0 %v5088_v21 }
 0xb75   :  { %v2289_v52 = vmul.f32 0.03125, %v2275_v28  ;;  %v5477_v28 = vld [vmem:[%s7604_s4] sm:$0xff] }
 0xb76   :  { %v2278_v6 = vpop.xlane.xlu1 %2277 }
 0xb77   :  { %v2297_v7 = vadd.f32 1e-06, %v2289_v52  ;;  %v2290_v42 = vmul.f32 0.03125, %v2278_v6  ;;  %4885 = vmatpush3.bf16.msra.mxu0 %v5088_v21  ;;  %v5478_v6 = vld [vmem:[%s7604_s4 + $0x20] sm:$0xff] }
 0xb78   :  { %v2281_v51 = vpop.xlane.xlu0 %2280 }
 0xb79   :  { %5287 = vrsqrt.f32 %v2297_v7  ;;  %v2298_v9 = vadd.f32 1e-06, %v2290_v42  ;;  %v2291_v15 = vmul.f32 0.03125, %v2281_v51  ;;  %v5479_v42 = vld [vmem:[%s7604_s4 + $0x40] sm:$0xff] }
 0xb7a   :  { %v2284_v12 = vpop.xlane.xlu1 %2283 }
 0xb7b   :  { %5289 = vrsqrt.f32 %v2298_v9  ;;  %v2299_v57 = vadd.f32 1e-06, %v2291_v15  ;;  %v2292_v3 = vmul.f32 0.03125, %v2284_v12  ;;  %v6805_v9 = vld [vmem:[%s7604_s4 + $0x60] sm:$0xff]  ;;  %v5481_v12 = vld [vmem:[%s7604_s4 + $0x18] sm:$0xff] }
 0xb7d   :  { %5291 = vrsqrt.f32 %v2299_v57  ;;  %v2300_v2 = vadd.f32 1e-06, %v2292_v3  ;;  %v5482_v3 = vld [vmem:[%s7604_s4 + $0x38] sm:$0xff] }
 0xb7f   :  { %5293 = vrsqrt.f32 %v2300_v2 }
 0xb83   :  { %v5288_v14 = vpop.eup %5287 }
 0xb84   :  { %v2313_v50 = vmul.f32 %v5288_v14, %v6681_v19  ;;  %v5483_v14 = vld [vmem:[%s7604_s4 + $0x58] sm:$0xff] }
 0xb85   :  { %v5290_v53 = vpop.eup %5289 }
 0xb86   :  { %v2314_v39 = vmul.f32 %v5290_v53, %v6684_v35  ;;  %v2327_v61 = vmul.f32 %v4385_v8, %v2313_v50  ;;  %v5484_v53 = vld [vmem:[%s7604_s4 + $0x78] sm:$0xff] }
 0xb87   :  { %v5292_v38 = vpop.eup %5291 }
 0xb88   :  { %v2315_v33 = vmul.f32 %v5292_v38, %v6689_v1  ;;  %v2328_v46 = vmul.f32 %v4385_v8, %v2314_v39  ;;  %v2341_v29 = vadd.f32 %v4386_v36, %v2327_v61  ;;  %v6751_v1 = vld [vmem:[%s7603_s3 + $0x1] ss:$0 sm:$0xff]  ;;  %v5485_v38 = vld [vmem:[%s7604_s4 + $0x8] sm:$0xff] }
 0xb89   :  { %v5294_v48 = vpop.eup %5293 }
 0xb8a   :  { %v2316_v26 = vmul.f32 %v5294_v48, %v6695_v20  ;;  %v2342_v37 = vadd.f32 %v4386_v36, %v2328_v46  ;;  %v2329_v32 = vmul.f32 %v4385_v8, %v2315_v33  ;;  %v5486_v46 = vld [vmem:[%s7604_s4 + $0x28] sm:$0xff] }
 0xb8c   :  { %v2347_v43 = vpack.c.bf16 %v2342_v37, %v2341_v29  ;;  %v2330_v23 = vmul.f32 %v4385_v8, %v2316_v26  ;;  %v2343_v19 = vadd.f32 %v4386_v36, %v2329_v32  ;;  %v5487_v26 = vld [vmem:[%s7604_s4 + $0x48] sm:$0xff] }
 0xb8d   :  { %v5488_v32 = vld [vmem:[%s7604_s4 + $0x68] sm:$0xff] }
 0xb8e   :  { %4878 = vmatprep.mubr.msk.bf16.mxu0 %vm243_vm1, %v2347_v43  ;;  %4902 = vmatprep.mubr.msk.bf16.mxu1 %vm243_vm1, %v2347_v43  ;;  %v2344_v13 = vadd.f32 %v4386_v36, %v2330_v23 }
 0xb90   :  { %v2348_v35 = vpack.c.bf16 %v2344_v13, %v2343_v19 }
 0xb92   :  { %4879 = vmatmul.mubr.msk.bf16.gmra.mrb[56].mxu0 %vm243_vm1, %v2348_v35  ;;  %4903 = vmatmul.mubr.msk.bf16.gmra.mrb[72].mxu1 %vm243_vm1, %v2348_v35 }
 0xb93   :  { %4886 = vmatprep.mubr.msk.bf16.mxu0 %vm243_vm1, %v2345_v47 }
 0xb9a   :  { %4887 = vmatmul.mubr.msk.bf16.vlgmr.msra.gmra.mrb[60].mxu0 %vm243_vm1, %v2346_v24 }
 0xb9b   :  { %4890 = vmatprep.mubr.msk.bf16.mxu0 %vm243_vm1, %v2347_v43 }
 0xba2   :  { %4891 = vmatmul.mubr.msk.bf16.gmra.mrb[64].mxu0 %vm243_vm1, %v2348_v35 }
 0xc45   :  { %v4876_v20 = vpop.f32.mrb[52].mxu0  ;;  %v4900_v17 = vpop.f32.mrb[68].mxu1 }
 0xc46   :  { %v2429_v44 = vadd.f32 %v4876_v20, %v6751_v1  ;;  %v2420_v41 = vpop.f32.mrb[53].mxu0  ;;  %v2604_v8 = vpop.f32.mrb[69].mxu1  ;;  %v2613_v58 = vadd.f32 %v4900_v17, %v6756_v60 }
 0xc47   :  { %v2421_v16 = vadd.f32 %v6751_v1, %v2420_v41  ;;  %v4877_v55 = vpop.f32.mrb[54].mxu0  ;;  %v4901_v11 = vpop.f32.mrb[70].mxu1  ;;  %v2605_v63 = vadd.f32 %v6756_v60, %v2604_v8 }
 0xc48   :  { %v2423_v36 = vpop.f32.mrb[55].mxu0  ;;  %v2607_v30 = vpop.f32.mrb[71].mxu1  ;;  %v6765_v0 = vmul.f32 %v5473_v25, %v2429_v44  ;;  %v6770_v40 = vmul.f32 %v5474_v22, %v2429_v44  ;;  %v6775_v5 = vmul.f32 %v5475_v34, %v2429_v44  ;;  %v6783_v47 = vmul.f32 %v6780_v4, %v2429_v44 }
 0xc49   :  { %v2432_v10 = vadd.f32 %v4877_v55, %v6751_v1  ;;  %v2616_v45 = vadd.f32 %v4901_v11, %v6756_v60  ;;  %v2424_v24 = vadd.f32 %v6751_v1, %v2423_v36  ;;  %v2608_v21 = vadd.f32 %v6756_v60, %v2607_v30 }
 0xc4a   :  { %v2639_v52 = vmul.f32 %v5477_v28, %v2421_v16  ;;  %v6795_v7 = vmul.f32 %v5478_v6, %v2421_v16  ;;  %v6800_v51 = vmul.f32 %v5479_v42, %v2421_v16  ;;  %v6808_v15 = vmul.f32 %v6805_v9, %v2421_v16 }
 0xc4b   :  { %v6813_v57 = vmul.f32 %v5481_v12, %v2432_v10  ;;  %v6818_v2 = vmul.f32 %v5482_v3, %v2432_v10  ;;  %v6823_v50 = vmul.f32 %v5483_v14, %v2432_v10  ;;  %v6828_v39 = vmul.f32 %v5484_v53, %v2432_v10 }
 0xc4c   :  { %v2636_v61 = vpack.c.bf16 %v2616_v45, %v2613_v58  ;;  %v2640_v33 = vmul.f32 %v5485_v38, %v2424_v24  ;;  %v6836_v48 = vmul.f32 %v5486_v46, %v2424_v24  ;;  %v6841_v29 = vmul.f32 %v5487_v26, %v2424_v24 }
 0xc4d   :  { %v2656_v37 = vpack.c.bf16 %v6813_v57, %v6765_v0  ;;  %v6848_v43 = vmul.f32 %v5488_v32, %v2424_v24  ;;  %v2635_v23 = vpack.c.bf16 %v2608_v21, %v2605_v63  ;;  %v2658_v19 = vpack.c.bf16 %v6818_v2, %v6770_v40 }
 0xc4e   :  { %v2655_v13 = vpack.c.bf16 %v2640_v33, %v2639_v52  ;;  %v2657_v35 = vpack.c.bf16 %v6836_v48, %v6795_v7  ;;  %v2659_v20 = vpack.c.bf16 %v6841_v29, %v6800_v51  ;;  %v2660_v17 = vpack.c.bf16 %v6823_v50, %v6775_v5  ;;  %v6958_v7 = vld [vmem:[%s7605_s6] ss:$0 sm:$0xff] }
 0xc4f   :  { %4926 = vmatprep.subr.bf16.mxu1 %v2635_v23  ;;  %v7606_v0 = vpack.c.bf16 %v6848_v43, %v6808_v15  ;;  %v7607_v40 = vpack.c.bf16 %v6828_v39, %v6783_v47 }
 0xc50   :  { %4927 = vmatpush3.bf16.msra.mxu1 %v2635_v23  ;;  %4910 = vmatprep.mubr.msk.bf16.mxu0 %vm243_vm1, %v2655_v13 }
 0xc51   :  { %4928 = vmatprep.subr.bf16.mxu1 %v2636_v61 }
 0xc54   :  { %4929 = vmatpush3.bf16.msra.mxu1 %v2636_v61 }
 0xc65   :  { %v4880_v8 = vpop.f32.mrb[56].mxu0  ;;  %v4904_v16 = vpop.f32.mrb[72].mxu1 }
 0xc66   :  { %v2445_v55 = vadd.f32 %v4880_v8, %v6751_v1  ;;  %v2629_v11 = vadd.f32 %v4904_v16, %v6756_v60  ;;  %v2436_v58 = vpop.f32.mrb[57].mxu0  ;;  %v2620_v63 = vpop.f32.mrb[73].mxu1 }
 0xc67   :  { %v2437_v36 = vadd.f32 %v6751_v1, %v2436_v58  ;;  %v4881_v30 = vpop.f32.mrb[58].mxu0  ;;  %v4905_v10 = vpop.f32.mrb[74].mxu1  ;;  %v2621_v61 = vadd.f32 %v6756_v60, %v2620_v63 }
 0xc68   :  { %v2439_v45 = vpop.f32.mrb[59].mxu0  ;;  %v2623_v24 = vpop.f32.mrb[75].mxu1  ;;  %v6866_v21 = vmul.f32 %v5473_v25, %v2445_v55  ;;  %v6868_v52 = vmul.f32 %v5474_v22, %v2445_v55  ;;  %v6870_v33 = vmul.f32 %v5475_v34, %v2445_v55  ;;  %v2448_v23 = vadd.f32 %v4881_v30, %v6751_v1 }
 0xc69   :  { %v2632_v13 = vadd.f32 %v4905_v10, %v6756_v60  ;;  %v2440_v8 = vadd.f32 %v6751_v1, %v2439_v45  ;;  %v2624_v16 = vadd.f32 %v6756_v60, %v2623_v24  ;;  %v6878_v58 = vmul.f32 %v6780_v4, %v2445_v55  ;;  %v4404_v1 = vld [vmem:[%s7558_s10 + $0x1] ss:$0 sm:$0xff] }
 0xc6a   :  { %v6880_v41 = vmul.f32 %v5477_v28, %v2437_v36  ;;  %v6882_v25 = vmul.f32 %v5478_v6, %v2437_v36  ;;  %v6884_v22 = vmul.f32 %v5479_v42, %v2437_v36  ;;  %v3126_v34 = vmul.f32 %v5481_v12, %v2448_v23 }
 0xc6b   :  { %v6886_v44 = vmul.f32 %v5482_v3, %v2448_v23  ;;  %v6888_v63 = vmul.f32 %v5483_v14, %v2448_v23  ;;  %v6890_v30 = vmul.f32 %v5484_v53, %v2448_v23  ;;  %v6895_v60 = vpack.c.bf16 %v2632_v13, %v2629_v11 }
 0xc6c   :  { %v3124_v4 = vmul.f32 %v5485_v38, %v2440_v8  ;;  %v3128_v28 = vmul.f32 %v5486_v46, %v2440_v8  ;;  %v3132_v55 = vmul.f32 %v5487_v26, %v2440_v8  ;;  %v3135_v42 = vmul.f32 %v6805_v9, %v2437_v36 }
 0xc6d   :  { %v4888_v6 = vpop.f32.mrb[60].mxu0  ;;  %v3140_v12 = vpack.c.bf16 %v3126_v34, %v6866_v21  ;;  %v3136_v3 = vmul.f32 %v5488_v32, %v2440_v8  ;;  %v6899_v10 = vpack.c.bf16 %v2624_v16, %v2621_v61  ;;  %v3142_v38 = vpack.c.bf16 %v6886_v44, %v6868_v52 }
 0xc6e   :  { %v2510_v14 = vpop.f32.mrb[61].mxu0  ;;  %v2519_v53 = vadd.f32 %v4888_v6, %v4404_v1  ;;  %v3139_v24 = vpack.c.bf16 %v3124_v4, %v6880_v41  ;;  %v3141_v23 = vpack.c.bf16 %v3128_v28, %v6882_v25  ;;  %v3143_v9 = vpack.c.bf16 %v3132_v55, %v6884_v22 }
 0xc6f   :  { %v4889_v45 = vpop.f32.mrb[62].mxu0  ;;  %4966 = vmatprep.subr.bf16.mxu1 %v6899_v10  ;;  %v3144_v32 = vpack.c.bf16 %v6888_v63, %v6870_v33  ;;  %v3145_v11 = vpack.c.bf16 %v3136_v3, %v3135_v42  ;;  %v2511_v36 = vadd.f32 %v4404_v1, %v2510_v14  ;;  %v3146_v41 = vpack.c.bf16 %v6890_v30, %v6878_v58 }
 0xc70   :  { %v2522_v46 = vadd.f32 %v4889_v45, %v4404_v1  ;;  %v2513_v26 = vpop.f32.mrb[63].mxu0 }
 0xc71   :  { %v2514_v21 = vadd.f32 %v4404_v1, %v2513_v26 }
 0xc72   :  { %v2542_v61 = vpack.c.bf16 %v2522_v46, %v2519_v53 }
 0xc73   :  { %v2541_v13 = vpack.c.bf16 %v2514_v21, %v2511_v36 }
 0xc74   :  { %v2691_v58 = vsel %vm243_vm1, %v2542_v61, 0 }
 0xc75   :  { %v4892_v8 = vpop.f32.mrb[64].mxu0  ;;  %5050 = vmatprep.subr.msk.bf16.mxu0 %vm243_vm1, %v2541_v13  ;;  %v2688_v44 = vsel %vm243_vm1, %v2541_v13, 0 }
 0xc76   :  { %v2526_v52 = vpop.f32.mrb[65].mxu0  ;;  %4907 = vmatpush3.bf16.xpose.msra.mxu0 %v2688_v44  ;;  %v2535_v25 = vadd.f32 %v4892_v8, %v4404_v1 }
 0xc77   :  { %v4893_v16 = vpop.f32.mrb[66].mxu0  ;;  %5051 = vmatprep.subr.msk.bf16.mxu0 %vm243_vm1, %v2542_v61  ;;  %v2527_v34 = vadd.f32 %v4404_v1, %v2526_v52 }
 0xc78   :  { %v2538_v33 = vadd.f32 %v4893_v16, %v4404_v1  ;;  %v2529_v22 = vpop.f32.mrb[67].mxu0 }
 0xc79   :  { %v2530_v63 = vadd.f32 %v4404_v1, %v2529_v22 }
 0xc7a   :  { %v2544_v4 = vpack.c.bf16 %v2538_v33, %v2535_v25 }
 0xc7b   :  { %v2543_v28 = vpack.c.bf16 %v2530_v63, %v2527_v34 }
 0xc7c   :  { %v3175_v1 = vsel %vm243_vm1, %v2544_v4, 0 }
 0xc7d   :  { %v3172_v30 = vsel %vm243_vm1, %v2543_v28, 0 }
 0xc7e   :  { %4909 = vmatpush3.bf16.xpose.msra.mxu0 %v2691_v58 }
 0xc7f   :  { %5052 = vmatprep.subr.msk.bf16.mxu0 %vm243_vm1, %v2543_v28 }
 0xc85   :  { %4911 = vmatmul.mubr.msk.bf16.vlgmr.msra.gmra.mrb[68].mxu0 %vm243_vm1, %v2656_v37 }
 0xc86   :  { %4914 = vmatprep.mubr.msk.bf16.mxu0 %vm243_vm1, %v2657_v35  ;;  %4947 = vmatpush3.bf16.xpose.msra.mxu0 %v3172_v30 }
 0xc87   :  { %5053 = vmatprep.subr.msk.bf16.mxu0 %vm243_vm1, %v2544_v4 }
 0xc8d   :  { %4915 = vmatmul.mubr.msk.bf16.gmra.mrb[72].mxu0 %vm243_vm1, %v2658_v19 }
 0xc8e   :  { %4918 = vmatprep.mubr.msk.bf16.mxu0 %vm243_vm1, %v2659_v20  ;;  %4949 = vmatpush3.bf16.xpose.msra.mxu0 %v3175_v1 }
 0xc95   :  { %4919 = vmatmul.mubr.msk.bf16.gmra.mrb[76].mxu0 %vm243_vm1, %v2660_v17 }
 0xc96   :  { %4922 = vmatprep.mubr.msk.bf16.mxu0 %vm243_vm1, %v7606_v0 }
 0xc9d   :  { %4923 = vmatmul.mubr.msk.bf16.gmra.mrb[80].mxu0 %vm243_vm1, %v7607_v40 }
 0xc9e   :  { %4950 = vmatprep.mubr.msk.bf16.mxu0 %vm243_vm1, %v3139_v24 }
 0xca5   :  { %4951 = vmatmul.mubr.msk.bf16.vlgmr.msra.gmra.mrb[84].mxu0 %vm243_vm1, %v3140_v12 }
 0xca6   :  { %4954 = vmatprep.mubr.msk.bf16.mxu0 %vm243_vm1, %v3141_v23 }
 0xcad   :  { %4955 = vmatmul.mubr.msk.bf16.gmra.mrb[88].mxu0 %vm243_vm1, %v3142_v38 }
 0xcae   :  { %4958 = vmatprep.mubr.msk.bf16.mxu0 %vm243_vm1, %v3143_v9 }
 0xcb5   :  { %4959 = vmatmul.mubr.msk.bf16.gmra.mrb[92].mxu0 %vm243_vm1, %v3144_v32 }
 0xcb6   :  { %4962 = vmatprep.mubr.msk.bf16.mxu0 %vm243_vm1, %v3145_v11 }
 0xcbd   :  { %4963 = vmatmul.mubr.msk.bf16.gmra.mrb[96].mxu0 %vm243_vm1, %v3146_v41 }
 0xd58   :  { %v4912_v5 = vpop.f32.mrb[68].mxu0 }
 0xd59   :  { %v2727_v47 = vpop.f32.mrb[69].mxu0  ;;  %v6964_v2 = vadd.f32 %v6958_v7, %v4912_v5 }
 0xd5a   :  { %v6961_v51 = vadd.f32 %v6958_v7, %v2727_v47  ;;  %v4913_v15 = vpop.f32.mrb[70].mxu0 }
 0xd5b   :  { %v2730_v57 = vpop.f32.mrb[71].mxu0  ;;  %v6972_v48 = vadd.f32 %v6958_v7, %v4913_v15  ;;  %v2796_v43 = vsel %vm243_vm1, %v6964_v2, -inf }
 0xd5c   :  { %v6967_v50 = vadd.f32 %v6958_v7, %v2730_v57  ;;  %v2790_v39 = vsel %vm243_vm1, %v6961_v51, -inf }
 0xd5d   :  { %2791 = vmax.xlane.f32.xlu0 %v2790_v39  ;;  %v2799_v17 = vsel %vm243_vm1, %v6972_v48, -inf }
 0xd5e   :  { %v2793_v29 = vsel %vm243_vm1, %v6967_v50, -inf }
 0xd5f   :  { %2794 = vmax.xlane.f32.xlu1 %v2793_v29 }
 0xd60   :  { %v4916_v37 = vpop.f32.mrb[72].mxu0 }
 0xd61   :  { %v2743_v19 = vpop.f32.mrb[73].mxu0  ;;  %2797 = vmax.xlane.f32.xlu0 %v2796_v43  ;;  %v6984_v6 = vadd.f32 %v6958_v7, %v4916_v37 }
 0xd62   :  { %v6979_v35 = vadd.f32 %v6958_v7, %v2743_v19  ;;  %v4917_v20 = vpop.f32.mrb[74].mxu0 }
 0xd63   :  { %v2746_v55 = vpop.f32.mrb[75].mxu0  ;;  %2800 = vmax.xlane.f32.xlu1 %v2799_v17  ;;  %v6992_v3 = vadd.f32 %v6958_v7, %v4917_v20  ;;  %v2808_v45 = vsel %vm243_vm1, %v6984_v6, -inf }
 0xd64   :  { %v6987_v42 = vadd.f32 %v6958_v7, %v2746_v55  ;;  %v2802_v12 = vsel %vm243_vm1, %v6979_v35, -inf }
 0xd65   :  { %2803 = vmax.xlane.f32.xlu0 %v2802_v12  ;;  %v2811_v46 = vsel %vm243_vm1, %v6992_v3, -inf }
 0xd66   :  { %v2805_v14 = vsel %vm243_vm1, %v6987_v42, -inf }
 0xd67   :  { %2806 = vmax.xlane.f32.xlu1 %v2805_v14 }
 0xd68   :  { %v4920_v53 = vpop.f32.mrb[76].mxu0 }
 0xd69   :  { %v2759_v24 = vpop.f32.mrb[77].mxu0  ;;  %2809 = vmax.xlane.f32.xlu0 %v2808_v45  ;;  %v7004_v9 = vadd.f32 %v6958_v7, %v4920_v53 }
 0xd6a   :  { %v6999_v23 = vadd.f32 %v6958_v7, %v2759_v24  ;;  %v4921_v38 = vpop.f32.mrb[78].mxu0 }
 0xd6b   :  { %v2762_v26 = vpop.f32.mrb[79].mxu0  ;;  %2812 = vmax.xlane.f32.xlu1 %v2811_v46  ;;  %v7012_v36 = vadd.f32 %v6958_v7, %v4921_v38  ;;  %v2820_v61 = vsel %vm243_vm1, %v7004_v9, -inf }
 0xd6c   :  { %v7007_v32 = vadd.f32 %v6958_v7, %v2762_v26  ;;  %v2814_v11 = vsel %vm243_vm1, %v6999_v23, -inf }
 0xd6d   :  { %2815 = vmax.xlane.f32.xlu0 %v2814_v11  ;;  %v2823_v52 = vsel %vm243_vm1, %v7012_v36, -inf }
 0xd6e   :  { %v2817_v21 = vsel %vm243_vm1, %v7007_v32, -inf }
 0xd6f   :  { %2818 = vmax.xlane.f32.xlu1 %v2817_v21 }
 0xd70   :  { %v4924_v41 = vpop.f32.mrb[80].mxu0 }
 0xd71   :  { %v2775_v13 = vpop.f32.mrb[81].mxu0  ;;  %2821 = vmax.xlane.f32.xlu0 %v2820_v61  ;;  %v7024_v25 = vadd.f32 %v6958_v7, %v4924_v41 }
 0xd72   :  { %v7019_v8 = vadd.f32 %v6958_v7, %v2775_v13  ;;  %v4925_v44 = vpop.f32.mrb[82].mxu0 }
 0xd73   :  { %v2778_v16 = vpop.f32.mrb[83].mxu0  ;;  %2824 = vmax.xlane.f32.xlu1 %v2823_v52  ;;  %v7032_v34 = vadd.f32 %v6958_v7, %v4925_v44  ;;  %v2832_v28 = vsel %vm243_vm1, %v7024_v25, -inf }
 0xd74   :  { %v7027_v33 = vadd.f32 %v6958_v7, %v2778_v16  ;;  %v2826_v22 = vsel %vm243_vm1, %v7019_v8, -inf }
 0xd75   :  { %2827 = vmax.xlane.f32.xlu0 %v2826_v22  ;;  %v2835_v0 = vsel %vm243_vm1, %v7032_v34, -inf }
 0xd76   :  { %v2829_v63 = vsel %vm243_vm1, %v7027_v33, -inf }
 0xd77   :  { %2830 = vmax.xlane.f32.xlu1 %v2829_v63 }
 0xd78   :  { %v4952_v4 = vpop.f32.mrb[84].mxu0 }
 0xd79   :  { %2833 = vmax.xlane.f32.xlu0 %v2832_v28  ;;  %v3211_v58 = vpop.f32.mrb[85].mxu0  ;;  %v7044_v5 = vadd.f32 %v6958_v7, %v4952_v4 }
 0xd7a   :  { %v7039_v30 = vadd.f32 %v6958_v7, %v3211_v58  ;;  %v4953_v1 = vpop.f32.mrb[86].mxu0 }
 0xd7b   :  { %2836 = vmax.xlane.f32.xlu1 %v2835_v0  ;;  %v3214_v40 = vpop.f32.mrb[87].mxu0  ;;  %v7052_v57 = vadd.f32 %v6958_v7, %v4953_v1  ;;  %v3280_v37 = vsel %vm243_vm1, %v7044_v5, -inf }
 0xd7c   :  { %v7047_v47 = vadd.f32 %v6958_v7, %v3214_v40  ;;  %v3274_v15 = vsel %vm243_vm1, %v7039_v30, -inf }
 0xd7d   :  { %3275 = vmax.xlane.f32.xlu0 %v3274_v15  ;;  %v3283_v17 = vsel %vm243_vm1, %v7052_v57, -inf }
 0xd7e   :  { %v3277_v39 = vsel %vm243_vm1, %v7047_v47, -inf }
 0xd7f   :  { %3278 = vmax.xlane.f32.xlu1 %v3277_v39 }
 0xd80   :  { %v4956_v29 = vpop.f32.mrb[88].mxu0 }
 0xd81   :  { %v3227_v43 = vpop.f32.mrb[89].mxu0  ;;  %3281 = vmax.xlane.f32.xlu0 %v3280_v37  ;;  %v7064_v12 = vadd.f32 %v6958_v7, %v4956_v29 }
 0xd82   :  { %v7059_v19 = vadd.f32 %v6958_v7, %v3227_v43  ;;  %v4957_v20 = vpop.f32.mrb[90].mxu0 }
 0xd83   :  { %v3230_v55 = vpop.f32.mrb[91].mxu0  ;;  %3284 = vmax.xlane.f32.xlu1 %v3283_v17  ;;  %v7072_v45 = vadd.f32 %v6958_v7, %v4957_v20  ;;  %v3292_v46 = vsel %vm243_vm1, %v7064_v12, -inf }
 0xd84   :  { %v7067_v14 = vadd.f32 %v6958_v7, %v3230_v55  ;;  %v3286_v53 = vsel %vm243_vm1, %v7059_v19, -inf }
 0xd85   :  { %3287 = vmax.xlane.f32.xlu0 %v3286_v53  ;;  %v3295_v41 = vsel %vm243_vm1, %v7072_v45, -inf }
 0xd86   :  { %v3289_v24 = vsel %vm243_vm1, %v7067_v14, -inf }
 0xd87   :  { %3290 = vmax.xlane.f32.xlu1 %v3289_v24 }
 0xd88   :  { %v4960_v38 = vpop.f32.mrb[92].mxu0 }
 0xd89   :  { %v3243_v26 = vpop.f32.mrb[93].mxu0  ;;  %3293 = vmax.xlane.f32.xlu0 %v3292_v46  ;;  %v7084_v13 = vadd.f32 %v6958_v7, %v4960_v38 }
 0xd8a   :  { %v7079_v11 = vadd.f32 %v6958_v7, %v3243_v26  ;;  %v4961_v21 = vpop.f32.mrb[94].mxu0 }
 0xd8b   :  { %v3246_v61 = vpop.f32.mrb[95].mxu0  ;;  %3296 = vmax.xlane.f32.xlu1 %v3295_v41  ;;  %v7092_v16 = vadd.f32 %v6958_v7, %v4961_v21  ;;  %v3304_v4 = vsel %vm243_vm1, %v7084_v13, -inf }
 0xd8c   :  { %v7087_v44 = vadd.f32 %v6958_v7, %v3246_v61  ;;  %v3298_v52 = vsel %vm243_vm1, %v7079_v11, -inf }
 0xd8d   :  { %3299 = vmax.xlane.f32.xlu0 %v3298_v52  ;;  %v3307_v0 = vsel %vm243_vm1, %v7092_v16, -inf }
 0xd8e   :  { %v3301_v22 = vsel %vm243_vm1, %v7087_v44, -inf }
 0xd8f   :  { %3302 = vmax.xlane.f32.xlu1 %v3301_v22 }
 0xd90   :  { %v4964_v63 = vpop.f32.mrb[96].mxu0 }
 0xd91   :  { %v3259_v28 = vpop.f32.mrb[97].mxu0  ;;  %3305 = vmax.xlane.f32.xlu0 %v3304_v4  ;;  %v7104_v15 = vadd.f32 %v6958_v7, %v4964_v63 }
 0xd92   :  { %v7099_v58 = vadd.f32 %v6958_v7, %v3259_v28  ;;  %v4965_v1 = vpop.f32.mrb[98].mxu0 }
 0xd93   :  { %v3262_v40 = vpop.f32.mrb[99].mxu0  ;;  %3308 = vmax.xlane.f32.xlu1 %v3307_v0  ;;  %v7112_v37 = vadd.f32 %v6958_v7, %v4965_v1  ;;  %v3316_v20 = vsel %vm243_vm1, %v7104_v15, -inf }
 0xd94   :  { %v7107_v39 = vadd.f32 %v6958_v7, %v3262_v40  ;;  %v3310_v29 = vsel %vm243_vm1, %v7099_v58, -inf }
 0xd95   :  { %3311 = vmax.xlane.f32.xlu0 %v3310_v29  ;;  %v3319_v17 = vsel %vm243_vm1, %v7112_v37, -inf }
 0xd96   :  { %v3313_v43 = vsel %vm243_vm1, %v7107_v39, -inf }
 0xd97   :  { %3314 = vmax.xlane.f32.xlu1 %v3313_v43 }
 0xd99   :  { %3317 = vmax.xlane.f32.xlu0 %v3316_v20 }
 0xd9b   :  { %3320 = vmax.xlane.f32.xlu1 %v3319_v17 }
 0xdea   :  { %v2792_v55 = vpop.xlane.xlu0 %2791 }
 0xdeb   :  { %v2838_v53 = vsub.f32 %v6961_v51, %v2792_v55 }
 0xdec   :  { %v2795_v24 = vpop.xlane.xlu1 %2794 }
 0xded   :  { %v2854_v38 = vmul.f32 1.442695, %v2838_v53  ;;  %v2839_v7 = vsub.f32 %v6967_v50, %v2795_v24 }
 0xdee   :  { %v2798_v46 = vpop.xlane.xlu0 %2797 }
 0xdef   :  { %5295 = vpow2.f32 %v2854_v38  ;;  %v2856_v26 = vmul.f32 1.442695, %v2839_v7  ;;  %v2840_v21 = vsub.f32 %v6964_v2, %v2798_v46 }
 0xdf0   :  { %v2801_v41 = vpop.xlane.xlu1 %2800 }
 0xdf1   :  { %5297 = vpow2.f32 %v2856_v26  ;;  %v2858_v61 = vmul.f32 1.442695, %v2840_v21  ;;  %v2841_v52 = vsub.f32 %v6972_v48, %v2801_v41 }
 0xdf2   :  { %v2804_v22 = vpop.xlane.xlu0 %2803 }
 0xdf3   :  { %5299 = vpow2.f32 %v2858_v61  ;;  %v2860_v63 = vmul.f32 1.442695, %v2841_v52  ;;  %v2842_v4 = vsub.f32 %v6979_v35, %v2804_v22 }
 0xdf4   :  { %v2807_v51 = vpop.xlane.xlu1 %2806 }
 0xdf5   :  { %5301 = vpow2.f32 %v2860_v63  ;;  %v2862_v28 = vmul.f32 1.442695, %v2842_v4  ;;  %v2843_v50 = vsub.f32 %v6987_v42, %v2807_v51 }
 0xdf6   :  { %v2810_v1 = vpop.xlane.xlu0 %2809 }
 0xdf7   :  { %5303 = vpow2.f32 %v2862_v28  ;;  %v2864_v0 = vmul.f32 1.442695, %v2843_v50  ;;  %v2844_v2 = vsub.f32 %v6984_v6, %v2810_v1 }
 0xdf8   :  { %v2813_v40 = vpop.xlane.xlu1 %2812 }
 0xdf9   :  { %v7127_v29 = vpop.eup %5295  ;;  %5305 = vpow2.f32 %v2864_v0  ;;  %v2866_v48 = vmul.f32 1.442695, %v2844_v2  ;;  %v2845_v43 = vsub.f32 %v6992_v3, %v2813_v40 }
 0xdfa   :  { %v2816_v20 = vpop.xlane.xlu0 %2815  ;;  %v2886_v35 = vsel %vm243_vm1, %v7127_v29, 0.0 }
 0xdfb   :  { %v7132_v17 = vpop.eup %5297  ;;  %5307 = vpow2.f32 %v2866_v48  ;;  %v2868_v42 = vmul.f32 1.442695, %v2845_v43  ;;  %v2846_v55 = vsub.f32 %v6999_v23, %v2816_v20  ;;  %2887 = vadd.xlane.f32.xlu0 %v2886_v35 }
 0xdfc   :  { %v2819_v53 = vpop.xlane.xlu1 %2818  ;;  %v2889_v6 = vsel %vm243_vm1, %v7132_v17, 0.0 }
 0xdfd   :  { %v7137_v24 = vpop.eup %5299  ;;  %5309 = vpow2.f32 %v2868_v42  ;;  %v2870_v38 = vmul.f32 1.442695, %v2846_v55  ;;  %v2847_v3 = vsub.f32 %v7007_v32, %v2819_v53  ;;  %2890 = vadd.xlane.f32.xlu1 %v2889_v6 }
 0xdfe   :  { %v2822_v7 = vpop.xlane.xlu0 %2821  ;;  %v2892_v46 = vsel %vm243_vm1, %v7137_v24, 0.0 }
 0xdff   :  { %v7142_v26 = vpop.eup %5301  ;;  %5311 = vpow2.f32 %v2870_v38  ;;  %v2872_v23 = vmul.f32 1.442695, %v2847_v3  ;;  %v2848_v21 = vsub.f32 %v7004_v9, %v2822_v7  ;;  %2893 = vadd.xlane.f32.xlu0 %v2892_v46 }
 0xe00   :  { %v2825_v41 = vpop.xlane.xlu1 %2824  ;;  %v2895_v61 = vsel %vm243_vm1, %v7142_v26, 0.0 }
 0xe01   :  { %v7147_v52 = vpop.eup %5303  ;;  %5313 = vpow2.f32 %v2872_v23  ;;  %v2874_v32 = vmul.f32 1.442695, %v2848_v21  ;;  %v2849_v22 = vsub.f32 %v7012_v36, %v2825_v41  ;;  %2896 = vadd.xlane.f32.xlu1 %v2895_v61 }
 0xe02   :  { %v2828_v63 = vpop.xlane.xlu0 %2827  ;;  %v2898_v4 = vsel %vm243_vm1, %v7147_v52, 0.0 }
 0xe03   :  { %v7152_v51 = vpop.eup %5305  ;;  %5315 = vpow2.f32 %v2874_v32  ;;  %v2876_v9 = vmul.f32 1.442695, %v2849_v22  ;;  %v2850_v28 = vsub.f32 %v7019_v8, %v2828_v63  ;;  %2899 = vadd.xlane.f32.xlu0 %v2898_v4 }
 0xe04   :  { %v2831_v50 = vpop.xlane.xlu1 %2830  ;;  %v2901_v1 = vsel %vm243_vm1, %v7152_v51, 0.0 }
 0xe05   :  { %v7157_v0 = vpop.eup %5307  ;;  %5317 = vpow2.f32 %v2876_v9  ;;  %v2878_v36 = vmul.f32 1.442695, %v2850_v28  ;;  %v2851_v2 = vsub.f32 %v7027_v33, %v2831_v50  ;;  %2902 = vadd.xlane.f32.xlu1 %v2901_v1 }
 0xe06   :  { %v2834_v40 = vpop.xlane.xlu0 %2833  ;;  %v2904_v48 = vsel %vm243_vm1, %v7157_v0, 0.0 }
 0xe07   :  { %v7162_v43 = vpop.eup %5309  ;;  %5319 = vpow2.f32 %v2878_v36  ;;  %v2880_v8 = vmul.f32 1.442695, %v2851_v2  ;;  %v2852_v20 = vsub.f32 %v7024_v25, %v2834_v40  ;;  %2905 = vadd.xlane.f32.xlu0 %v2904_v48 }
 0xe08   :  { %v2837_v35 = vpop.xlane.xlu1 %2836  ;;  %v2907_v42 = vsel %vm243_vm1, %v7162_v43, 0.0 }
 0xe09   :  { %v7167_v55 = vpop.eup %5311  ;;  %5321 = vpow2.f32 %v2880_v8  ;;  %v2882_v33 = vmul.f32 1.442695, %v2852_v20  ;;  %v2853_v53 = vsub.f32 %v7032_v34, %v2837_v35  ;;  %2908 = vadd.xlane.f32.xlu1 %v2907_v42 }
 0xe0a   :  { %v3276_v6 = vpop.xlane.xlu0 %3275  ;;  %v2910_v38 = vsel %vm243_vm1, %v7167_v55, 0.0 }
 0xe0b   :  { %v7172_v3 = vpop.eup %5313  ;;  %5323 = vpow2.f32 %v2882_v33  ;;  %v2884_v25 = vmul.f32 1.442695, %v2853_v53  ;;  %v3322_v7 = vsub.f32 %v7039_v30, %v3276_v6  ;;  %2911 = vadd.xlane.f32.xlu0 %v2910_v38 }
 0xe0c   :  { %v3279_v46 = vpop.xlane.xlu1 %3278  ;;  %v2913_v23 = vsel %vm243_vm1, %v7172_v3, 0.0 }
 0xe0d   :  { %v7177_v21 = vpop.eup %5315  ;;  %5325 = vpow2.f32 %v2884_v25  ;;  %v3338_v34 = vmul.f32 1.442695, %v3322_v7  ;;  %v3323_v41 = vsub.f32 %v7047_v47, %v3279_v46  ;;  %2914 = vadd.xlane.f32.xlu1 %v2913_v23 }
 0xe0e   :  { %v3282_v61 = vpop.xlane.xlu0 %3281  ;;  %v2916_v32 = vsel %vm243_vm1, %v7177_v21, 0.0 }
 0xe0f   :  { %v7182_v22 = vpop.eup %5317  ;;  %5327 = vpow2.f32 %v3338_v34  ;;  %v3340_v30 = vmul.f32 1.442695, %v3323_v41  ;;  %v3324_v63 = vsub.f32 %v7044_v5, %v3282_v61  ;;  %2917 = vadd.xlane.f32.xlu0 %v2916_v32 }
 0xe10   :  { %v3285_v4 = vpop.xlane.xlu1 %3284  ;;  %v2919_v9 = vsel %vm243_vm1, %v7182_v22, 0.0 }
 0xe11   :  { %v7187_v28 = vpop.eup %5319  ;;  %5329 = vpow2.f32 %v3340_v30  ;;  %v3342_v47 = vmul.f32 1.442695, %v3324_v63  ;;  %v3325_v50 = vsub.f32 %v7052_v57, %v3285_v4  ;;  %2920 = vadd.xlane.f32.xlu1 %v2919_v9 }
 0xe12   :  { %v3288_v1 = vpop.xlane.xlu0 %3287  ;;  %v2922_v36 = vsel %vm243_vm1, %v7187_v28, 0.0 }
 0xe13   :  { %v7192_v2 = vpop.eup %5321  ;;  %5331 = vpow2.f32 %v3342_v47  ;;  %v3344_v5 = vmul.f32 1.442695, %v3325_v50  ;;  %v3326_v40 = vsub.f32 %v7059_v19, %v3288_v1  ;;  %2923 = vadd.xlane.f32.xlu0 %v2922_v36 }
 0xe14   :  { %v3291_v48 = vpop.xlane.xlu1 %3290  ;;  %v2925_v8 = vsel %vm243_vm1, %v7192_v2, 0.0 }
 0xe15   :  { %v7197_v20 = vpop.eup %5323  ;;  %5333 = vpow2.f32 %v3344_v5  ;;  %v3346_v57 = vmul.f32 1.442695, %v3326_v40  ;;  %v3327_v35 = vsub.f32 %v7067_v14, %v3291_v48  ;;  %2926 = vadd.xlane.f32.xlu1 %v2925_v8 }
 0xe16   :  { %v3294_v42 = vpop.xlane.xlu0 %3293  ;;  %v2928_v33 = vsel %vm243_vm1, %v7197_v20, 0.0 }
 0xe17   :  { %v7202_v53 = vpop.eup %5325  ;;  %5335 = vpow2.f32 %v3346_v57  ;;  %v3348_v19 = vmul.f32 1.442695, %v3327_v35  ;;  %v3328_v6 = vsub.f32 %v7064_v12, %v3294_v42  ;;  %2929 = vadd.xlane.f32.xlu0 %v2928_v33 }
 0xe18   :  { %v3297_v38 = vpop.xlane.xlu1 %3296  ;;  %v2931_v25 = vsel %vm243_vm1, %v7202_v53, 0.0 }
 0xe19   :  { %v7207_v7 = vpop.eup %5327  ;;  %5337 = vpow2.f32 %v3348_v19  ;;  %v3350_v14 = vmul.f32 1.442695, %v3328_v6  ;;  %v3329_v46 = vsub.f32 %v7072_v45, %v3297_v38  ;;  %2932 = vadd.xlane.f32.xlu1 %v2931_v25 }
 0xe1a   :  { %v3300_v23 = vpop.xlane.xlu0 %3299  ;;  %v3370_v34 = vsel %vm243_vm1, %v7207_v7, 0.0 }
 0xe1b   :  { %v7212_v41 = vpop.eup %5329  ;;  %5339 = vpow2.f32 %v3350_v14  ;;  %v3352_v12 = vmul.f32 1.442695, %v3329_v46  ;;  %v3330_v61 = vsub.f32 %v7079_v11, %v3300_v23  ;;  %3371 = vadd.xlane.f32.xlu0 %v3370_v34 }
 0xe1c   :  { %v3303_v32 = vpop.xlane.xlu1 %3302  ;;  %v3373_v30 = vsel %vm243_vm1, %v7212_v41, 0.0 }
 0xe1d   :  { %v7217_v63 = vpop.eup %5331  ;;  %5341 = vpow2.f32 %v3352_v12  ;;  %v3354_v45 = vmul.f32 1.442695, %v3330_v61  ;;  %v3331_v4 = vsub.f32 %v7087_v44, %v3303_v32  ;;  %3374 = vadd.xlane.f32.xlu1 %v3373_v30 }
 0xe1e   :  { %v3306_v9 = vpop.xlane.xlu0 %3305  ;;  %v3376_v47 = vsel %vm243_vm1, %v7217_v63, 0.0 }
 0xe1f   :  { %v7222_v50 = vpop.eup %5333  ;;  %5343 = vpow2.f32 %v3354_v45  ;;  %v3356_v11 = vmul.f32 1.442695, %v3331_v4  ;;  %v3332_v1 = vsub.f32 %v7084_v13, %v3306_v9  ;;  %3377 = vadd.xlane.f32.xlu0 %v3376_v47 }
 0xe20   :  { %v3309_v36 = vpop.xlane.xlu1 %3308  ;;  %v3379_v5 = vsel %vm243_vm1, %v7222_v50, 0.0 }
 0xe21   :  { %v7227_v40 = vpop.eup %5335  ;;  %5345 = vpow2.f32 %v3356_v11  ;;  %v3358_v44 = vmul.f32 1.442695, %v3332_v1  ;;  %v3333_v48 = vsub.f32 %v7092_v16, %v3309_v36  ;;  %3380 = vadd.xlane.f32.xlu1 %v3379_v5 }
 0xe22   :  { %v3312_v8 = vpop.xlane.xlu0 %3311  ;;  %v3382_v57 = vsel %vm243_vm1, %v7227_v40, 0.0 }
 0xe23   :  { %v7232_v35 = vpop.eup %5337  ;;  %5347 = vpow2.f32 %v3358_v44  ;;  %v3360_v13 = vmul.f32 1.442695, %v3333_v48  ;;  %v3334_v42 = vsub.f32 %v7099_v58, %v3312_v8  ;;  %3383 = vadd.xlane.f32.xlu0 %v3382_v57 }
 0xe24   :  { %v3315_v33 = vpop.xlane.xlu1 %3314  ;;  %v3385_v19 = vsel %vm243_vm1, %v7232_v35, 0.0 }
 0xe25   :  { %v7237_v6 = vpop.eup %5339  ;;  %5349 = vpow2.f32 %v3360_v13  ;;  %v3362_v16 = vmul.f32 1.442695, %v3334_v42  ;;  %v3335_v38 = vsub.f32 %v7107_v39, %v3315_v33  ;;  %3386 = vadd.xlane.f32.xlu1 %v3385_v19 }
 0xe26   :  { %v3318_v25 = vpop.xlane.xlu0 %3317  ;;  %v3388_v14 = vsel %vm243_vm1, %v7237_v6, 0.0 }
 0xe27   :  { %v7242_v46 = vpop.eup %5341  ;;  %5351 = vpow2.f32 %v3362_v16  ;;  %v3364_v58 = vmul.f32 1.442695, %v3335_v38  ;;  %v3336_v23 = vsub.f32 %v7104_v15, %v3318_v25  ;;  %3389 = vadd.xlane.f32.xlu0 %v3388_v14 }
 0xe28   :  { %v3321_v34 = vpop.xlane.xlu1 %3320  ;;  %v3391_v12 = vsel %vm243_vm1, %v7242_v46, 0.0 }
 0xe29   :  { %v7247_v61 = vpop.eup %5343  ;;  %5353 = vpow2.f32 %v3364_v58  ;;  %v3366_v39 = vmul.f32 1.442695, %v3336_v23  ;;  %v3337_v32 = vsub.f32 %v7112_v37, %v3321_v34  ;;  %3392 = vadd.xlane.f32.xlu1 %v3391_v12 }
 0xe2a   :  { %v3394_v30 = vsel %vm243_vm1, %v7247_v61, 0.0 }
 0xe2b   :  { %v7252_v45 = vpop.eup %5345  ;;  %5355 = vpow2.f32 %v3366_v39  ;;  %v3368_v4 = vmul.f32 1.442695, %v3337_v32  ;;  %3395 = vadd.xlane.f32.xlu0 %v3394_v30 }
 0xe2c   :  { %v3397_v15 = vsel %vm243_vm1, %v7252_v45, 0.0 }
 0xe2d   :  { %v7256_v9 = vpop.eup %5347  ;;  %5357 = vpow2.f32 %v3368_v4  ;;  %3398 = vadd.xlane.f32.xlu1 %v3397_v15 }
 0xe2e   :  { %v3400_v47 = vsel %vm243_vm1, %v7256_v9, 0.0 }
 0xe2f   :  { %v7260_v37 = vpop.eup %5349  ;;  %3401 = vadd.xlane.f32.xlu0 %v3400_v47 }
 0xe30   :  { %v3403_v11 = vsel %vm243_vm1, %v7260_v37, 0.0 }
 0xe31   :  { %v7264_v1 = vpop.eup %5351  ;;  %3404 = vadd.xlane.f32.xlu1 %v3403_v11 }
 0xe32   :  { %v3406_v36 = vsel %vm243_vm1, %v7264_v1, 0.0 }
 0xe33   :  { %v7268_v5 = vpop.eup %5353  ;;  %3407 = vadd.xlane.f32.xlu0 %v3406_v36 }
 0xe34   :  { %v3409_v44 = vsel %vm243_vm1, %v7268_v5, 0.0 }
 0xe35   :  { %v7272_v48 = vpop.eup %5355  ;;  %3410 = vadd.xlane.f32.xlu1 %v3409_v44 }
 0xe36   :  { %v3412_v8 = vsel %vm243_vm1, %v7272_v48, 0.0 }
 0xe37   :  { %v7276_v57 = vpop.eup %5357  ;;  %3413 = vadd.xlane.f32.xlu0 %v3412_v8 }
 0xe38   :  { %v3415_v13 = vsel %vm243_vm1, %v7276_v57, 0.0 }
 0xe39   :  { %3416 = vadd.xlane.f32.xlu1 %v3415_v13 }
 0xe88   :  { %v2888_v42 = vpop.xlane.xlu0 %2887 }
 0xe89   :  { %5359 = vrcp.f32 %v2888_v42 }
 0xe8a   :  { %v2891_v33 = vpop.xlane.xlu1 %2890 }
 0xe8b   :  { %5361 = vrcp.f32 %v2891_v33 }
 0xe8c   :  { %v2894_v19 = vpop.xlane.xlu0 %2893 }
 0xe8d   :  { %5363 = vrcp.f32 %v2894_v19 }
 0xe8e   :  { %v2897_v16 = vpop.xlane.xlu1 %2896 }
 0xe8f   :  { %5365 = vrcp.f32 %v2897_v16 }
 0xe90   :  { %v2900_v38 = vpop.xlane.xlu0 %2899 }
 0xe91   :  { %5367 = vrcp.f32 %v2900_v38 }
 0xe92   :  { %v2903_v25 = vpop.xlane.xlu1 %2902 }
 0xe93   :  { %v5360_v14 = vpop.eup %5359  ;;  %5369 = vrcp.f32 %v2903_v25 }
 0xe94   :  { %v2906_v58 = vpop.xlane.xlu0 %2905  ;;  %v2950_v12 = vmul.f32 %v5360_v14, %v7127_v29 }
 0xe95   :  { %v5362_v23 = vpop.eup %5361  ;;  %5371 = vrcp.f32 %v2906_v58 }
 0xe96   :  { %v2909_v34 = vpop.xlane.xlu1 %2908  ;;  %v2951_v39 = vmul.f32 %v5362_v23, %v7132_v17 }
 0xe97   :  { %v5364_v32 = vpop.eup %5363  ;;  %5373 = vrcp.f32 %v2909_v34 }
 0xe98   :  { %v2912_v30 = vpop.xlane.xlu0 %2911  ;;  %v2966_v4 = vpack.c.bf16 %v2951_v39, %v2950_v12  ;;  %v2952_v47 = vmul.f32 %v5364_v32, %v7137_v24 }
 0xe99   :  { %v5366_v15 = vpop.eup %5365  ;;  %5375 = vrcp.f32 %v2912_v30 }
 0xe9a   :  { %v2953_v11 = vmul.f32 %v5366_v15, %v7142_v26  ;;  %v2915_v36 = vpop.xlane.xlu1 %2914  ;;  %4930 = vmatprep.mubr.msk.bf16.mxu1 %vm243_vm1, %v2966_v4 }
 0xe9b   :  { %v5368_v44 = vpop.eup %5367  ;;  %5377 = vrcp.f32 %v2915_v36 }
 0xe9c   :  { %v2967_v8 = vpack.c.bf16 %v2953_v11, %v2952_v47  ;;  %v2918_v13 = vpop.xlane.xlu0 %2917  ;;  %v2954_v42 = vmul.f32 %v5368_v44, %v7147_v52 }
 0xe9d   :  { %v5370_v29 = vpop.eup %5369  ;;  %5379 = vrcp.f32 %v2918_v13 }
 0xe9e   :  { %v2921_v17 = vpop.xlane.xlu1 %2920  ;;  %4931 = vmatmul.mubr.msk.bf16.vlgmr.msra.gmra.mrb[76].mxu1 %vm243_vm1, %v2967_v8  ;;  %v2955_v33 = vmul.f32 %v5370_v29, %v7152_v51 }
 0xe9f   :  { %v5372_v19 = vpop.eup %5371  ;;  %5381 = vrcp.f32 %v2921_v17  ;;  %4967 = vmatpush3.bf16.msra.mxu1 %v6899_v10 }
 0xea0   :  { %4968 = vmatprep.subr.bf16.mxu1 %v6895_v60  ;;  %v2924_v24 = vpop.xlane.xlu0 %2923  ;;  %v2968_v26 = vpack.c.bf16 %v2955_v33, %v2954_v42  ;;  %v2956_v25 = vmul.f32 %v5372_v19, %v7157_v0 }
 0xea1   :  { %v5374_v16 = vpop.eup %5373  ;;  %5383 = vrcp.f32 %v2924_v24 }
 0xea2   :  { %v2927_v38 = vpop.xlane.xlu1 %2926  ;;  %4934 = vmatprep.mubr.msk.bf16.mxu1 %vm243_vm1, %v2968_v26  ;;  %v2957_v14 = vmul.f32 %v5374_v16, %v7162_v43 }
 0xea3   :  { %v5376_v52 = vpop.eup %5375  ;;  %5385 = vrcp.f32 %v2927_v38  ;;  %4969 = vmatpush3.bf16.msra.mxu1 %v6895_v60 }
 0xea4   :  { %v2930_v51 = vpop.xlane.xlu0 %2929  ;;  %v2969_v58 = vpack.c.bf16 %v2957_v14, %v2956_v25  ;;  %v2958_v34 = vmul.f32 %v5376_v52, %v7167_v55 }
 0xea5   :  { %v5378_v10 = vpop.eup %5377  ;;  %5387 = vrcp.f32 %v2930_v51 }
 0xea6   :  { %v2933_v23 = vpop.xlane.xlu1 %2932  ;;  %4935 = vmatmul.mubr.msk.bf16.gmra.mrb[80].mxu1 %vm243_vm1, %v2969_v58  ;;  %v2959_v12 = vmul.f32 %v5378_v10, %v7172_v3 }
 0xea7   :  { %v5380_v39 = vpop.eup %5379  ;;  %5389 = vrcp.f32 %v2933_v23 }
 0xea8   :  { %v3372_v0 = vpop.xlane.xlu0 %3371  ;;  %v2970_v32 = vpack.c.bf16 %v2959_v12, %v2958_v34  ;;  %v2960_v60 = vmul.f32 %v5380_v39, %v7177_v21 }
 0xea9   :  { %v5382_v43 = vpop.eup %5381  ;;  %5391 = vrcp.f32 %v3372_v0 }
 0xeaa   :  { %v3375_v30 = vpop.xlane.xlu1 %3374  ;;  %4938 = vmatprep.mubr.msk.bf16.mxu1 %vm243_vm1, %v2970_v32  ;;  %v2961_v4 = vmul.f32 %v5382_v43, %v7182_v22 }
 0xeab   :  { %v5384_v15 = vpop.eup %5383  ;;  %5393 = vrcp.f32 %v3375_v30 }
 0xeac   :  { %v3378_v47 = vpop.xlane.xlu0 %3377  ;;  %v2971_v11 = vpack.c.bf16 %v2961_v4, %v2960_v60  ;;  %v2962_v36 = vmul.f32 %v5384_v15, %v7187_v28 }
 0xead   :  { %v5386_v55 = vpop.eup %5385  ;;  %5395 = vrcp.f32 %v3378_v47 }
 0xeae   :  { %v3381_v3 = vpop.xlane.xlu1 %3380  ;;  %4939 = vmatmul.mubr.msk.bf16.gmra.mrb[84].mxu1 %vm243_vm1, %v2971_v11  ;;  %v2963_v44 = vmul.f32 %v5386_v55, %v7192_v2 }
 0xeaf   :  { %v5388_v8 = vpop.eup %5387  ;;  %5397 = vrcp.f32 %v3381_v3 }
 0xeb0   :  { %v3384_v13 = vpop.xlane.xlu0 %3383  ;;  %v2972_v29 = vpack.c.bf16 %v2963_v44, %v2962_v36  ;;  %v2964_v17 = vmul.f32 %v5388_v8, %v7197_v20 }
 0xeb1   :  { %v5390_v21 = vpop.eup %5389  ;;  %5399 = vrcp.f32 %v3384_v13 }
 0xeb2   :  { %v3387_v22 = vpop.xlane.xlu1 %3386  ;;  %4942 = vmatprep.mubr.msk.bf16.mxu1 %vm243_vm1, %v2972_v29  ;;  %v2965_v42 = vmul.f32 %v5390_v21, %v7202_v53 }
 0xeb3   :  { %v5392_v33 = vpop.eup %5391  ;;  %5401 = vrcp.f32 %v3387_v22 }
 0xeb4   :  { %v3390_v19 = vpop.xlane.xlu0 %3389  ;;  %v2973_v24 = vpack.c.bf16 %v2965_v42, %v2964_v17  ;;  %v3434_v26 = vmul.f32 %v5392_v33, %v7207_v7 }
 0xeb5   :  { %v5394_v28 = vpop.eup %5393  ;;  %5403 = vrcp.f32 %v3390_v19 }
 0xeb6   :  { %v3393_v2 = vpop.xlane.xlu1 %3392  ;;  %4943 = vmatmul.mubr.msk.bf16.gmra.mrb[88].mxu1 %vm243_vm1, %v2973_v24  ;;  %v3435_v16 = vmul.f32 %v5394_v28, %v7212_v41  ;;  %v7340_v24 = vld [vmem:[%s7604_s4 + $0x10] sm:$0xff] }
 0xeb7   :  { %v5396_v38 = vpop.eup %5395  ;;  %5405 = vrcp.f32 %v3393_v2  ;;  %v7346_v2 = vld [vmem:[%s7604_s4 + $0x30] sm:$0xff] }
 0xeb8   :  { %v3396_v25 = vpop.xlane.xlu0 %3395  ;;  %v3450_v14 = vpack.c.bf16 %v3435_v16, %v3434_v26  ;;  %v3436_v53 = vmul.f32 %v5396_v38, %v7217_v63  ;;  %v5492_v38 = vld [vmem:[%s7604_s4] sm:$0xff] }
 0xeb9   :  { %v5398_v20 = vpop.eup %5397  ;;  %5407 = vrcp.f32 %v3396_v25 }
 0xeba   :  { %v3437_v52 = vmul.f32 %v5398_v20, %v7222_v50  ;;  %v3399_v51 = vpop.xlane.xlu1 %3398  ;;  %4970 = vmatprep.mubr.msk.bf16.mxu1 %vm243_vm1, %v3450_v14  ;;  %v5493_v14 = vld [vmem:[%s7604_s4 + $0x20] sm:$0xff] }
 0xebb   :  { %v5400_v58 = vpop.eup %5399  ;;  %5409 = vrcp.f32 %v3399_v51 }
 0xebc   :  { %v3451_v10 = vpack.c.bf16 %v3437_v52, %v3436_v53  ;;  %v3402_v23 = vpop.xlane.xlu0 %3401  ;;  %v3438_v34 = vmul.f32 %v5400_v58, %v7227_v40  ;;  %v5494_v52 = vld [vmem:[%s7604_s4 + $0x18] sm:$0xff] }
 0xebd   :  { %v5402_v7 = vpop.eup %5401  ;;  %5411 = vrcp.f32 %v3402_v23 }
 0xebe   :  { %v3405_v41 = vpop.xlane.xlu1 %3404  ;;  %4971 = vmatmul.mubr.msk.bf16.vlgmr.msra.gmra.mrb[92].mxu1 %vm243_vm1, %v3451_v10  ;;  %v3439_v12 = vmul.f32 %v5402_v7, %v7232_v35  ;;  %v5495_v10 = vld [vmem:[%s7604_s4 + $0x38] sm:$0xff] }
 0xebf   :  { %v5404_v39 = vpop.eup %5403  ;;  %5413 = vrcp.f32 %v3405_v41  ;;  %v5496_v41 = vld [vmem:[%s7604_s4 + $0x8] sm:$0xff] }
 0xec0   :  { %v3408_v63 = vpop.xlane.xlu0 %3407  ;;  %v3452_v50 = vpack.c.bf16 %v3439_v12, %v3438_v34  ;;  %v3440_v43 = vmul.f32 %v5404_v39, %v7237_v6  ;;  %v5497_v39 = vld [vmem:[%s7604_s4 + $0x28] sm:$0xff] }
 0xec1   :  { %v5406_v0 = vpop.eup %5405  ;;  %5415 = vrcp.f32 %v3408_v63 }
 0xec2   :  { %v3411_v32 = vpop.xlane.xlu1 %3410  ;;  %4974 = vmatprep.mubr.msk.bf16.mxu1 %vm243_vm1, %v3452_v50  ;;  %v3441_v30 = vmul.f32 %v5406_v0, %v7242_v46 }
 0xec3   :  { %v5408_v60 = vpop.eup %5407  ;;  %5417 = vrcp.f32 %v3411_v32 }
 0xec4   :  { %v3414_v4 = vpop.xlane.xlu0 %3413  ;;  %v3453_v15 = vpack.c.bf16 %v3441_v30, %v3440_v43  ;;  %v3442_v47 = vmul.f32 %v5408_v60, %v7247_v61  ;;  %v5498_v43 = vld [vmem:[%s7604_s4 + $0x50] sm:$0xff] }
 0xec5   :  { %v5410_v40 = vpop.eup %5409  ;;  %5419 = vrcp.f32 %v3414_v4  ;;  %v5499_v4 = vld [vmem:[%s7604_s4 + $0x40] sm:$0xff] }
 0xec6   :  { %v3417_v35 = vpop.xlane.xlu1 %3416  ;;  %4975 = vmatmul.mubr.msk.bf16.gmra.mrb[96].mxu1 %vm243_vm1, %v3453_v15  ;;  %v3443_v11 = vmul.f32 %v5410_v40, %v7252_v45 }
 0xec7   :  { %v5412_v55 = vpop.eup %5411  ;;  %5421 = vrcp.f32 %v3417_v35 }
 0xec8   :  { %v3454_v3 = vpack.c.bf16 %v3443_v11, %v3442_v47  ;;  %v3444_v6 = vmul.f32 %v5412_v55, %v7256_v9  ;;  %v5500_v47 = vld [vmem:[%s7604_s4 + $0x58] sm:$0xff] }
 0xec9   :  { %v5414_v36 = vpop.eup %5413 }
 0xeca   :  { %4978 = vmatprep.mubr.msk.bf16.mxu1 %vm243_vm1, %v3454_v3  ;;  %v3445_v46 = vmul.f32 %v5414_v36, %v7260_v37  ;;  %v5089_v37 = vld [vmem:[%s7561_s13 + $0x10] sm:$0xff]   ;;  %v5501_v36 = vld [vmem:[%s7604_s4 + $0x48] sm:$0xff] }
 0xecb   :  { %v5416_v44 = vpop.eup %5415  ;;  %4986 = vmatprep.subr.bf16.mxu0 %v5089_v37 }
 0xecc   :  { %v3455_v8 = vpack.c.bf16 %v3445_v46, %v3444_v6  ;;  %v3446_v29 = vmul.f32 %v5416_v44, %v7264_v1  ;;  %v5090_v1 = vld [vmem:[%s7561_s13 + $0x18] sm:$0xff]   ;;  %4987 = vmatpush3.bf16.msra.mxu0 %v5089_v37 }
 0xecd   :  { %v5418_v13 = vpop.eup %5417  ;;  %4988 = vmatprep.subr.bf16.mxu0 %v5090_v1 }
 0xece   :  { %4979 = vmatmul.mubr.msk.bf16.gmra.mrb[100].mxu1 %vm243_vm1, %v3455_v8  ;;  %v3447_v61 = vmul.f32 %v5418_v13, %v7268_v5  ;;  %v5502_v13 = vld [vmem:[%s7604_s4 + $0x70] sm:$0xff] }
 0xecf   :  { %v5420_v45 = vpop.eup %5419 }
 0xed0   :  { %v3456_v21 = vpack.c.bf16 %v3447_v61, %v3446_v29  ;;  %v3448_v17 = vmul.f32 %v5420_v45, %v7272_v48  ;;  %4989 = vmatpush3.bf16.msra.mxu0 %v5090_v1  ;;  %v5503_v45 = vld [vmem:[%s7604_s4 + $0x60] sm:$0xff] }
 0xed1   :  { %v5422_v22 = vpop.eup %5421 }
 0xed2   :  { %4982 = vmatprep.mubr.msk.bf16.mxu1 %vm243_vm1, %v3456_v21  ;;  %v3449_v9 = vmul.f32 %v5422_v22, %v7276_v57 }
 0xed4   :  { %v3457_v42 = vpack.c.bf16 %v3449_v9, %v3448_v17  ;;  %v5504_v9 = vld [vmem:[%s7604_s4 + $0x78] sm:$0xff] }
 0xed6   :  { %4983 = vmatmul.mubr.msk.bf16.gmra.mrb[104].mxu1 %vm243_vm1, %v3457_v42 }
 0xf71   :  { %v4932_v5 = vpop.f32.mrb[76].mxu1 }
 0xf72   :  { %v3032_v33 = vpop.f32.mrb[77].mxu1  ;;  %v3097_v28 = vmul.f32 %v7340_v24, %v4932_v5  ;;  %v5505_v5 = vld [vmem:[%s7604_s4 + $0x68] sm:$0xff] }
 0xf73   :  { %v4933_v48 = vpop.f32.mrb[78].mxu1  ;;  %v3095_v25 = vmul.f32 %v5492_v38, %v3032_v33 }
 0xf74   :  { %v3035_v19 = vpop.f32.mrb[79].mxu1  ;;  %v3098_v51 = vmul.f32 %v5494_v52, %v4933_v48 }
 0xf75   :  { %v3096_v34 = vmul.f32 %v5496_v41, %v3035_v19 }
 0xf79   :  { %v4936_v57 = vpop.f32.mrb[80].mxu1 }
 0xf7a   :  { %v3101_v26 = vmul.f32 %v7346_v2, %v4936_v57  ;;  %v3048_v16 = vpop.f32.mrb[81].mxu1 }
 0xf7b   :  { %v3099_v20 = vmul.f32 %v5493_v14, %v3048_v16  ;;  %v4937_v53 = vpop.f32.mrb[82].mxu1 }
 0xf7c   :  { %v3113_v58 = vadd.f32 %v3101_v26, %v3097_v28  ;;  %v3102_v23 = vmul.f32 %v5495_v10, %v4937_v53  ;;  %v3051_v7 = vpop.f32.mrb[83].mxu1 }
 0xf7d   :  { %v3111_v12 = vadd.f32 %v3099_v20, %v3095_v25  ;;  %v3100_v63 = vmul.f32 %v5497_v39, %v3051_v7 }
 0xf7e   :  { %v3114_v50 = vadd.f32 %v3102_v23, %v3098_v51 }
 0xf7f   :  { %v3112_v0 = vadd.f32 %v3100_v63, %v3096_v34 }
 0xf81   :  { %v4940_v32 = vpop.f32.mrb[84].mxu1 }
 0xf82   :  { %v3105_v30 = vmul.f32 %v5498_v43, %v4940_v32  ;;  %v3064_v60 = vpop.f32.mrb[85].mxu1 }
 0xf83   :  { %v3103_v15 = vmul.f32 %v5499_v4, %v3064_v60  ;;  %v4941_v40 = vpop.f32.mrb[86].mxu1 }
 0xf84   :  { %v3117_v35 = vadd.f32 %v3113_v58, %v3105_v30  ;;  %v3106_v11 = vmul.f32 %v5500_v47, %v4941_v40  ;;  %v3067_v55 = vpop.f32.mrb[87].mxu1 }
 0xf85   :  { %v3115_v3 = vadd.f32 %v3111_v12, %v3103_v15  ;;  %v3104_v6 = vmul.f32 %v5501_v36, %v3067_v55 }
 0xf86   :  { %v3118_v46 = vadd.f32 %v3114_v50, %v3106_v11 }
 0xf87   :  { %v3116_v44 = vadd.f32 %v3112_v0, %v3104_v6 }
 0xf89   :  { %v4944_v8 = vpop.f32.mrb[88].mxu1 }
 0xf8a   :  { %v3109_v29 = vmul.f32 %v5502_v13, %v4944_v8  ;;  %v3080_v61 = vpop.f32.mrb[89].mxu1 }
 0xf8b   :  { %v3107_v21 = vmul.f32 %v5503_v45, %v3080_v61  ;;  %v4945_v22 = vpop.f32.mrb[90].mxu1 }
 0xf8c   :  { %v3121_v17 = vadd.f32 %v3117_v35, %v3109_v29  ;;  %v3110_v42 = vmul.f32 %v5504_v9, %v4945_v22  ;;  %v3083_v37 = vpop.f32.mrb[91].mxu1 }
 0xf8d   :  { %v3119_v1 = vadd.f32 %v3115_v3, %v3107_v21  ;;  %v3108_v33 = vmul.f32 %v5505_v5, %v3083_v37 }
 0xf8e   :  { %v3122_v48 = vadd.f32 %v3118_v46, %v3110_v42 }
 0xf8f   :  { %v3120_v19 = vadd.f32 %v3116_v44, %v3108_v33 }
 0xf90   :  { %v3608_v57 = vpack.c.bf16 %v3122_v48, %v3121_v17 }
 0xf91   :  { %v3607_v28 = vpack.c.bf16 %v3120_v19, %v3119_v1  ;;  %v4972_v26 = vpop.f32.mrb[92].mxu1 }
 0xf92   :  { %v3516_v16 = vpop.f32.mrb[93].mxu1  ;;  %v3581_v51 = vmul.f32 %v7340_v24, %v4972_v26 }
 0xf93   :  { %v4973_v25 = vpop.f32.mrb[94].mxu1  ;;  %4990 = vmatprep.mubr.msk.bf16.mxu0 %vm243_vm1, %v3607_v28  ;;  %v3579_v7 = vmul.f32 %v5492_v38, %v3516_v16 }
 0xf94   :  { %v3519_v20 = vpop.f32.mrb[95].mxu1  ;;  %4991 = vmatmul.mubr.msk.bf16.vlgmr.msra.gmra.mrb[100].mxu0 %vm243_vm1, %v3608_v57  ;;  %v3582_v63 = vmul.f32 %v5494_v52, %v4973_v25 }
 0xf95   :  { %v3580_v30 = vmul.f32 %v5496_v41, %v3519_v20 }
 0xf99   :  { %v4976_v53 = vpop.f32.mrb[96].mxu1 }
 0xf9a   :  { %v3585_v58 = vmul.f32 %v7346_v2, %v4976_v53  ;;  %v3532_v23 = vpop.f32.mrb[97].mxu1 }
 0xf9b   :  { %v3583_v34 = vmul.f32 %v5493_v14, %v3532_v23  ;;  %v4977_v12 = vpop.f32.mrb[98].mxu1 }
 0xf9c   :  { %v3597_v50 = vadd.f32 %v3585_v58, %v3581_v51  ;;  %v3586_v0 = vmul.f32 %v5495_v10, %v4977_v12  ;;  %v3535_v32 = vpop.f32.mrb[99].mxu1 }
 0xf9d   :  { %v3595_v60 = vadd.f32 %v3583_v34, %v3579_v7  ;;  %v3584_v15 = vmul.f32 %v5497_v39, %v3535_v32 }
 0xf9e   :  { %v3598_v40 = vadd.f32 %v3586_v0, %v3582_v63 }
 0xf9f   :  { %v3596_v35 = vadd.f32 %v3584_v15, %v3580_v30 }
 0xfa1   :  { %v4980_v11 = vpop.f32.mrb[100].mxu1 }
 0xfa2   :  { %v3589_v55 = vmul.f32 %v5498_v43, %v4980_v11  ;;  %v3548_v3 = vpop.f32.mrb[101].mxu1 }
 0xfa3   :  { %v3587_v6 = vmul.f32 %v5499_v4, %v3548_v3  ;;  %v4981_v24 = vpop.f32.mrb[102].mxu1 }
 0xfa4   :  { %v3601_v46 = vadd.f32 %v3597_v50, %v3589_v55  ;;  %v3590_v2 = vmul.f32 %v5500_v47, %v4981_v24  ;;  %v3551_v44 = vpop.f32.mrb[103].mxu1  ;;  %v4460_v47 = vld [vmem:[%s7562_s14 + $0x1] ss:$0 sm:$0xff] }
 0xfa5   :  { %v3599_v38 = vadd.f32 %v3595_v60, %v3587_v6  ;;  %v3588_v14 = vmul.f32 %v5501_v36, %v3551_v44 }
 0xfa6   :  { %v3602_v8 = vadd.f32 %v3598_v40, %v3590_v2 }
 0xfa7   :  { %v3600_v52 = vadd.f32 %v3596_v35, %v3588_v14 }
 0xfa9   :  { %v4984_v29 = vpop.f32.mrb[104].mxu1 }
 0xfaa   :  { %v3593_v10 = vmul.f32 %v5502_v13, %v4984_v29  ;;  %v3564_v61 = vpop.f32.mrb[105].mxu1 }
 0xfab   :  { %v3591_v41 = vmul.f32 %v5503_v45, %v3564_v61  ;;  %v4985_v21 = vpop.f32.mrb[106].mxu1 }
 0xfac   :  { %v3605_v39 = vadd.f32 %v3601_v46, %v3593_v10  ;;  %v3594_v22 = vmul.f32 %v5504_v9, %v4985_v21  ;;  %v3567_v17 = vpop.f32.mrb[107].mxu1 }
 0xfad   :  { %v3603_v42 = vadd.f32 %v3599_v38, %v3591_v41  ;;  %v3592_v43 = vmul.f32 %v5505_v5, %v3567_v17 }
 0xfae   :  { %v3606_v37 = vadd.f32 %v3602_v8, %v3594_v22 }
 0xfaf   :  { %v3604_v4 = vadd.f32 %v3600_v52, %v3592_v43 }
 0xfb0   :  { %v3610_v1 = vpack.c.bf16 %v3606_v37, %v3605_v39 }
 0xfb1   :  { %v3609_v33 = vpack.c.bf16 %v3604_v4, %v3603_v42 }
 0xfb3   :  { %4994 = vmatprep.mubr.msk.bf16.mxu0 %vm243_vm1, %v3609_v33 }
 0xfb4   :  { %4995 = vmatmul.mubr.msk.bf16.gmra.mrb[104].mxu0 %vm243_vm1, %v3610_v1 }
0x1067   :  { %v4992_v36 = vpop.f32.mrb[100].mxu0 }
0x1068   :  { %v3682_v13 = vpop.f32.mrb[101].mxu0  ;;  %v3691_v45 = vadd.f32 %v4992_v36, %v4460_v47 }
0x1069   :  { %v3683_v48 = vadd.f32 %v4460_v47, %v3682_v13  ;;  %v4993_v9 = vpop.f32.mrb[102].mxu0 }
0x106a   :  { %v3685_v19 = vpop.f32.mrb[103].mxu0  ;;  %v3694_v57 = vadd.f32 %v4993_v9, %v4460_v47  ;;  %v3715_v26 = vadd.f32 %v3691_v45, %v6620_v59 }
0x106b   :  { %v7401_v5 = vadd.f32 %v3683_v48, %v6617_v27  ;;  %v3686_v28 = vadd.f32 %v4460_v47, %v3685_v19 }
0x106c   :  { %v3716_v20 = vadd.f32 %v3694_v57, %v6628_v62  ;;  %v3731_v51 = vsel %vm243_vm1, %v3715_v26, 0.0 }
0x106d   :  { %v3714_v16 = vadd.f32 %v3686_v28, %v6623_v31  ;;  %v3725_v25 = vsel %vm243_vm1, %v7401_v5, 0.0 }
0x106e   :  { %3726 = vadd.xlane.f32.xlu0 %v3725_v25  ;;  %v3734_v27 = vsel %vm243_vm1, %v3716_v20, 0.0 }
0x106f   :  { %v3728_v53 = vsel %vm243_vm1, %v3714_v16, 0.0 }
0x1070   :  { %3729 = vadd.xlane.f32.xlu1 %v3728_v53 }
0x1072   :  { %3732 = vadd.xlane.f32.xlu0 %v3731_v51 }
0x1074   :  { %3735 = vadd.xlane.f32.xlu1 %v3734_v27 }
0x1087   :  { %v4996_v58 = vpop.f32.mrb[104].mxu0 }
0x1088   :  { %v3698_v23 = vpop.f32.mrb[105].mxu0  ;;  %v3707_v59 = vadd.f32 %v4996_v58, %v4460_v47 }
0x1089   :  { %v3699_v7 = vadd.f32 %v4460_v47, %v3698_v23  ;;  %v4997_v31 = vpop.f32.mrb[106].mxu0 }
0x108a   :  { %v3701_v34 = vpop.f32.mrb[107].mxu0  ;;  %v3710_v63 = vadd.f32 %v4997_v31, %v4460_v47  ;;  %v3719_v50 = vadd.f32 %v3707_v59, %v6640_v18 }
0x108b   :  { %v7412_v12 = vadd.f32 %v3699_v7, %v6637_v49  ;;  %v3702_v62 = vadd.f32 %v4460_v47, %v3701_v34 }
0x108c   :  { %v3720_v30 = vadd.f32 %v3710_v63, %v6648_v54  ;;  %v3743_v15 = vsel %vm243_vm1, %v3719_v50, 0.0 }
0x108d   :  { %v3718_v0 = vadd.f32 %v3702_v62, %v6643_v56  ;;  %v3737_v32 = vsel %vm243_vm1, %v7412_v12, 0.0 }
0x108e   :  { %3738 = vadd.xlane.f32.xlu0 %v3737_v32  ;;  %v3746_v49 = vsel %vm243_vm1, %v3720_v30, 0.0 }
0x108f   :  { %v3740_v60 = vsel %vm243_vm1, %v3718_v0, 0.0 }
0x1090   :  { %3741 = vadd.xlane.f32.xlu1 %v3740_v60 }
0x1092   :  { %3744 = vadd.xlane.f32.xlu0 %v3743_v15 }
0x1094   :  { %3747 = vadd.xlane.f32.xlu1 %v3746_v49  ;;  %v4470_v49 = vld [vmem:[%s7564_s16 + $0x1] ss:$0 sm:$0xff] }
0x10fb   :  { %v3727_v40 = vpop.xlane.xlu0 %3726 }
0x10fc   :  { %v3749_v35 = vmul.f32 0.03125, %v3727_v40 }
0x10fd   :  { %v3730_v18 = vpop.xlane.xlu1 %3729 }
0x10fe   :  { %v7423_v56 = vsub.f32 %v7401_v5, %v3749_v35  ;;  %v3750_v11 = vmul.f32 0.03125, %v3730_v18 }
0x10ff   :  { %v3733_v55 = vpop.xlane.xlu0 %3732 }
0x1100   :  { %v7425_v3 = vsub.f32 %v3714_v16, %v3750_v11  ;;  %v3751_v54 = vmul.f32 0.03125, %v3733_v55  ;;  %v3765_v6 = vmul.f32 %v7423_v56, %v7423_v56  ;;  %v5092_v16 = vld [vmem:[%s7565_s17 + $0x18] sm:$0xff]  }
0x1101   :  { %v3736_v24 = vpop.xlane.xlu1 %3735 }
0x1102   :  { %v7429_v46 = vsub.f32 %v3715_v26, %v3751_v54  ;;  %v3752_v2 = vmul.f32 0.03125, %v3736_v24  ;;  %v3773_v44 = vsel %vm243_vm1, %v3765_v6, 0.0  ;;  %v3766_v38 = vmul.f32 %v7425_v3, %v7425_v3  ;;  %v5091_v26 = vld [vmem:[%s7565_s17 + $0x10] sm:$0xff]  }
0x1103   :  { %3774 = vadd.xlane.f32.xlu0 %v3773_v44  ;;  %4998 = vmatprep.subr.bf16.mxu1 %v5091_v26 }
0x1104   :  { %v7434_v14 = vsub.f32 %v3716_v20, %v3752_v2  ;;  %v3776_v8 = vsel %vm243_vm1, %v3766_v38, 0.0  ;;  %v3767_v52 = vmul.f32 %v7429_v46, %v7429_v46  ;;  %4999 = vmatpush3.bf16.msra.mxu1 %v5091_v26 }
0x1105   :  { %3777 = vadd.xlane.f32.xlu1 %v3776_v8  ;;  %5000 = vmatprep.subr.bf16.mxu1 %v5092_v16 }
0x1106   :  { %v3779_v29 = vsel %vm243_vm1, %v3767_v52, 0.0  ;;  %v3768_v10 = vmul.f32 %v7434_v14, %v7434_v14 }
0x1107   :  { %3780 = vadd.xlane.f32.xlu0 %v3779_v29 }
0x1108   :  { %v3782_v61 = vsel %vm243_vm1, %v3768_v10, 0.0  ;;  %5001 = vmatpush3.bf16.msra.mxu1 %v5092_v16 }
0x1109   :  { %3783 = vadd.xlane.f32.xlu1 %v3782_v61 }
0x111b   :  { %v3739_v41 = vpop.xlane.xlu0 %3738 }
0x111c   :  { %v3753_v21 = vmul.f32 0.03125, %v3739_v41 }
0x111d   :  { %v3742_v39 = vpop.xlane.xlu1 %3741 }
0x111e   :  { %v7444_v22 = vsub.f32 %v7412_v12, %v3753_v21  ;;  %v3754_v17 = vmul.f32 0.03125, %v3742_v39 }
0x111f   :  { %v3745_v42 = vpop.xlane.xlu0 %3744 }
0x1120   :  { %v7446_v43 = vsub.f32 %v3718_v0, %v3754_v17  ;;  %v3755_v37 = vmul.f32 0.03125, %v3745_v42  ;;  %v3769_v4 = vmul.f32 %v7444_v22, %v7444_v22 }
0x1121   :  { %v3748_v1 = vpop.xlane.xlu1 %3747 }
0x1122   :  { %v7450_v33 = vsub.f32 %v3719_v50, %v3755_v37  ;;  %v3756_v47 = vmul.f32 0.03125, %v3748_v1  ;;  %v3785_v36 = vsel %vm243_vm1, %v3769_v4, 0.0  ;;  %v3770_v13 = vmul.f32 %v7446_v43, %v7446_v43  ;;  %v4469_v50 = vld [vmem:[%s7563_s15 + $0x1] ss:$0 sm:$0xff] }
0x1123   :  { %3786 = vadd.xlane.f32.xlu0 %v3785_v36 }
0x1124   :  { %v7455_v45 = vsub.f32 %v3720_v30, %v3756_v47  ;;  %v3788_v48 = vsel %vm243_vm1, %v3770_v13, 0.0  ;;  %v3771_v9 = vmul.f32 %v7450_v33, %v7450_v33 }
0x1125   :  { %3789 = vadd.xlane.f32.xlu1 %v3788_v48 }
0x1126   :  { %v3791_v19 = vsel %vm243_vm1, %v3771_v9, 0.0  ;;  %v3772_v57 = vmul.f32 %v7455_v45, %v7455_v45 }
0x1127   :  { %3792 = vadd.xlane.f32.xlu0 %v3791_v19 }
0x1128   :  { %v3794_v28 = vsel %vm243_vm1, %v3772_v57, 0.0 }
0x1129   :  { %3795 = vadd.xlane.f32.xlu1 %v3794_v28 }
0x1190   :  { %v3775_v25 = vpop.xlane.xlu0 %3774 }
0x1191   :  { %v3797_v20 = vmul.f32 0.03125, %v3775_v25 }
0x1192   :  { %v3778_v53 = vpop.xlane.xlu1 %3777 }
0x1193   :  { %v3805_v51 = vadd.f32 1e-06, %v3797_v20  ;;  %v3798_v27 = vmul.f32 0.03125, %v3778_v53 }
0x1194   :  { %v3781_v58 = vpop.xlane.xlu0 %3780 }
0x1195   :  { %5423 = vrsqrt.f32 %v3805_v51  ;;  %v3806_v23 = vadd.f32 1e-06, %v3798_v27  ;;  %v3799_v59 = vmul.f32 0.03125, %v3781_v58  ;;  %v5096_v51 = vld [vmem:[%s7567_s19 + $0x58] sm:$0xff]   ;;  %v5097_v27 = vld [vmem:[%s7567_s19 + $0x60] sm:$0xff]   ;;  %v5098_v58 = vld [vmem:[%s7567_s19 + $0x68] sm:$0xff]  }
0x1196   :  { %v3784_v7 = vpop.xlane.xlu1 %3783 }
0x1197   :  { %5425 = vrsqrt.f32 %v3806_v23  ;;  %v3807_v31 = vadd.f32 1e-06, %v3799_v59  ;;  %v3800_v34 = vmul.f32 0.03125, %v3784_v7  ;;  %v5099_v23 = vld [vmem:[%s7567_s19 + $0x70] sm:$0xff]   ;;  %v5100_v59 = vld [vmem:[%s7567_s19 + $0x78] sm:$0xff]  }
0x1198   :  { %v4476_v7 = vld [vmem:[%s7566_s18 + $0x1] ss:$0 sm:$0xff] }
0x1199   :  { %5427 = vrsqrt.f32 %v3807_v31  ;;  %v3808_v63 = vadd.f32 1e-06, %v3800_v34 }
0x119b   :  { %5429 = vrsqrt.f32 %v3808_v63 }
0x119f   :  { %v5424_v62 = vpop.eup %5423 }
0x11a0   :  { %v3821_v0 = vmul.f32 %v5424_v62, %v7423_v56 }
0x11a1   :  { %v5426_v32 = vpop.eup %5425 }
0x11a2   :  { %v3822_v30 = vmul.f32 %v5426_v32, %v7425_v3  ;;  %v3835_v60 = vmul.f32 %v4469_v50, %v3821_v0 }
0x11a3   :  { %v5428_v15 = vpop.eup %5427 }
0x11a4   :  { %v3823_v40 = vmul.f32 %v5428_v15, %v7429_v46  ;;  %v3836_v35 = vmul.f32 %v4469_v50, %v3822_v30  ;;  %v3849_v54 = vadd.f32 %v4470_v49, %v3835_v60 }
0x11a5   :  { %v5430_v18 = vpop.eup %5429 }
0x11a6   :  { %v3837_v11 = vmul.f32 %v4469_v50, %v3823_v40  ;;  %v3824_v55 = vmul.f32 %v5430_v18, %v7434_v14  ;;  %v3850_v6 = vadd.f32 %v4470_v49, %v3836_v35 }
0x11a8   :  { %v3838_v24 = vmul.f32 %v4469_v50, %v3824_v55  ;;  %v3857_v56 = vpack.c.bf16 %v3850_v6, %v3849_v54  ;;  %v3851_v2 = vadd.f32 %v4470_v49, %v3837_v11 }
0x11aa   :  { %v3852_v44 = vadd.f32 %v4470_v49, %v3838_v24  ;;  %5002 = vmatprep.mubr.msk.bf16.mxu1 %vm243_vm1, %v3857_v56 }
0x11ac   :  { %v3858_v3 = vpack.c.bf16 %v3852_v44, %v3851_v2 }
0x11ae   :  { %5003 = vmatmul.mubr.msk.bf16.vlgmr.msra.gmra.mrb[108].mxu1 %vm243_vm1, %v3858_v3 }
0x11b0   :  { %v3787_v38 = vpop.xlane.xlu0 %3786 }
0x11b1   :  { %v3801_v8 = vmul.f32 0.03125, %v3787_v38 }
0x11b2   :  { %v3790_v52 = vpop.xlane.xlu1 %3789 }
0x11b3   :  { %v3809_v46 = vadd.f32 1e-06, %v3801_v8  ;;  %v3802_v29 = vmul.f32 0.03125, %v3790_v52 }
0x11b4   :  { %v3793_v10 = vpop.xlane.xlu0 %3792 }
0x11b5   :  { %5431 = vrsqrt.f32 %v3809_v46  ;;  %v3810_v61 = vadd.f32 1e-06, %v3802_v29  ;;  %v3803_v14 = vmul.f32 0.03125, %v3793_v10 }
0x11b6   :  { %v3796_v41 = vpop.xlane.xlu1 %3795 }
0x11b7   :  { %5433 = vrsqrt.f32 %v3810_v61  ;;  %v3811_v21 = vadd.f32 1e-06, %v3803_v14  ;;  %v3804_v39 = vmul.f32 0.03125, %v3796_v41 }
0x11b9   :  { %5435 = vrsqrt.f32 %v3811_v21  ;;  %v3812_v17 = vadd.f32 1e-06, %v3804_v39 }
0x11bb   :  { %5437 = vrsqrt.f32 %v3812_v17 }
0x11bf   :  { %v5432_v42 = vpop.eup %5431 }
0x11c0   :  { %v3825_v37 = vmul.f32 %v5432_v42, %v7444_v22 }
0x11c1   :  { %v5434_v4 = vpop.eup %5433 }
0x11c2   :  { %v3826_v1 = vmul.f32 %v5434_v4, %v7446_v43  ;;  %v3839_v47 = vmul.f32 %v4469_v50, %v3825_v37  ;;  %v5093_v43 = vld [vmem:[%s7567_s19 + $0x40] sm:$0xff]  }
0x11c3   :  { %v5436_v36 = vpop.eup %5435  ;;  %5010 = vmatprep.subr.bf16.mxu0 %v5093_v43 }
0x11c4   :  { %v3827_v13 = vmul.f32 %v5436_v36, %v7450_v33  ;;  %v3840_v48 = vmul.f32 %v4469_v50, %v3826_v1  ;;  %v3853_v57 = vadd.f32 %v4470_v49, %v3839_v47  ;;  %5011 = vmatpush3.bf16.msra.mxu0 %v5093_v43  ;;  %v5094_v33 = vld [vmem:[%s7567_s19 + $0x48] sm:$0xff]  }
0x11c5   :  { %v5438_v9 = vpop.eup %5437  ;;  %5012 = vmatprep.subr.bf16.mxu0 %v5094_v33 }
0x11c6   :  { %v3828_v19 = vmul.f32 %v5438_v9, %v7455_v45  ;;  %v3854_v28 = vadd.f32 %v4470_v49, %v3840_v48  ;;  %v3841_v26 = vmul.f32 %v4469_v50, %v3827_v13  ;;  %v5095_v45 = vld [vmem:[%s7567_s19 + $0x50] sm:$0xff]  }
0x11c8   :  { %v3859_v16 = vpack.c.bf16 %v3854_v28, %v3853_v57  ;;  %v3842_v25 = vmul.f32 %v4469_v50, %v3828_v19  ;;  %v3855_v20 = vadd.f32 %v4470_v49, %v3841_v26  ;;  %5013 = vmatpush3.bf16.msra.mxu0 %v5094_v33 }
0x11c9   :  { %5014 = vmatprep.subr.bf16.mxu0 %v5095_v45 }
0x11ca   :  { %5006 = vmatprep.mubr.msk.bf16.mxu1 %vm243_vm1, %v3859_v16  ;;  %v3856_v22 = vadd.f32 %v4470_v49, %v3842_v25 }
0x11cc   :  { %v3860_v53 = vpack.c.bf16 %v3856_v22, %v3855_v20  ;;  %5015 = vmatpush3.bf16.msra.mxu0 %v5095_v45 }
0x11cd   :  { %5016 = vmatprep.subr.bf16.mxu0 %v5096_v51 }
0x11ce   :  { %5007 = vmatmul.mubr.msk.bf16.gmra.mrb[112].mxu1 %vm243_vm1, %v3860_v53 }
0x11d0   :  { %5017 = vmatpush3.bf16.msra.mxu0 %v5096_v51 }
0x11d1   :  { %5018 = vmatprep.subr.bf16.mxu0 %v5097_v27 }
0x11d4   :  { %5019 = vmatpush3.bf16.msra.mxu0 %v5097_v27 }
0x11d5   :  { %5020 = vmatprep.subr.bf16.mxu0 %v5098_v58 }
0x11d8   :  { %5021 = vmatpush3.bf16.msra.mxu0 %v5098_v58 }
0x11d9   :  { %5022 = vmatprep.subr.bf16.mxu0 %v5099_v23 }
0x11dc   :  { %5023 = vmatpush3.bf16.msra.mxu0 %v5099_v23 }
0x11dd   :  { %5024 = vmatprep.subr.bf16.mxu0 %v5100_v59 }
0x11e0   :  { %5025 = vmatpush3.bf16.msra.mxu0 %v5100_v59 }
0x1281   :  { %v5004_v31 = vpop.f32.mrb[108].mxu1 }
0x1282   :  { %v3941_v34 = vadd.f32 %v5004_v31, %v4476_v7  ;;  %v3932_v63 = vpop.f32.mrb[109].mxu1 }
0x1283   :  { %v3933_v62 = vadd.f32 %v4476_v7, %v3932_v63  ;;  %v5005_v50 = vpop.f32.mrb[110].mxu1 }
0x1284   :  { %v3965_v0 = vmul.f32 %v3941_v34, %v3941_v34  ;;  %v3944_v32 = vadd.f32 %v5005_v50, %v4476_v7  ;;  %v3935_v30 = vpop.f32.mrb[111].mxu1 }
0x1285   :  { %v3963_v60 = vmul.f32 %v3933_v62, %v3933_v62  ;;  %v3936_v15 = vadd.f32 %v4476_v7, %v3935_v30 }
0x1286   :  { %v3973_v49 = vmul.f32 %v3965_v0, %v3941_v34  ;;  %v3966_v40 = vmul.f32 %v3944_v32, %v3944_v32 }
0x1287   :  { %v3971_v35 = vmul.f32 %v3963_v60, %v3933_v62  ;;  %v3964_v18 = vmul.f32 %v3936_v15, %v3936_v15 }
0x1288   :  { %v3981_v11 = vmul.f32 0.044715, %v3973_v49  ;;  %v3974_v55 = vmul.f32 %v3966_v40, %v3944_v32 }
0x1289   :  { %v3979_v54 = vmul.f32 0.044715, %v3971_v35  ;;  %v3972_v6 = vmul.f32 %v3964_v18, %v3936_v15 }
0x128a   :  { %v3989_v24 = vadd.f32 %v3981_v11, %v3941_v34  ;;  %v3982_v56 = vmul.f32 0.044715, %v3974_v55 }
0x128b   :  { %v3987_v2 = vadd.f32 %v3979_v54, %v3933_v62  ;;  %v3980_v44 = vmul.f32 0.044715, %v3972_v6 }
0x128c   :  { %v3997_v3 = vmul.f32 0.7978846, %v3989_v24  ;;  %v3990_v38 = vadd.f32 %v3982_v56, %v3944_v32 }
0x128d   :  { %v3995_v8 = vmul.f32 0.7978846, %v3987_v2  ;;  %v3988_v52 = vadd.f32 %v3980_v44, %v3936_v15 }
0x128e   :  { %5439 = vtanh.f32 %v3997_v3  ;;  %v3998_v46 = vmul.f32 0.7978846, %v3990_v38 }
0x128f   :  { %5441 = vtanh.f32 %v3995_v8  ;;  %v3996_v29 = vmul.f32 0.7978846, %v3988_v52 }
0x1290   :  { %5443 = vtanh.f32 %v3998_v46 }
0x1291   :  { %5445 = vtanh.f32 %v3996_v29 }
0x1298   :  { %v5440_v10 = vpop.eup %5439 }
0x1299   :  { %v5442_v61 = vpop.eup %5441  ;;  %v4013_v14 = vadd.f32 1.0, %v5440_v10 }
0x129a   :  { %v5444_v41 = vpop.eup %5443  ;;  %v4011_v21 = vadd.f32 1.0, %v5442_v61 }
0x129b   :  { %v5446_v39 = vpop.eup %5445  ;;  %v4021_v17 = vmul.f32 0.5, %v4013_v14  ;;  %v4014_v42 = vadd.f32 1.0, %v5444_v41 }
0x129c   :  { %v4012_v37 = vadd.f32 1.0, %v5446_v39  ;;  %v4019_v4 = vmul.f32 0.5, %v4011_v21 }
0x129d   :  { %v4022_v1 = vmul.f32 0.5, %v4014_v42  ;;  %v4029_v36 = vmul.f32 %v4021_v17, %v3941_v34  ;;  %v4500_v17 = vld [vmem:[%s7568_s20 + $0x1] ss:$0 sm:$0xff] }
0x129e   :  { %v4020_v47 = vmul.f32 0.5, %v4012_v37  ;;  %v4027_v48 = vmul.f32 %v4019_v4, %v3933_v62 }
0x129f   :  { %v4030_v13 = vmul.f32 %v4022_v1, %v3944_v32 }
0x12a0   :  { %v4028_v9 = vmul.f32 %v4020_v47, %v3936_v15 }
0x12a1   :  { %v4036_v19 = vpack.c.bf16 %v4030_v13, %v4029_v36  ;;  %v5008_v57 = vpop.f32.mrb[112].mxu1 }
0x12a2   :  { %v3957_v28 = vadd.f32 %v5008_v57, %v4476_v7  ;;  %v3948_v26 = vpop.f32.mrb[113].mxu1  ;;  %v4035_v16 = vpack.c.bf16 %v4028_v9, %v4027_v48 }
0x12a3   :  { %v3949_v25 = vadd.f32 %v4476_v7, %v3948_v26  ;;  %v5009_v20 = vpop.f32.mrb[114].mxu1 }
0x12a4   :  { %v3969_v22 = vmul.f32 %v3957_v28, %v3957_v28  ;;  %v3960_v53 = vadd.f32 %v5009_v20, %v4476_v7  ;;  %v3951_v43 = vpop.f32.mrb[115].mxu1  ;;  %5026 = vmatprep.mubr.bf16.mxu0 %v4035_v16 }
0x12a5   :  { %v3967_v33 = vmul.f32 %v3949_v25, %v3949_v25  ;;  %v3952_v45 = vadd.f32 %v4476_v7, %v3951_v43  ;;  %5027 = vmatmul.mubr.bf16.vlgmr.msra.gmra.mrb[108].mxu0 %v4036_v19 }
0x12a6   :  { %v3977_v51 = vmul.f32 %v3969_v22, %v3957_v28  ;;  %v3970_v27 = vmul.f32 %v3960_v53, %v3960_v53  ;;  %v5101_v22 = vld [vmem:[%s7571_s23] sm:$0xff]  }
0x12a7   :  { %v3975_v58 = vmul.f32 %v3967_v33, %v3949_v25  ;;  %v3968_v23 = vmul.f32 %v3952_v45, %v3952_v45 }
0x12a8   :  { %v3985_v59 = vmul.f32 0.044715, %v3977_v51  ;;  %v3978_v31 = vmul.f32 %v3970_v27, %v3960_v53  ;;  %v4509_v51 = vld [vmem:[%s7569_s21] ss:$0 sm:$0xff]  ;;  %s5506_s21 = scalar_lea.vmem %s4283_s9, 32 }
0x12a9   :  { %v3983_v34 = vmul.f32 0.044715, %v3975_v58  ;;  %v3976_v63 = vmul.f32 %v3968_v23, %v3952_v45  ;;  %v4510_v58 = vld [vmem:[%s7570_s22] ss:$0 sm:$0xff]  ;;  %p5507_p0 = scmp.ne.s32.totalorder %s4283_s9, %s5506_s21  ;;  %p5512_p2 = scmp.lt.s32.totalorder %s5506_s21, %s5506_s21 }
0x12aa   :  { %v3993_v62 = vadd.f32 %v3985_v59, %v3957_v28  ;;  %v3986_v50 = vmul.f32 0.044715, %v3978_v31 }
0x12ab   :  { %v3991_v0 = vadd.f32 %v3983_v34, %v3949_v25  ;;  %v3984_v32 = vmul.f32 0.044715, %v3976_v63  ;;  %v4511_v34 = vld [vmem:[%s7572_s24] ss:$0 sm:$0xff]  ;;  %p5513_p3 = por %p5512_p2, %p5511_p1 }
0x12ac   :  { %v4001_v30 = vmul.f32 0.7978846, %v3993_v62  ;;  %v3994_v60 = vadd.f32 %v3986_v50, %v3960_v53 }
0x12ad   :  { %v3999_v15 = vmul.f32 0.7978846, %v3991_v0  ;;  %v3992_v49 = vadd.f32 %v3984_v32, %v3952_v45  ;;  %p5514_p4 = pnand %p5513_p3, %p5507_p0 }
0x12ae   :  { %5447 = vtanh.f32 %v4001_v30  ;;  %v4002_v40 = vmul.f32 0.7978846, %v3994_v60 }
0x12af   :  { %5449 = vtanh.f32 %v3999_v15  ;;  %v4000_v7 = vmul.f32 0.7978846, %v3992_v49 }
0x12b0   :  { %5451 = vtanh.f32 %v4002_v40 }
0x12b1   :  { %5453 = vtanh.f32 %v4000_v7 }
0x12b8   :  { %v5448_v35 = vpop.eup %5447 }
0x12b9   :  { %v5450_v18 = vpop.eup %5449  ;;  %v4017_v11 = vadd.f32 1.0, %v5448_v35 }
0x12ba   :  { %v5452_v55 = vpop.eup %5451  ;;  %v4015_v54 = vadd.f32 1.0, %v5450_v18 }
0x12bb   :  { %v5454_v6 = vpop.eup %5453  ;;  %v4018_v24 = vadd.f32 1.0, %v5452_v55  ;;  %v4025_v56 = vmul.f32 0.5, %v4017_v11 }
0x12bc   :  { %v4016_v2 = vadd.f32 1.0, %v5454_v6  ;;  %v4023_v44 = vmul.f32 0.5, %v4015_v54 }
0x12bd   :  { %v4026_v3 = vmul.f32 0.5, %v4018_v24  ;;  %v4033_v8 = vmul.f32 %v4025_v56, %v3957_v28 }
0x12be   :  { %v4024_v38 = vmul.f32 0.5, %v4016_v2  ;;  %v4031_v46 = vmul.f32 %v4023_v44, %v3949_v25 }
0x12bf   :  { %v4034_v52 = vmul.f32 %v4026_v3, %v3960_v53  ;;  %v5530_v53 = vmov 0.0  }
0x12c0   :  { %v4032_v29 = vmul.f32 %v4024_v38, %v3952_v45  ;;  %5034 = vmatprep.subr.bf16.mxu1 %v5530_v53  ;;  %5038 = vmatprep.mubr.msk.bf16.mxu1 %vm5531_vm4, %v5530_v53 }
0x12c1   :  { %v4038_v10 = vpack.c.bf16 %v4034_v52, %v4033_v8  ;;  %5035 = vmatpush3.bf16.msra.mxu1 %v5101_v22 }
0x12c2   :  { %v4037_v61 = vpack.c.bf16 %v4032_v29, %v4031_v46  ;;  %5036 = vmatprep.subr.bf16.mxu1 %v5530_v53 }
0x12c4   :  { %5030 = vmatprep.mubr.bf16.mxu0 %v4037_v61 }
0x12c5   :  { %5031 = vmatmul.mubr.bf16.gmra.mrb[112].mxu0 %v4038_v10 }
0x1378   :  { %v5028_v14 = vpop.f32.mrb[108].mxu0 }
0x1379   :  { %v4146_v41 = vpop.f32.mrb[109].mxu0 }
0x137a   :  { %v5029_v21 = vpop.f32.mrb[110].mxu0  ;;  %v4147_v4 = vadd.f32 %v4500_v17, %v4146_v41 }
0x137b   :  { %v4149_v39 = vpop.f32.mrb[111].mxu0 }
0x137c   :  { %v4171_v48 = vadd.f32 %v4147_v4, %v7401_v5  ;;  %v5102_v5 = vld [vmem:[%s7571_s23 + $0x8] sm:$0xff]  }
0x137d   :  { %5037 = vmatpush3.bf16.msra.mxu1 %v5102_v5 }
0x1398   :  { %v5032_v42 = vpop.f32.mrb[112].mxu0 }
0x1399   :  { %v4159_v37 = vpop.f32.mrb[113].mxu0 }
0x139a   :  { %v4160_v1 = vadd.f32 %v4500_v17, %v4159_v37  ;;  %v5033_v47 = vpop.f32.mrb[114].mxu0 }
0x139b   :  { %v4162_v36 = vpop.f32.mrb[115].mxu0 }
0x139c   :  { %v4172_v13 = vadd.f32 %v4160_v1, %v7412_v12 }
0x139e   :  { %v4174_v9 = vrot.slane %v4172_v13, 7 }
0x13a0   :  { %v4177_v19 = vsel %vm4176_vm2, %v4171_v48, %v4174_v9 }
0x13a1   :  { %v4181_v57 = vsel %vm4180_vm3, %v4177_v19, 0.0 }
0x13a2   :  { %4182 = vadd.xlane.f32.xlu0 %v4181_v57 }
0x142f   :  { %v4183_v28 = vpop.xlane.xlu0 %4182 }
0x1430   :  { %v4184_v26 = vmul.f32 0.03125, %v4183_v28 }
0x1432   :  { %v4185_v16 = vsub.f32 %v4177_v19, %v4184_v26 }
0x1434   :  { %v4186_v25 = vmul.f32 %v4185_v16, %v4185_v16 }
0x1436   :  { %v4187_v20 = vsel %vm4180_vm3, %v4186_v25, 0.0 }
0x1437   :  { %4188 = vadd.xlane.f32.xlu1 %v4187_v20 }
0x14c4   :  { %v4189_v12 = vpop.xlane.xlu1 %4188 }
0x14c5   :  { %v4190_v43 = vmul.f32 0.03125, %v4189_v12 }
0x14c7   :  { %v4191_v33 = vadd.f32 1e-06, %v4190_v43 }
0x14c9   :  { %5455 = vrsqrt.f32 %v4191_v33 }
0x14d3   :  { %v5456_v45 = vpop.eup %5455 }
0x14d4   :  { %v4193_v27 = vmul.f32 %v5456_v45, %v4185_v16 }
0x14d6   :  { %v4200_v23 = vmul.f32 %v4509_v51, %v4193_v27 }
0x14d8   :  { %v4207_v59 = vadd.f32 %v4510_v58, %v4200_v23 }
0x14da   :  { %v4208_v31 = vpack.c.bf16 %v4207_v59, %v4207_v59 }
0x14dc   :  { %5039 = vmatmul.mubr.msk.bf16.vlgmr.msra.gmra.mrb[116].mxu1 %vm243_vm1, %v4208_v31 }
0x15af   :  { %v4269_v63 = vpop.f32.mrb[116].mxu1 }
0x15b0   :  { %v4270_v62 = vadd.f32 %v4511_v34, %v4269_v63  ;;  %v5040_v50 = vpop.f32.mrb[117].mxu1 }
0x15b1   :  { %v4272_v0 = vpop.f32.mrb[118].mxu1 }
0x15b2   :  { %4275 = vst [vmem:[#allocation2] sm:$0x3] %v4270_v62  ;;  %v5041_v32 = vpop.f32.mrb[119].mxu1 }
0x15b3   :  { %5517 = shalt.err (!%p5514_p4)
}
0x15b4   :  { %s7608_s13 = sld [smem:[#allocation15_spill]] }
0x15ba   :  { %s5518_s24 = scalar_lea.hbm %s7608_s13, 32 }
0x15bb   :  { %p5519_p5 = scmp.ne.s32.totalorder %s7608_s13, %s5518_s24  ;;  %p5522_p6 = scmp.lt.u32.totalorder %s5518_s24, %s7608_s13 }
0x15bd   :  { %p5524_p7 = pnand %p5522_p6, %p5519_p5 }
0x15bf   :  { %5527 = shalt.err (!%p5524_p7)
}
0x15c0   :  { %4285 = dma.vmem_to_hbm [thread:$0]  %s4283_s9, 32, %s7608_s13, [#allocation3]  }
0x15c1   :  { %5528 = dma.done.wait [#allocation3], 32  }
0x15c2   :  { %5529 = vsyncadd [#allocation3], 4294967264 }
0x15c3   :  { %4289 = vsyncpa [#allocation3], 1 }

</bundles_post_ra>
